<compile_context>
chip_gen: v5e
topology: v5e:2x2
jax: 0.10.0
libtpu: 0.0.40
codegen_flags: <defaults>
</compile_context>

<pallas_src>
import jax
import jax.numpy as jnp
from jax import lax
from jax.experimental import pallas as pl
from jax.experimental.pallas import tpu as pltpu


def _time_block(seq_len):
    for tb in (64, 32, 16, 8, 4, 2):
        if seq_len % tb == 0:
            return tb
    return 1


def _make_kernel(n_layers, hid_dim, t_block, b_pad):
    L, H, TB, Bp = n_layers, hid_dim, t_block, b_pad

    def kernel(*refs):
        x_ref = refs[0]                       # (TB, Bp, E) embedded time block
        lstm_refs = refs[1:1 + 3 * L]         # per layer: wih (4,in,H), whh (4,H,H), b (4,1,H)
        wout_ref = refs[1 + 3 * L]            # (2L, H, 2*D2)  combined [Wmu|Wvar], row blocks
        bout_ref = refs[2 + 3 * L]            # (1, 2*D2)
        mulv_ref = refs[3 + 3 * L]            # (TB, Bp, 2*D2) combined [mu | logvar]
        h_scr = refs[4 + 3 * L]               # (L, Bp, H) hidden state (persists across blocks)
        c_scr = refs[5 + 3 * L]               # (L, Bp, H) cell state

        @pl.when(pl.program_id(0) == 0)
        def _():
            h_scr[...] = jnp.zeros_like(h_scr)
            c_scr[...] = jnp.zeros_like(c_scr)

        # Loop-invariant weight loads and bias broadcasts (hoisted out of the time loop).
        wih = [[lstm_refs[3 * l][g] for g in range(4)] for l in range(L)]
        whh = [[lstm_refs[3 * l + 1][g] for g in range(4)] for l in range(L)]
        bias = [[jnp.broadcast_to(lstm_refs[3 * l + 2][g], (Bp, H))
                 for g in range(4)] for l in range(L)]
        wout = [wout_ref[p] for p in range(2 * L)]
        bout = jnp.broadcast_to(bout_ref[...], (Bp, bout_ref.shape[-1]))

        h0 = tuple(h_scr[l] for l in range(L))
        c0 = tuple(c_scr[l] for l in range(L))

        def step(t, carry):
            hs, cs = carry
            x = x_ref[t]                                      # (Bp, E) current-step embedding
            new_h, new_c = [], []
            for l in range(L):                                # stacked LSTM, one time step
                wx, wh, bl = wih[l], whh[l], bias[l]
                h_prev, c_prev = hs[l], cs[l]
                i_g = jax.nn.sigmoid(
                    jnp.dot(x, wx[0], preferred_element_type=jnp.float32)
                    + jnp.dot(h_prev, wh[0], preferred_element_type=jnp.float32) + bl[0])
                f_g = jax.nn.sigmoid(
                    jnp.dot(x, wx[1], preferred_element_type=jnp.float32)
                    + jnp.dot(h_prev, wh[1], preferred_element_type=jnp.float32) + bl[1])
                g_g = jnp.tanh(
                    jnp.dot(x, wx[2], preferred_element_type=jnp.float32)
                    + jnp.dot(h_prev, wh[2], preferred_element_type=jnp.float32) + bl[2])
                o_g = jax.nn.sigmoid(
                    jnp.dot(x, wx[3], preferred_element_type=jnp.float32)
                    + jnp.dot(h_prev, wh[3], preferred_element_type=jnp.float32) + bl[3])
                c_new = f_g * c_prev + i_g * g_g
                h_new = o_g * jnp.tanh(c_new)
                new_h.append(h_new)
                new_c.append(c_new)
                x = h_new

            # ziphidden + combined [mu | logvar] linear, accumulated per (h_l, c_l)
            # row block -> no cross-lane concat, lane-dense (Bp, 2*D2) result.
            acc = bout
            for l in range(L):
                acc = acc + jnp.dot(new_h[l], wout[2 * l],
                                    preferred_element_type=jnp.float32)
                acc = acc + jnp.dot(new_c[l], wout[2 * l + 1],
                                    preferred_element_type=jnp.float32)
            mulv_ref[t] = acc
            return tuple(new_h), tuple(new_c)

        unroll = True if TB <= 16 else 4
        hT, cT = lax.fori_loop(0, TB, step, (h0, c0), unroll=unroll)
        for l in range(L):
            h_scr[l] = hT[l]
            c_scr[l] = cT[l]

    return kernel


def vae_encoder_forward(src, params, n_layers, hid_dim):
    seq_len, B = src.shape
    emb_table = params["emb"]
    E = emb_table.shape[1]
    L, H = n_layers, hid_dim
    D2 = 2 * L * H

    # Glue: embedding gather (padding_idx=0 row is zero in the table), dropout = identity (eval).
    embedded = jnp.take(emb_table, src, axis=0).astype(jnp.float32)      # (seq, B, E)

    # Pad batch to a multiple of 8 sublanes; padded rows are sliced off afterwards.
    Bp = max(8, ((B + 7) // 8) * 8)
    if Bp != B:
        embedded = jnp.pad(embedded, ((0, 0), (0, Bp - B), (0, 0)))

    TB = _time_block(seq_len)
    grid = (seq_len // TB,)

    weight_inputs, weight_specs = [], []
    for l in range(L):
        for name in ("wih", "whh", "b"):
            w = params[f"{name}_{l}"]
            weight_inputs.append(w)
            weight_specs.append(pl.BlockSpec(w.shape, lambda b, nd=w.ndim: (0,) * nd))
    for name in ("wout", "bout"):
        w = params[name]
        weight_inputs.append(w)
        weight_specs.append(pl.BlockSpec(w.shape, lambda b, nd=w.ndim: (0,) * nd))

    kernel = _make_kernel(L, H, TB, Bp)
    mulv = pl.pallas_call(
        kernel,
        out_shape=jax.ShapeDtypeStruct((seq_len, Bp, 2 * D2), jnp.float32),
        grid_spec=pltpu.PrefetchScalarGridSpec(
            num_scalar_prefetch=0,
            grid=grid,
            in_specs=[pl.BlockSpec((TB, Bp, E), lambda b: (b, 0, 0))] + weight_specs,
            out_specs=pl.BlockSpec((TB, Bp, 2 * D2), lambda b: (b, 0, 0)),
            scratch_shapes=[
                pltpu.VMEM((L, Bp, H), jnp.float32),      # hidden state
                pltpu.VMEM((L, Bp, H), jnp.float32),      # cell state
            ],
        ),
        compiler_params=pltpu.CompilerParams(dimension_semantics=("arbitrary",)),
    )(embedded, *weight_inputs)

    mulv = mulv[:, :B, :]
    mu = mulv[..., :D2]
    logvar = mulv[..., D2:]
    h = mu[-1]                                            # eval-mode reparameterize returns mu
    # get_sen_len: trivial reduction, done outside the kernel.
    sen_len = jnp.sum(src > 0, axis=0).astype(jnp.float32)
    return h, mu, logvar, sen_len


def init_params(key, input_dim, emb_dim, hid_dim, n_layers):
    """Deterministic PyTorch-style init, stored in the kernel's weight layout."""
    params = {}
    keys = iter(jax.random.split(key, 1 + 4 * n_layers + 4))

    emb = jax.random.normal(next(keys), (input_dim, emb_dim), jnp.float32)
    emb = emb.at[0].set(0.0)                              # padding_idx=0
    params["emb"] = emb

    H = hid_dim
    k = 1.0 / jnp.sqrt(jnp.float32(H))
    for l in range(n_layers):
        in_sz = emb_dim if l == 0 else H
        w_ih = jax.random.uniform(next(keys), (4 * H, in_sz), jnp.float32, -k, k)
        w_hh = jax.random.uniform(next(keys), (4 * H, H), jnp.float32, -k, k)
        b_ih = jax.random.uniform(next(keys), (4 * H,), jnp.float32, -k, k)
        b_hh = jax.random.uniform(next(keys), (4 * H,), jnp.float32, -k, k)
        # Per-gate blocks (PyTorch gate order i, f, g, o), pre-transposed to (in, H).
        params[f"wih_{l}"] = jnp.stack(
            [jnp.transpose(w_ih[g * H:(g + 1) * H, :]) for g in range(4)])   # (4, in, H)
        params[f"whh_{l}"] = jnp.stack(
            [jnp.transpose(w_hh[g * H:(g + 1) * H, :]) for g in range(4)])   # (4, H, H)
        params[f"b_{l}"] = (b_ih + b_hh).reshape(4, 1, H)                    # (4, 1, H)

    D2 = 2 * n_layers * H
    kl = 1.0 / jnp.sqrt(jnp.float32(D2))
    w_mu = jax.random.uniform(next(keys), (D2, D2), jnp.float32, -kl, kl)
    b_mu = jax.random.uniform(next(keys), (D2,), jnp.float32, -kl, kl)
    w_var = jax.random.uniform(next(keys), (D2, D2), jnp.float32, -kl, kl)
    b_var = jax.random.uniform(next(keys), (D2,), jnp.float32, -kl, kl)
    # Combined [Wmu^T | Wvar^T] split into 2L row blocks (h_0, c_0, h_1, c_1, ...).
    w_comb = jnp.concatenate([jnp.transpose(w_mu), jnp.transpose(w_var)], axis=1)  # (D2, 2*D2)
    params["wout"] = w_comb.reshape(2 * n_layers, H, 2 * D2)
    params["bout"] = jnp.concatenate([b_mu, b_var]).reshape(1, 2 * D2)
    return params


def reference_forward(src, params, n_layers, hid_dim):
    """Pure-JAX reference of the PyTorch forward (eval mode), for correctness check."""
    seq_len, B = src.shape
    L, H = n_layers, hid_dim
    D2 = 2 * L * H
    emb = jnp.take(params["emb"], src, axis=0)
    # Reconstruct the standard (in, 4H) matrices from the kernel's per-gate layout.
    wihT = [jnp.concatenate([params[f"wih_{l}"][g] for g in range(4)], axis=1) for l in range(L)]
    whhT = [jnp.concatenate([params[f"whh_{l}"][g] for g in range(4)], axis=1) for l in range(L)]
    bias = [params[f"b_{l}"].reshape(1, 4 * H) for l in range(L)]
    w_comb = params["wout"].reshape(D2, 2 * D2)
    wmuT, wvarT = w_comb[:, :D2], w_comb[:, D2:]
    bmu, bvar = params["bout"][:, :D2], params["bout"][:, D2:]

    h = jnp.zeros((L, B, H), jnp.float32)
    c = jnp.zeros((L, B, H), jnp.float32)
    mus, lvs = [], []
    for t in range(seq_len):
        x = emb[t]
        for l in range(L):
            gates = x @ wihT[l] + h[l] @ whhT[l] + bias[l]
            i_g = jax.nn.sigmoid(gates[:, :H])
            f_g = jax.nn.sigmoid(gates[:, H:2 * H])
            g_g = jnp.tanh(gates[:, 2 * H:3 * H])
            o_g = jax.nn.sigmoid(gates[:, 3 * H:])
            c_new = f_g * c[l] + i_g * g_g
            h_new = o_g * jnp.tanh(c_new)
            h = h.at[l].set(h_new)
            c = c.at[l].set(c_new)
            x = h_new
        hz = jnp.concatenate(
            [jnp.concatenate([h[l], c[l]], axis=-1) for l in range(L)], axis=-1)
        mus.append(hz @ wmuT + bmu)
        lvs.append(hz @ wvarT + bvar)
    mu = jnp.stack(mus)
    lv = jnp.stack(lvs)
    sen_len = jnp.sum(src > 0, axis=0).astype(jnp.float32)
    return mu[-1], mu, lv, sen_len


if __name__ == "__main__":
    input_dim, emb_dim, hid_dim, n_layers = 32, 16, 16, 2
    seq_len, batch = 8, 4

    key = jax.random.PRNGKey(0)
    k_params, k_src = jax.random.split(key)
    params = init_params(k_params, input_dim, emb_dim, hid_dim, n_layers)
    src = jax.random.randint(k_src, (seq_len, batch), 0, input_dim, dtype=jnp.int32)

    h, mu, logvar, sen_len = vae_encoder_forward(src, params, n_layers, hid_dim)
    jax.block_until_ready((h, mu, logvar, sen_len))

    h_r, mu_r, lv_r, sl_r = reference_forward(src, params, n_layers, hid_dim)
    assert jnp.allclose(mu, mu_r, atol=2e-3, rtol=2e-3)
    assert jnp.allclose(logvar, lv_r, atol=2e-3, rtol=2e-3)
    assert jnp.allclose(h, h_r, atol=2e-3, rtol=2e-3)
    assert jnp.allclose(sen_len, sl_r)

    print("KERNEL_OK")
</pallas_src>

<mosaic_0001>
module attributes {stable_mosaic.version = 11 : i64} {
  func.func @kernel(%arg0: i32, %arg1: memref<8x8x16xf32, #tpu.memory_space<vmem>>, %arg2: memref<4x16x16xf32, #tpu.memory_space<vmem>>, %arg3: memref<4x16x16xf32, #tpu.memory_space<vmem>>, %arg4: memref<4x1x16xf32, #tpu.memory_space<vmem>>, %arg5: memref<4x16x16xf32, #tpu.memory_space<vmem>>, %arg6: memref<4x16x16xf32, #tpu.memory_space<vmem>>, %arg7: memref<4x1x16xf32, #tpu.memory_space<vmem>>, %arg8: memref<4x16x128xf32, #tpu.memory_space<vmem>>, %arg9: memref<1x128xf32, #tpu.memory_space<vmem>>, %arg10: memref<8x8x128xf32, #tpu.memory_space<vmem>>, %arg11: memref<2x8x16xf32, #tpu.memory_space<vmem>>, %arg12: memref<2x8x16xf32, #tpu.memory_space<vmem>>) attributes {dimension_semantics = [#tpu.dimension_semantics<arbitrary>], iteration_bounds = array<i64: 1>, scalar_prefetch = 0 : i64, scratch_operands = 2 : i64, tpu.core_type = #tpu.core_type<tc>, window_params = [{transform_indices = @transform_0, window_bounds = array<i64: 8, 8, 16>}, {pipeline_mode = #tpu.pipeline_mode<synchronous>, transform_indices = @transform_1, window_bounds = array<i64: 4, 16, 16>}, {pipeline_mode = #tpu.pipeline_mode<synchronous>, transform_indices = @transform_2, window_bounds = array<i64: 4, 16, 16>}, {pipeline_mode = #tpu.pipeline_mode<synchronous>, transform_indices = @transform_3, window_bounds = array<i64: 4, 1, 16>}, {pipeline_mode = #tpu.pipeline_mode<synchronous>, transform_indices = @transform_4, window_bounds = array<i64: 4, 16, 16>}, {pipeline_mode = #tpu.pipeline_mode<synchronous>, transform_indices = @transform_5, window_bounds = array<i64: 4, 16, 16>}, {pipeline_mode = #tpu.pipeline_mode<synchronous>, transform_indices = @transform_6, window_bounds = array<i64: 4, 1, 16>}, {pipeline_mode = #tpu.pipeline_mode<synchronous>, transform_indices = @transform_7, window_bounds = array<i64: 4, 16, 128>}, {pipeline_mode = #tpu.pipeline_mode<synchronous>, transform_indices = @transform_8, window_bounds = array<i64: 1, 128>}, {transform_indices = @transform_9, window_bounds = array<i64: 8, 8, 128>}]} {
    %c0_i32 = arith.constant 0 : i32
    %0 = arith.cmpi eq, %arg0, %c0_i32 : i32
    %1 = arith.extui %0 : i1 to i32
    %c0_i32_0 = arith.constant 0 : i32
    %2 = arith.cmpi ne, %1, %c0_i32_0 : i32
    scf.if %2 {
      %cst_347 = arith.constant 0.000000e+00 : f32
      %810 = vector.broadcast %cst_347 : f32 to vector<2x8x16xf32>
      %c0_348 = arith.constant 0 : index
      %c0_349 = arith.constant 0 : index
      %c0_350 = arith.constant 0 : index
      %811 = vector.load %arg11[%c0_348, %c0_349, %c0_350] : memref<2x8x16xf32, #tpu.memory_space<vmem>>, vector<2x8x16xf32>
      tpu.vector_store %arg11[%c0_348, %c0_349, %c0_350], %810 {strides = array<i32>} : memref<2x8x16xf32, #tpu.memory_space<vmem>>, vector<2x8x16xf32>,
      %cst_351 = arith.constant 0.000000e+00 : f32
      %812 = vector.broadcast %cst_351 : f32 to vector<2x8x16xf32>
      %c0_352 = arith.constant 0 : index
      %c0_353 = arith.constant 0 : index
      %c0_354 = arith.constant 0 : index
      %813 = vector.load %arg12[%c0_352, %c0_353, %c0_354] : memref<2x8x16xf32, #tpu.memory_space<vmem>>, vector<2x8x16xf32>
      tpu.vector_store %arg12[%c0_352, %c0_353, %c0_354], %812 {strides = array<i32>} : memref<2x8x16xf32, #tpu.memory_space<vmem>>, vector<2x8x16xf32>,
    } else {
    }
    %c0 = arith.constant 0 : index
    %c0_1 = arith.constant 0 : index
    %c0_2 = arith.constant 0 : index
    %3 = vector.load %arg2[%c0, %c0_1, %c0_2] : memref<4x16x16xf32, #tpu.memory_space<vmem>>, vector<1x16x16xf32>
    %4 = vector.shape_cast %3 : vector<1x16x16xf32> to vector<16x16xf32>
    %c1 = arith.constant 1 : index
    %c0_3 = arith.constant 0 : index
    %c0_4 = arith.constant 0 : index
    %5 = vector.load %arg2[%c1, %c0_3, %c0_4] : memref<4x16x16xf32, #tpu.memory_space<vmem>>, vector<1x16x16xf32>
    %6 = vector.shape_cast %5 : vector<1x16x16xf32> to vector<16x16xf32>
    %c2 = arith.constant 2 : index
    %c0_5 = arith.constant 0 : index
    %c0_6 = arith.constant 0 : index
    %7 = vector.load %arg2[%c2, %c0_5, %c0_6] : memref<4x16x16xf32, #tpu.memory_space<vmem>>, vector<1x16x16xf32>
    %8 = vector.shape_cast %7 : vector<1x16x16xf32> to vector<16x16xf32>
    %c3 = arith.constant 3 : index
    %c0_7 = arith.constant 0 : index
    %c0_8 = arith.constant 0 : index
    %9 = vector.load %arg2[%c3, %c0_7, %c0_8] : memref<4x16x16xf32, #tpu.memory_space<vmem>>, vector<1x16x16xf32>
    %10 = vector.shape_cast %9 : vector<1x16x16xf32> to vector<16x16xf32>
    %c0_9 = arith.constant 0 : index
    %c0_10 = arith.constant 0 : index
    %c0_11 = arith.constant 0 : index
    %11 = vector.load %arg5[%c0_9, %c0_10, %c0_11] : memref<4x16x16xf32, #tpu.memory_space<vmem>>, vector<1x16x16xf32>
    %12 = vector.shape_cast %11 : vector<1x16x16xf32> to vector<16x16xf32>
    %c1_12 = arith.constant 1 : index
    %c0_13 = arith.constant 0 : index
    %c0_14 = arith.constant 0 : index
    %13 = vector.load %arg5[%c1_12, %c0_13, %c0_14] : memref<4x16x16xf32, #tpu.memory_space<vmem>>, vector<1x16x16xf32>
    %14 = vector.shape_cast %13 : vector<1x16x16xf32> to vector<16x16xf32>
    %c2_15 = arith.constant 2 : index
    %c0_16 = arith.constant 0 : index
    %c0_17 = arith.constant 0 : index
    %15 = vector.load %arg5[%c2_15, %c0_16, %c0_17] : memref<4x16x16xf32, #tpu.memory_space<vmem>>, vector<1x16x16xf32>
    %16 = vector.shape_cast %15 : vector<1x16x16xf32> to vector<16x16xf32>
    %c3_18 = arith.constant 3 : index
    %c0_19 = arith.constant 0 : index
    %c0_20 = arith.constant 0 : index
    %17 = vector.load %arg5[%c3_18, %c0_19, %c0_20] : memref<4x16x16xf32, #tpu.memory_space<vmem>>, vector<1x16x16xf32>
    %18 = vector.shape_cast %17 : vector<1x16x16xf32> to vector<16x16xf32>
    %c0_21 = arith.constant 0 : index
    %c0_22 = arith.constant 0 : index
    %c0_23 = arith.constant 0 : index
    %19 = vector.load %arg3[%c0_21, %c0_22, %c0_23] : memref<4x16x16xf32, #tpu.memory_space<vmem>>, vector<1x16x16xf32>
    %20 = vector.shape_cast %19 : vector<1x16x16xf32> to vector<16x16xf32>
    %c1_24 = arith.constant 1 : index
    %c0_25 = arith.constant 0 : index
    %c0_26 = arith.constant 0 : index
    %21 = vector.load %arg3[%c1_24, %c0_25, %c0_26] : memref<4x16x16xf32, #tpu.memory_space<vmem>>, vector<1x16x16xf32>
    %22 = vector.shape_cast %21 : vector<1x16x16xf32> to vector<16x16xf32>
    %c2_27 = arith.constant 2 : index
    %c0_28 = arith.constant 0 : index
    %c0_29 = arith.constant 0 : index
    %23 = vector.load %arg3[%c2_27, %c0_28, %c0_29] : memref<4x16x16xf32, #tpu.memory_space<vmem>>, vector<1x16x16xf32>
    %24 = vector.shape_cast %23 : vector<1x16x16xf32> to vector<16x16xf32>
    %c3_30 = arith.constant 3 : index
    %c0_31 = arith.constant 0 : index
    %c0_32 = arith.constant 0 : index
    %25 = vector.load %arg3[%c3_30, %c0_31, %c0_32] : memref<4x16x16xf32, #tpu.memory_space<vmem>>, vector<1x16x16xf32>
    %26 = vector.shape_cast %25 : vector<1x16x16xf32> to vector<16x16xf32>
    %c0_33 = arith.constant 0 : index
    %c0_34 = arith.constant 0 : index
    %c0_35 = arith.constant 0 : index
    %27 = vector.load %arg6[%c0_33, %c0_34, %c0_35] : memref<4x16x16xf32, #tpu.memory_space<vmem>>, vector<1x16x16xf32>
    %28 = vector.shape_cast %27 : vector<1x16x16xf32> to vector<16x16xf32>
    %c1_36 = arith.constant 1 : index
    %c0_37 = arith.constant 0 : index
    %c0_38 = arith.constant 0 : index
    %29 = vector.load %arg6[%c1_36, %c0_37, %c0_38] : memref<4x16x16xf32, #tpu.memory_space<vmem>>, vector<1x16x16xf32>
    %30 = vector.shape_cast %29 : vector<1x16x16xf32> to vector<16x16xf32>
    %c2_39 = arith.constant 2 : index
    %c0_40 = arith.constant 0 : index
    %c0_41 = arith.constant 0 : index
    %31 = vector.load %arg6[%c2_39, %c0_40, %c0_41] : memref<4x16x16xf32, #tpu.memory_space<vmem>>, vector<1x16x16xf32>
    %32 = vector.shape_cast %31 : vector<1x16x16xf32> to vector<16x16xf32>
    %c3_42 = arith.constant 3 : index
    %c0_43 = arith.constant 0 : index
    %c0_44 = arith.constant 0 : index
    %33 = vector.load %arg6[%c3_42, %c0_43, %c0_44] : memref<4x16x16xf32, #tpu.memory_space<vmem>>, vector<1x16x16xf32>
    %34 = vector.shape_cast %33 : vector<1x16x16xf32> to vector<16x16xf32>
    %c0_45 = arith.constant 0 : index
    %c0_46 = arith.constant 0 : index
    %c0_47 = arith.constant 0 : index
    %35 = vector.load %arg4[%c0_45, %c0_46, %c0_47] : memref<4x1x16xf32, #tpu.memory_space<vmem>>, vector<1x1x16xf32>
    %36 = vector.shape_cast %35 : vector<1x1x16xf32> to vector<1x16xf32>
    %37 = vector.shape_cast %36 : vector<1x16xf32> to vector<1x16xf32>
    %38 = vector.broadcast %37 : vector<1x16xf32> to vector<8x16xf32>
    %c1_48 = arith.constant 1 : index
    %c0_49 = arith.constant 0 : index
    %c0_50 = arith.constant 0 : index
    %39 = vector.load %arg4[%c1_48, %c0_49, %c0_50] : memref<4x1x16xf32, #tpu.memory_space<vmem>>, vector<1x1x16xf32>
    %40 = vector.shape_cast %39 : vector<1x1x16xf32> to vector<1x16xf32>
    %41 = vector.shape_cast %40 : vector<1x16xf32> to vector<1x16xf32>
    %42 = vector.broadcast %41 : vector<1x16xf32> to vector<8x16xf32>
    %c2_51 = arith.constant 2 : index
    %c0_52 = arith.constant 0 : index
    %c0_53 = arith.constant 0 : index
    %43 = vector.load %arg4[%c2_51, %c0_52, %c0_53] : memref<4x1x16xf32, #tpu.memory_space<vmem>>, vector<1x1x16xf32>
    %44 = vector.shape_cast %43 : vector<1x1x16xf32> to vector<1x16xf32>
    %45 = vector.shape_cast %44 : vector<1x16xf32> to vector<1x16xf32>
    %46 = vector.broadcast %45 : vector<1x16xf32> to vector<8x16xf32>
    %c3_54 = arith.constant 3 : index
    %c0_55 = arith.constant 0 : index
    %c0_56 = arith.constant 0 : index
    %47 = vector.load %arg4[%c3_54, %c0_55, %c0_56] : memref<4x1x16xf32, #tpu.memory_space<vmem>>, vector<1x1x16xf32>
    %48 = vector.shape_cast %47 : vector<1x1x16xf32> to vector<1x16xf32>
    %49 = vector.shape_cast %48 : vector<1x16xf32> to vector<1x16xf32>
    %50 = vector.broadcast %49 : vector<1x16xf32> to vector<8x16xf32>
    %c0_57 = arith.constant 0 : index
    %c0_58 = arith.constant 0 : index
    %c0_59 = arith.constant 0 : index
    %51 = vector.load %arg7[%c0_57, %c0_58, %c0_59] : memref<4x1x16xf32, #tpu.memory_space<vmem>>, vector<1x1x16xf32>
    %52 = vector.shape_cast %51 : vector<1x1x16xf32> to vector<1x16xf32>
    %53 = vector.shape_cast %52 : vector<1x16xf32> to vector<1x16xf32>
    %54 = vector.broadcast %53 : vector<1x16xf32> to vector<8x16xf32>
    %c1_60 = arith.constant 1 : index
    %c0_61 = arith.constant 0 : index
    %c0_62 = arith.constant 0 : index
    %55 = vector.load %arg7[%c1_60, %c0_61, %c0_62] : memref<4x1x16xf32, #tpu.memory_space<vmem>>, vector<1x1x16xf32>
    %56 = vector.shape_cast %55 : vector<1x1x16xf32> to vector<1x16xf32>
    %57 = vector.shape_cast %56 : vector<1x16xf32> to vector<1x16xf32>
    %58 = vector.broadcast %57 : vector<1x16xf32> to vector<8x16xf32>
    %c2_63 = arith.constant 2 : index
    %c0_64 = arith.constant 0 : index
    %c0_65 = arith.constant 0 : index
    %59 = vector.load %arg7[%c2_63, %c0_64, %c0_65] : memref<4x1x16xf32, #tpu.memory_space<vmem>>, vector<1x1x16xf32>
    %60 = vector.shape_cast %59 : vector<1x1x16xf32> to vector<1x16xf32>
    %61 = vector.shape_cast %60 : vector<1x16xf32> to vector<1x16xf32>
    %62 = vector.broadcast %61 : vector<1x16xf32> to vector<8x16xf32>
    %c3_66 = arith.constant 3 : index
    %c0_67 = arith.constant 0 : index
    %c0_68 = arith.constant 0 : index
    %63 = vector.load %arg7[%c3_66, %c0_67, %c0_68] : memref<4x1x16xf32, #tpu.memory_space<vmem>>, vector<1x1x16xf32>
    %64 = vector.shape_cast %63 : vector<1x1x16xf32> to vector<1x16xf32>
    %65 = vector.shape_cast %64 : vector<1x16xf32> to vector<1x16xf32>
    %66 = vector.broadcast %65 : vector<1x16xf32> to vector<8x16xf32>
    %c0_69 = arith.constant 0 : index
    %c0_70 = arith.constant 0 : index
    %c0_71 = arith.constant 0 : index
    %67 = vector.load %arg8[%c0_69, %c0_70, %c0_71] : memref<4x16x128xf32, #tpu.memory_space<vmem>>, vector<1x16x128xf32>
    %68 = vector.shape_cast %67 : vector<1x16x128xf32> to vector<16x128xf32>
    %c1_72 = arith.constant 1 : index
    %c0_73 = arith.constant 0 : index
    %c0_74 = arith.constant 0 : index
    %69 = vector.load %arg8[%c1_72, %c0_73, %c0_74] : memref<4x16x128xf32, #tpu.memory_space<vmem>>, vector<1x16x128xf32>
    %70 = vector.shape_cast %69 : vector<1x16x128xf32> to vector<16x128xf32>
    %c2_75 = arith.constant 2 : index
    %c0_76 = arith.constant 0 : index
    %c0_77 = arith.constant 0 : index
    %71 = vector.load %arg8[%c2_75, %c0_76, %c0_77] : memref<4x16x128xf32, #tpu.memory_space<vmem>>, vector<1x16x128xf32>
    %72 = vector.shape_cast %71 : vector<1x16x128xf32> to vector<16x128xf32>
    %c3_78 = arith.constant 3 : index
    %c0_79 = arith.constant 0 : index
    %c0_80 = arith.constant 0 : index
    %73 = vector.load %arg8[%c3_78, %c0_79, %c0_80] : memref<4x16x128xf32, #tpu.memory_space<vmem>>, vector<1x16x128xf32>
    %74 = vector.shape_cast %73 : vector<1x16x128xf32> to vector<16x128xf32>
    %c0_81 = arith.constant 0 : index
    %c0_82 = arith.constant 0 : index
    %75 = vector.load %arg9[%c0_81, %c0_82] : memref<1x128xf32, #tpu.memory_space<vmem>>, vector<1x128xf32>
    %76 = vector.shape_cast %75 : vector<1x128xf32> to vector<1x128xf32>
    %77 = vector.broadcast %76 : vector<1x128xf32> to vector<8x128xf32>
    %c0_83 = arith.constant 0 : index
    %c0_84 = arith.constant 0 : index
    %c0_85 = arith.constant 0 : index
    %78 = vector.load %arg11[%c0_83, %c0_84, %c0_85] : memref<2x8x16xf32, #tpu.memory_space<vmem>>, vector<1x8x16xf32>
    %79 = vector.shape_cast %78 : vector<1x8x16xf32> to vector<8x16xf32>
    %c1_86 = arith.constant 1 : index
    %c0_87 = arith.constant 0 : index
    %c0_88 = arith.constant 0 : index
    %80 = vector.load %arg11[%c1_86, %c0_87, %c0_88] : memref<2x8x16xf32, #tpu.memory_space<vmem>>, vector<1x8x16xf32>
    %81 = vector.shape_cast %80 : vector<1x8x16xf32> to vector<8x16xf32>
    %c0_89 = arith.constant 0 : index
    %c0_90 = arith.constant 0 : index
    %c0_91 = arith.constant 0 : index
    %82 = vector.load %arg12[%c0_89, %c0_90, %c0_91] : memref<2x8x16xf32, #tpu.memory_space<vmem>>, vector<1x8x16xf32>
    %83 = vector.shape_cast %82 : vector<1x8x16xf32> to vector<8x16xf32>
    %c1_92 = arith.constant 1 : index
    %c0_93 = arith.constant 0 : index
    %c0_94 = arith.constant 0 : index
    %84 = vector.load %arg12[%c1_92, %c0_93, %c0_94] : memref<2x8x16xf32, #tpu.memory_space<vmem>>, vector<1x8x16xf32>
    %85 = vector.shape_cast %84 : vector<1x8x16xf32> to vector<8x16xf32>
    %c0_i32_95 = arith.constant 0 : i32
    %86 = arith.index_cast %c0_i32_95 : i32 to index
    %c0_96 = arith.constant 0 : index
    %c0_97 = arith.constant 0 : index
    %87 = vector.load %arg1[%86, %c0_96, %c0_97] : memref<8x8x16xf32, #tpu.memory_space<vmem>>, vector<1x8x16xf32>
    %88 = vector.shape_cast %87 : vector<1x8x16xf32> to vector<8x16xf32>
    %cst = arith.constant dense<0.000000e+00> : vector<8x16xf32>
    %89 = tpu.matmul %88, %4, %cst {dimension_numbers = #tpu.dot_dimension_numbers<[1], [0], [0], [1], [0, 0, 1, 1], [], []>} : vector<8x16xf32>, vector<16x16xf32>, vector<8x16xf32> -> vector<8x16xf32>
    %cst_98 = arith.constant dense<0.000000e+00> : vector<8x16xf32>
    %90 = tpu.matmul %79, %20, %cst_98 {dimension_numbers = #tpu.dot_dimension_numbers<[1], [0], [0], [1], [0, 0, 1, 1], [], []>} : vector<8x16xf32>, vector<16x16xf32>, vector<8x16xf32> -> vector<8x16xf32>
    %91 = arith.addf %89, %90 : vector<8x16xf32>
    %92 = arith.addf %91, %38 : vector<8x16xf32>
    %93 = arith.negf %92 : vector<8x16xf32>
    %94 = math.exp %93 : vector<8x16xf32>
    %cst_99 = arith.constant 1.000000e+00 : f32
    %95 = vector.broadcast %cst_99 : f32 to vector<8x16xf32>
    %96 = arith.addf %95, %94 : vector<8x16xf32>
    %97 = arith.divf %95, %96 : vector<8x16xf32>
    %cst_100 = arith.constant dense<0.000000e+00> : vector<8x16xf32>
    %98 = tpu.matmul %88, %6, %cst_100 {dimension_numbers = #tpu.dot_dimension_numbers<[1], [0], [0], [1], [0, 0, 1, 1], [], []>} : vector<8x16xf32>, vector<16x16xf32>, vector<8x16xf32> -> vector<8x16xf32>
    %cst_101 = arith.constant dense<0.000000e+00> : vector<8x16xf32>
    %99 = tpu.matmul %79, %22, %cst_101 {dimension_numbers = #tpu.dot_dimension_numbers<[1], [0], [0], [1], [0, 0, 1, 1], [], []>} : vector<8x16xf32>, vector<16x16xf32>, vector<8x16xf32> -> vector<8x16xf32>
    %100 = arith.addf %98, %99 : vector<8x16xf32>
    %101 = arith.addf %100, %42 : vector<8x16xf32>
    %102 = arith.negf %101 : vector<8x16xf32>
    %103 = math.exp %102 : vector<8x16xf32>
    %cst_102 = arith.constant 1.000000e+00 : f32
    %104 = vector.broadcast %cst_102 : f32 to vector<8x16xf32>
    %105 = arith.addf %104, %103 : vector<8x16xf32>
    %106 = arith.divf %104, %105 : vector<8x16xf32>
    %cst_103 = arith.constant dense<0.000000e+00> : vector<8x16xf32>
    %107 = tpu.matmul %88, %8, %cst_103 {dimension_numbers = #tpu.dot_dimension_numbers<[1], [0], [0], [1], [0, 0, 1, 1], [], []>} : vector<8x16xf32>, vector<16x16xf32>, vector<8x16xf32> -> vector<8x16xf32>
    %cst_104 = arith.constant dense<0.000000e+00> : vector<8x16xf32>
    %108 = tpu.matmul %79, %24, %cst_104 {dimension_numbers = #tpu.dot_dimension_numbers<[1], [0], [0], [1], [0, 0, 1, 1], [], []>} : vector<8x16xf32>, vector<16x16xf32>, vector<8x16xf32> -> vector<8x16xf32>
    %109 = arith.addf %107, %108 : vector<8x16xf32>
    %110 = arith.addf %109, %46 : vector<8x16xf32>
    %111 = math.tanh %110 : vector<8x16xf32>
    %cst_105 = arith.constant dense<0.000000e+00> : vector<8x16xf32>
    %112 = tpu.matmul %88, %10, %cst_105 {dimension_numbers = #tpu.dot_dimension_numbers<[1], [0], [0], [1], [0, 0, 1, 1], [], []>} : vector<8x16xf32>, vector<16x16xf32>, vector<8x16xf32> -> vector<8x16xf32>
    %cst_106 = arith.constant dense<0.000000e+00> : vector<8x16xf32>
    %113 = tpu.matmul %79, %26, %cst_106 {dimension_numbers = #tpu.dot_dimension_numbers<[1], [0], [0], [1], [0, 0, 1, 1], [], []>} : vector<8x16xf32>, vector<16x16xf32>, vector<8x16xf32> -> vector<8x16xf32>
    %114 = arith.addf %112, %113 : vector<8x16xf32>
    %115 = arith.addf %114, %50 : vector<8x16xf32>
    %116 = arith.negf %115 : vector<8x16xf32>
    %117 = math.exp %116 : vector<8x16xf32>
    %cst_107 = arith.constant 1.000000e+00 : f32
    %118 = vector.broadcast %cst_107 : f32 to vector<8x16xf32>
    %119 = arith.addf %118, %117 : vector<8x16xf32>
    %120 = arith.divf %118, %119 : vector<8x16xf32>
    %121 = arith.mulf %106, %83 : vector<8x16xf32>
    %122 = arith.mulf %97, %111 : vector<8x16xf32>
    %123 = arith.addf %121, %122 : vector<8x16xf32>
    %124 = math.tanh %123 : vector<8x16xf32>
    %125 = arith.mulf %120, %124 : vector<8x16xf32>
    %cst_108 = arith.constant dense<0.000000e+00> : vector<8x16xf32>
    %126 = tpu.matmul %125, %12, %cst_108 {dimension_numbers = #tpu.dot_dimension_numbers<[1], [0], [0], [1], [0, 0, 1, 1], [], []>} : vector<8x16xf32>, vector<16x16xf32>, vector<8x16xf32> -> vector<8x16xf32>
    %cst_109 = arith.constant dense<0.000000e+00> : vector<8x16xf32>
    %127 = tpu.matmul %81, %28, %cst_109 {dimension_numbers = #tpu.dot_dimension_numbers<[1], [0], [0], [1], [0, 0, 1, 1], [], []>} : vector<8x16xf32>, vector<16x16xf32>, vector<8x16xf32> -> vector<8x16xf32>
    %128 = arith.addf %126, %127 : vector<8x16xf32>
    %129 = arith.addf %128, %54 : vector<8x16xf32>
    %130 = arith.negf %129 : vector<8x16xf32>
    %131 = math.exp %130 : vector<8x16xf32>
    %cst_110 = arith.constant 1.000000e+00 : f32
    %132 = vector.broadcast %cst_110 : f32 to vector<8x16xf32>
    %133 = arith.addf %132, %131 : vector<8x16xf32>
    %134 = arith.divf %132, %133 : vector<8x16xf32>
    %cst_111 = arith.constant dense<0.000000e+00> : vector<8x16xf32>
    %135 = tpu.matmul %125, %14, %cst_111 {dimension_numbers = #tpu.dot_dimension_numbers<[1], [0], [0], [1], [0, 0, 1, 1], [], []>} : vector<8x16xf32>, vector<16x16xf32>, vector<8x16xf32> -> vector<8x16xf32>
    %cst_112 = arith.constant dense<0.000000e+00> : vector<8x16xf32>
    %136 = tpu.matmul %81, %30, %cst_112 {dimension_numbers = #tpu.dot_dimension_numbers<[1], [0], [0], [1], [0, 0, 1, 1], [], []>} : vector<8x16xf32>, vector<16x16xf32>, vector<8x16xf32> -> vector<8x16xf32>
    %137 = arith.addf %135, %136 : vector<8x16xf32>
    %138 = arith.addf %137, %58 : vector<8x16xf32>
    %139 = arith.negf %138 : vector<8x16xf32>
    %140 = math.exp %139 : vector<8x16xf32>
    %cst_113 = arith.constant 1.000000e+00 : f32
    %141 = vector.broadcast %cst_113 : f32 to vector<8x16xf32>
    %142 = arith.addf %141, %140 : vector<8x16xf32>
    %143 = arith.divf %141, %142 : vector<8x16xf32>
    %cst_114 = arith.constant dense<0.000000e+00> : vector<8x16xf32>
    %144 = tpu.matmul %125, %16, %cst_114 {dimension_numbers = #tpu.dot_dimension_numbers<[1], [0], [0], [1], [0, 0, 1, 1], [], []>} : vector<8x16xf32>, vector<16x16xf32>, vector<8x16xf32> -> vector<8x16xf32>
    %cst_115 = arith.constant dense<0.000000e+00> : vector<8x16xf32>
    %145 = tpu.matmul %81, %32, %cst_115 {dimension_numbers = #tpu.dot_dimension_numbers<[1], [0], [0], [1], [0, 0, 1, 1], [], []>} : vector<8x16xf32>, vector<16x16xf32>, vector<8x16xf32> -> vector<8x16xf32>
    %146 = arith.addf %144, %145 : vector<8x16xf32>
    %147 = arith.addf %146, %62 : vector<8x16xf32>
    %148 = math.tanh %147 : vector<8x16xf32>
    %cst_116 = arith.constant dense<0.000000e+00> : vector<8x16xf32>
    %149 = tpu.matmul %125, %18, %cst_116 {dimension_numbers = #tpu.dot_dimension_numbers<[1], [0], [0], [1], [0, 0, 1, 1], [], []>} : vector<8x16xf32>, vector<16x16xf32>, vector<8x16xf32> -> vector<8x16xf32>
    %cst_117 = arith.constant dense<0.000000e+00> : vector<8x16xf32>
    %150 = tpu.matmul %81, %34, %cst_117 {dimension_numbers = #tpu.dot_dimension_numbers<[1], [0], [0], [1], [0, 0, 1, 1], [], []>} : vector<8x16xf32>, vector<16x16xf32>, vector<8x16xf32> -> vector<8x16xf32>
    %151 = arith.addf %149, %150 : vector<8x16xf32>
    %152 = arith.addf %151, %66 : vector<8x16xf32>
    %153 = arith.negf %152 : vector<8x16xf32>
    %154 = math.exp %153 : vector<8x16xf32>
    %cst_118 = arith.constant 1.000000e+00 : f32
    %155 = vector.broadcast %cst_118 : f32 to vector<8x16xf32>
    %156 = arith.addf %155, %154 : vector<8x16xf32>
    %157 = arith.divf %155, %156 : vector<8x16xf32>
    %158 = arith.mulf %143, %85 : vector<8x16xf32>
    %159 = arith.mulf %134, %148 : vector<8x16xf32>
    %160 = arith.addf %158, %159 : vector<8x16xf32>
    %161 = math.tanh %160 : vector<8x16xf32>
    %162 = arith.mulf %157, %161 : vector<8x16xf32>
    %cst_119 = arith.constant dense<0.000000e+00> : vector<8x128xf32>
    %163 = tpu.matmul %125, %68, %cst_119 {dimension_numbers = #tpu.dot_dimension_numbers<[1], [0], [0], [1], [0, 0, 1, 1], [], []>} : vector<8x16xf32>, vector<16x128xf32>, vector<8x128xf32> -> vector<8x128xf32>
    %164 = arith.addf %77, %163 : vector<8x128xf32>
    %cst_120 = arith.constant dense<0.000000e+00> : vector<8x128xf32>
    %165 = tpu.matmul %123, %70, %cst_120 {dimension_numbers = #tpu.dot_dimension_numbers<[1], [0], [0], [1], [0, 0, 1, 1], [], []>} : vector<8x16xf32>, vector<16x128xf32>, vector<8x128xf32> -> vector<8x128xf32>
    %166 = arith.addf %164, %165 : vector<8x128xf32>
    %cst_121 = arith.constant dense<0.000000e+00> : vector<8x128xf32>
    %167 = tpu.matmul %162, %72, %cst_121 {dimension_numbers = #tpu.dot_dimension_numbers<[1], [0], [0], [1], [0, 0, 1, 1], [], []>} : vector<8x16xf32>, vector<16x128xf32>, vector<8x128xf32> -> vector<8x128xf32>
    %168 = arith.addf %166, %167 : vector<8x128xf32>
    %cst_122 = arith.constant dense<0.000000e+00> : vector<8x128xf32>
    %169 = tpu.matmul %160, %74, %cst_122 {dimension_numbers = #tpu.dot_dimension_numbers<[1], [0], [0], [1], [0, 0, 1, 1], [], []>} : vector<8x16xf32>, vector<16x128xf32>, vector<8x128xf32> -> vector<8x128xf32>
    %170 = arith.addf %168, %169 : vector<8x128xf32>
    %171 = arith.index_cast %c0_i32_95 : i32 to index
    %c0_123 = arith.constant 0 : index
    %c0_124 = arith.constant 0 : index
    %172 = vector.load %arg10[%171, %c0_123, %c0_124] : memref<8x8x128xf32, #tpu.memory_space<vmem>>, vector<1x8x128xf32>
    %173 = vector.shape_cast %172 : vector<1x8x128xf32> to vector<8x128xf32>
    %174 = vector.shape_cast %170 : vector<8x128xf32> to vector<1x8x128xf32>
    tpu.vector_store %arg10[%171, %c0_123, %c0_124], %174 {strides = array<i32>} : memref<8x8x128xf32, #tpu.memory_space<vmem>>, vector<1x8x128xf32>,
    %c1_i32 = arith.constant 1 : i32
    %175 = arith.index_cast %c1_i32 : i32 to index
    %c0_125 = arith.constant 0 : index
    %c0_126 = arith.constant 0 : index
    %176 = vector.load %arg1[%175, %c0_125, %c0_126] : memref<8x8x16xf32, #tpu.memory_space<vmem>>, vector<1x8x16xf32>
    %177 = vector.shape_cast %176 : vector<1x8x16xf32> to vector<8x16xf32>
    %cst_127 = arith.constant dense<0.000000e+00> : vector<8x16xf32>
    %178 = tpu.matmul %177, %4, %cst_127 {dimension_numbers = #tpu.dot_dimension_numbers<[1], [0], [0], [1], [0, 0, 1, 1], [], []>} : vector<8x16xf32>, vector<16x16xf32>, vector<8x16xf32> -> vector<8x16xf32>
    %cst_128 = arith.constant dense<0.000000e+00> : vector<8x16xf32>
    %179 = tpu.matmul %125, %20, %cst_128 {dimension_numbers = #tpu.dot_dimension_numbers<[1], [0], [0], [1], [0, 0, 1, 1], [], []>} : vector<8x16xf32>, vector<16x16xf32>, vector<8x16xf32> -> vector<8x16xf32>
    %180 = arith.addf %178, %179 : vector<8x16xf32>
    %181 = arith.addf %180, %38 : vector<8x16xf32>
    %182 = arith.negf %181 : vector<8x16xf32>
    %183 = math.exp %182 : vector<8x16xf32>
    %cst_129 = arith.constant 1.000000e+00 : f32
    %184 = vector.broadcast %cst_129 : f32 to vector<8x16xf32>
    %185 = arith.addf %184, %183 : vector<8x16xf32>
    %186 = arith.divf %184, %185 : vector<8x16xf32>
    %cst_130 = arith.constant dense<0.000000e+00> : vector<8x16xf32>
    %187 = tpu.matmul %177, %6, %cst_130 {dimension_numbers = #tpu.dot_dimension_numbers<[1], [0], [0], [1], [0, 0, 1, 1], [], []>} : vector<8x16xf32>, vector<16x16xf32>, vector<8x16xf32> -> vector<8x16xf32>
    %cst_131 = arith.constant dense<0.000000e+00> : vector<8x16xf32>
    %188 = tpu.matmul %125, %22, %cst_131 {dimension_numbers = #tpu.dot_dimension_numbers<[1], [0], [0], [1], [0, 0, 1, 1], [], []>} : vector<8x16xf32>, vector<16x16xf32>, vector<8x16xf32> -> vector<8x16xf32>
    %189 = arith.addf %187, %188 : vector<8x16xf32>
    %190 = arith.addf %189, %42 : vector<8x16xf32>
    %191 = arith.negf %190 : vector<8x16xf32>
    %192 = math.exp %191 : vector<8x16xf32>
    %cst_132 = arith.constant 1.000000e+00 : f32
    %193 = vector.broadcast %cst_132 : f32 to vector<8x16xf32>
    %194 = arith.addf %193, %192 : vector<8x16xf32>
    %195 = arith.divf %193, %194 : vector<8x16xf32>
    %cst_133 = arith.constant dense<0.000000e+00> : vector<8x16xf32>
    %196 = tpu.matmul %177, %8, %cst_133 {dimension_numbers = #tpu.dot_dimension_numbers<[1], [0], [0], [1], [0, 0, 1, 1], [], []>} : vector<8x16xf32>, vector<16x16xf32>, vector<8x16xf32> -> vector<8x16xf32>
    %cst_134 = arith.constant dense<0.000000e+00> : vector<8x16xf32>
    %197 = tpu.matmul %125, %24, %cst_134 {dimension_numbers = #tpu.dot_dimension_numbers<[1], [0], [0], [1], [0, 0, 1, 1], [], []>} : vector<8x16xf32>, vector<16x16xf32>, vector<8x16xf32> -> vector<8x16xf32>
    %198 = arith.addf %196, %197 : vector<8x16xf32>
    %199 = arith.addf %198, %46 : vector<8x16xf32>
    %200 = math.tanh %199 : vector<8x16xf32>
    %cst_135 = arith.constant dense<0.000000e+00> : vector<8x16xf32>
    %201 = tpu.matmul %177, %10, %cst_135 {dimension_numbers = #tpu.dot_dimension_numbers<[1], [0], [0], [1], [0, 0, 1, 1], [], []>} : vector<8x16xf32>, vector<16x16xf32>, vector<8x16xf32> -> vector<8x16xf32>
    %cst_136 = arith.constant dense<0.000000e+00> : vector<8x16xf32>
    %202 = tpu.matmul %125, %26, %cst_136 {dimension_numbers = #tpu.dot_dimension_numbers<[1], [0], [0], [1], [0, 0, 1, 1], [], []>} : vector<8x16xf32>, vector<16x16xf32>, vector<8x16xf32> -> vector<8x16xf32>
    %203 = arith.addf %201, %202 : vector<8x16xf32>
    %204 = arith.addf %203, %50 : vector<8x16xf32>
    %205 = arith.negf %204 : vector<8x16xf32>
    %206 = math.exp %205 : vector<8x16xf32>
    %cst_137 = arith.constant 1.000000e+00 : f32
    %207 = vector.broadcast %cst_137 : f32 to vector<8x16xf32>
    %208 = arith.addf %207, %206 : vector<8x16xf32>
    %209 = arith.divf %207, %208 : vector<8x16xf32>
    %210 = arith.mulf %195, %123 : vector<8x16xf32>
    %211 = arith.mulf %186, %200 : vector<8x16xf32>
    %212 = arith.addf %210, %211 : vector<8x16xf32>
    %213 = math.tanh %212 : vector<8x16xf32>
    %214 = arith.mulf %209, %213 : vector<8x16xf32>
    %cst_138 = arith.constant dense<0.000000e+00> : vector<8x16xf32>
    %215 = tpu.matmul %214, %12, %cst_138 {dimension_numbers = #tpu.dot_dimension_numbers<[1], [0], [0], [1], [0, 0, 1, 1], [], []>} : vector<8x16xf32>, vector<16x16xf32>, vector<8x16xf32> -> vector<8x16xf32>
    %cst_139 = arith.constant dense<0.000000e+00> : vector<8x16xf32>
    %216 = tpu.matmul %162, %28, %cst_139 {dimension_numbers = #tpu.dot_dimension_numbers<[1], [0], [0], [1], [0, 0, 1, 1], [], []>} : vector<8x16xf32>, vector<16x16xf32>, vector<8x16xf32> -> vector<8x16xf32>
    %217 = arith.addf %215, %216 : vector<8x16xf32>
    %218 = arith.addf %217, %54 : vector<8x16xf32>
    %219 = arith.negf %218 : vector<8x16xf32>
    %220 = math.exp %219 : vector<8x16xf32>
    %cst_140 = arith.constant 1.000000e+00 : f32
    %221 = vector.broadcast %cst_140 : f32 to vector<8x16xf32>
    %222 = arith.addf %221, %220 : vector<8x16xf32>
    %223 = arith.divf %221, %222 : vector<8x16xf32>
    %cst_141 = arith.constant dense<0.000000e+00> : vector<8x16xf32>
    %224 = tpu.matmul %214, %14, %cst_141 {dimension_numbers = #tpu.dot_dimension_numbers<[1], [0], [0], [1], [0, 0, 1, 1], [], []>} : vector<8x16xf32>, vector<16x16xf32>, vector<8x16xf32> -> vector<8x16xf32>
    %cst_142 = arith.constant dense<0.000000e+00> : vector<8x16xf32>
    %225 = tpu.matmul %162, %30, %cst_142 {dimension_numbers = #tpu.dot_dimension_numbers<[1], [0], [0], [1], [0, 0, 1, 1], [], []>} : vector<8x16xf32>, vector<16x16xf32>, vector<8x16xf32> -> vector<8x16xf32>
    %226 = arith.addf %224, %225 : vector<8x16xf32>
    %227 = arith.addf %226, %58 : vector<8x16xf32>
    %228 = arith.negf %227 : vector<8x16xf32>
    %229 = math.exp %228 : vector<8x16xf32>
    %cst_143 = arith.constant 1.000000e+00 : f32
    %230 = vector.broadcast %cst_143 : f32 to vector<8x16xf32>
    %231 = arith.addf %230, %229 : vector<8x16xf32>
    %232 = arith.divf %230, %231 : vector<8x16xf32>
    %cst_144 = arith.constant dense<0.000000e+00> : vector<8x16xf32>
    %233 = tpu.matmul %214, %16, %cst_144 {dimension_numbers = #tpu.dot_dimension_numbers<[1], [0], [0], [1], [0, 0, 1, 1], [], []>} : vector<8x16xf32>, vector<16x16xf32>, vector<8x16xf32> -> vector<8x16xf32>
    %cst_145 = arith.constant dense<0.000000e+00> : vector<8x16xf32>
    %234 = tpu.matmul %162, %32, %cst_145 {dimension_numbers = #tpu.dot_dimension_numbers<[1], [0], [0], [1], [0, 0, 1, 1], [], []>} : vector<8x16xf32>, vector<16x16xf32>, vector<8x16xf32> -> vector<8x16xf32>
    %235 = arith.addf %233, %234 : vector<8x16xf32>
    %236 = arith.addf %235, %62 : vector<8x16xf32>
    %237 = math.tanh %236 : vector<8x16xf32>
    %cst_146 = arith.constant dense<0.000000e+00> : vector<8x16xf32>
    %238 = tpu.matmul %214, %18, %cst_146 {dimension_numbers = #tpu.dot_dimension_numbers<[1], [0], [0], [1], [0, 0, 1, 1], [], []>} : vector<8x16xf32>, vector<16x16xf32>, vector<8x16xf32> -> vector<8x16xf32>
    %cst_147 = arith.constant dense<0.000000e+00> : vector<8x16xf32>
    %239 = tpu.matmul %162, %34, %cst_147 {dimension_numbers = #tpu.dot_dimension_numbers<[1], [0], [0], [1], [0, 0, 1, 1], [], []>} : vector<8x16xf32>, vector<16x16xf32>, vector<8x16xf32> -> vector<8x16xf32>
    %240 = arith.addf %238, %239 : vector<8x16xf32>
    %241 = arith.addf %240, %66 : vector<8x16xf32>
    %242 = arith.negf %241 : vector<8x16xf32>
    %243 = math.exp %242 : vector<8x16xf32>
    %cst_148 = arith.constant 1.000000e+00 : f32
    %244 = vector.broadcast %cst_148 : f32 to vector<8x16xf32>
    %245 = arith.addf %244, %243 : vector<8x16xf32>
    %246 = arith.divf %244, %245 : vector<8x16xf32>
    %247 = arith.mulf %232, %160 : vector<8x16xf32>
    %248 = arith.mulf %223, %237 : vector<8x16xf32>
    %249 = arith.addf %247, %248 : vector<8x16xf32>
    %250 = math.tanh %249 : vector<8x16xf32>
    %251 = arith.mulf %246, %250 : vector<8x16xf32>
    %cst_149 = arith.constant dense<0.000000e+00> : vector<8x128xf32>
    %252 = tpu.matmul %214, %68, %cst_149 {dimension_numbers = #tpu.dot_dimension_numbers<[1], [0], [0], [1], [0, 0, 1, 1], [], []>} : vector<8x16xf32>, vector<16x128xf32>, vector<8x128xf32> -> vector<8x128xf32>
    %253 = arith.addf %77, %252 : vector<8x128xf32>
    %cst_150 = arith.constant dense<0.000000e+00> : vector<8x128xf32>
    %254 = tpu.matmul %212, %70, %cst_150 {dimension_numbers = #tpu.dot_dimension_numbers<[1], [0], [0], [1], [0, 0, 1, 1], [], []>} : vector<8x16xf32>, vector<16x128xf32>, vector<8x128xf32> -> vector<8x128xf32>
    %255 = arith.addf %253, %254 : vector<8x128xf32>
    %cst_151 = arith.constant dense<0.000000e+00> : vector<8x128xf32>
    %256 = tpu.matmul %251, %72, %cst_151 {dimension_numbers = #tpu.dot_dimension_numbers<[1], [0], [0], [1], [0, 0, 1, 1], [], []>} : vector<8x16xf32>, vector<16x128xf32>, vector<8x128xf32> -> vector<8x128xf32>
    %257 = arith.addf %255, %256 : vector<8x128xf32>
    %cst_152 = arith.constant dense<0.000000e+00> : vector<8x128xf32>
    %258 = tpu.matmul %249, %74, %cst_152 {dimension_numbers = #tpu.dot_dimension_numbers<[1], [0], [0], [1], [0, 0, 1, 1], [], []>} : vector<8x16xf32>, vector<16x128xf32>, vector<8x128xf32> -> vector<8x128xf32>
    %259 = arith.addf %257, %258 : vector<8x128xf32>
    %260 = arith.index_cast %c1_i32 : i32 to index
    %c0_153 = arith.constant 0 : index
    %c0_154 = arith.constant 0 : index
    %261 = vector.load %arg10[%260, %c0_153, %c0_154] : memref<8x8x128xf32, #tpu.memory_space<vmem>>, vector<1x8x128xf32>
    %262 = vector.shape_cast %261 : vector<1x8x128xf32> to vector<8x128xf32>
    %263 = vector.shape_cast %259 : vector<8x128xf32> to vector<1x8x128xf32>
    tpu.vector_store %arg10[%260, %c0_153, %c0_154], %263 {strides = array<i32>} : memref<8x8x128xf32, #tpu.memory_space<vmem>>, vector<1x8x128xf32>,
    %c2_i32 = arith.constant 2 : i32
    %264 = arith.index_cast %c2_i32 : i32 to index
    %c0_155 = arith.constant 0 : index
    %c0_156 = arith.constant 0 : index
    %265 = vector.load %arg1[%264, %c0_155, %c0_156] : memref<8x8x16xf32, #tpu.memory_space<vmem>>, vector<1x8x16xf32>
    %266 = vector.shape_cast %265 : vector<1x8x16xf32> to vector<8x16xf32>
    %cst_157 = arith.constant dense<0.000000e+00> : vector<8x16xf32>
    %267 = tpu.matmul %266, %4, %cst_157 {dimension_numbers = #tpu.dot_dimension_numbers<[1], [0], [0], [1], [0, 0, 1, 1], [], []>} : vector<8x16xf32>, vector<16x16xf32>, vector<8x16xf32> -> vector<8x16xf32>
    %cst_158 = arith.constant dense<0.000000e+00> : vector<8x16xf32>
    %268 = tpu.matmul %214, %20, %cst_158 {dimension_numbers = #tpu.dot_dimension_numbers<[1], [0], [0], [1], [0, 0, 1, 1], [], []>} : vector<8x16xf32>, vector<16x16xf32>, vector<8x16xf32> -> vector<8x16xf32>
    %269 = arith.addf %267, %268 : vector<8x16xf32>
    %270 = arith.addf %269, %38 : vector<8x16xf32>
    %271 = arith.negf %270 : vector<8x16xf32>
    %272 = math.exp %271 : vector<8x16xf32>
    %cst_159 = arith.constant 1.000000e+00 : f32
    %273 = vector.broadcast %cst_159 : f32 to vector<8x16xf32>
    %274 = arith.addf %273, %272 : vector<8x16xf32>
    %275 = arith.divf %273, %274 : vector<8x16xf32>
    %cst_160 = arith.constant dense<0.000000e+00> : vector<8x16xf32>
    %276 = tpu.matmul %266, %6, %cst_160 {dimension_numbers = #tpu.dot_dimension_numbers<[1], [0], [0], [1], [0, 0, 1, 1], [], []>} : vector<8x16xf32>, vector<16x16xf32>, vector<8x16xf32> -> vector<8x16xf32>
    %cst_161 = arith.constant dense<0.000000e+00> : vector<8x16xf32>
    %277 = tpu.matmul %214, %22, %cst_161 {dimension_numbers = #tpu.dot_dimension_numbers<[1], [0], [0], [1], [0, 0, 1, 1], [], []>} : vector<8x16xf32>, vector<16x16xf32>, vector<8x16xf32> -> vector<8x16xf32>
    %278 = arith.addf %276, %277 : vector<8x16xf32>
    %279 = arith.addf %278, %42 : vector<8x16xf32>
    %280 = arith.negf %279 : vector<8x16xf32>
    %281 = math.exp %280 : vector<8x16xf32>
    %cst_162 = arith.constant 1.000000e+00 : f32
    %282 = vector.broadcast %cst_162 : f32 to vector<8x16xf32>
    %283 = arith.addf %282, %281 : vector<8x16xf32>
    %284 = arith.divf %282, %283 : vector<8x16xf32>
    %cst_163 = arith.constant dense<0.000000e+00> : vector<8x16xf32>
    %285 = tpu.matmul %266, %8, %cst_163 {dimension_numbers = #tpu.dot_dimension_numbers<[1], [0], [0], [1], [0, 0, 1, 1], [], []>} : vector<8x16xf32>, vector<16x16xf32>, vector<8x16xf32> -> vector<8x16xf32>
    %cst_164 = arith.constant dense<0.000000e+00> : vector<8x16xf32>
    %286 = tpu.matmul %214, %24, %cst_164 {dimension_numbers = #tpu.dot_dimension_numbers<[1], [0], [0], [1], [0, 0, 1, 1], [], []>} : vector<8x16xf32>, vector<16x16xf32>, vector<8x16xf32> -> vector<8x16xf32>
    %287 = arith.addf %285, %286 : vector<8x16xf32>
    %288 = arith.addf %287, %46 : vector<8x16xf32>
    %289 = math.tanh %288 : vector<8x16xf32>
    %cst_165 = arith.constant dense<0.000000e+00> : vector<8x16xf32>
    %290 = tpu.matmul %266, %10, %cst_165 {dimension_numbers = #tpu.dot_dimension_numbers<[1], [0], [0], [1], [0, 0, 1, 1], [], []>} : vector<8x16xf32>, vector<16x16xf32>, vector<8x16xf32> -> vector<8x16xf32>
    %cst_166 = arith.constant dense<0.000000e+00> : vector<8x16xf32>
    %291 = tpu.matmul %214, %26, %cst_166 {dimension_numbers = #tpu.dot_dimension_numbers<[1], [0], [0], [1], [0, 0, 1, 1], [], []>} : vector<8x16xf32>, vector<16x16xf32>, vector<8x16xf32> -> vector<8x16xf32>
    %292 = arith.addf %290, %291 : vector<8x16xf32>
    %293 = arith.addf %292, %50 : vector<8x16xf32>
    %294 = arith.negf %293 : vector<8x16xf32>
    %295 = math.exp %294 : vector<8x16xf32>
    %cst_167 = arith.constant 1.000000e+00 : f32
    %296 = vector.broadcast %cst_167 : f32 to vector<8x16xf32>
    %297 = arith.addf %296, %295 : vector<8x16xf32>
    %298 = arith.divf %296, %297 : vector<8x16xf32>
    %299 = arith.mulf %284, %212 : vector<8x16xf32>
    %300 = arith.mulf %275, %289 : vector<8x16xf32>
    %301 = arith.addf %299, %300 : vector<8x16xf32>
    %302 = math.tanh %301 : vector<8x16xf32>
    %303 = arith.mulf %298, %302 : vector<8x16xf32>
    %cst_168 = arith.constant dense<0.000000e+00> : vector<8x16xf32>
    %304 = tpu.matmul %303, %12, %cst_168 {dimension_numbers = #tpu.dot_dimension_numbers<[1], [0], [0], [1], [0, 0, 1, 1], [], []>} : vector<8x16xf32>, vector<16x16xf32>, vector<8x16xf32> -> vector<8x16xf32>
    %cst_169 = arith.constant dense<0.000000e+00> : vector<8x16xf32>
    %305 = tpu.matmul %251, %28, %cst_169 {dimension_numbers = #tpu.dot_dimension_numbers<[1], [0], [0], [1], [0, 0, 1, 1], [], []>} : vector<8x16xf32>, vector<16x16xf32>, vector<8x16xf32> -> vector<8x16xf32>
    %306 = arith.addf %304, %305 : vector<8x16xf32>
    %307 = arith.addf %306, %54 : vector<8x16xf32>
    %308 = arith.negf %307 : vector<8x16xf32>
    %309 = math.exp %308 : vector<8x16xf32>
    %cst_170 = arith.constant 1.000000e+00 : f32
    %310 = vector.broadcast %cst_170 : f32 to vector<8x16xf32>
    %311 = arith.addf %310, %309 : vector<8x16xf32>
    %312 = arith.divf %310, %311 : vector<8x16xf32>
    %cst_171 = arith.constant dense<0.000000e+00> : vector<8x16xf32>
    %313 = tpu.matmul %303, %14, %cst_171 {dimension_numbers = #tpu.dot_dimension_numbers<[1], [0], [0], [1], [0, 0, 1, 1], [], []>} : vector<8x16xf32>, vector<16x16xf32>, vector<8x16xf32> -> vector<8x16xf32>
    %cst_172 = arith.constant dense<0.000000e+00> : vector<8x16xf32>
    %314 = tpu.matmul %251, %30, %cst_172 {dimension_numbers = #tpu.dot_dimension_numbers<[1], [0], [0], [1], [0, 0, 1, 1], [], []>} : vector<8x16xf32>, vector<16x16xf32>, vector<8x16xf32> -> vector<8x16xf32>
    %315 = arith.addf %313, %314 : vector<8x16xf32>
    %316 = arith.addf %315, %58 : vector<8x16xf32>
    %317 = arith.negf %316 : vector<8x16xf32>
    %318 = math.exp %317 : vector<8x16xf32>
    %cst_173 = arith.constant 1.000000e+00 : f32
    %319 = vector.broadcast %cst_173 : f32 to vector<8x16xf32>
    %320 = arith.addf %319, %318 : vector<8x16xf32>
    %321 = arith.divf %319, %320 : vector<8x16xf32>
    %cst_174 = arith.constant dense<0.000000e+00> : vector<8x16xf32>
    %322 = tpu.matmul %303, %16, %cst_174 {dimension_numbers = #tpu.dot_dimension_numbers<[1], [0], [0], [1], [0, 0, 1, 1], [], []>} : vector<8x16xf32>, vector<16x16xf32>, vector<8x16xf32> -> vector<8x16xf32>
    %cst_175 = arith.constant dense<0.000000e+00> : vector<8x16xf32>
    %323 = tpu.matmul %251, %32, %cst_175 {dimension_numbers = #tpu.dot_dimension_numbers<[1], [0], [0], [1], [0, 0, 1, 1], [], []>} : vector<8x16xf32>, vector<16x16xf32>, vector<8x16xf32> -> vector<8x16xf32>
    %324 = arith.addf %322, %323 : vector<8x16xf32>
    %325 = arith.addf %324, %62 : vector<8x16xf32>
    %326 = math.tanh %325 : vector<8x16xf32>
    %cst_176 = arith.constant dense<0.000000e+00> : vector<8x16xf32>
    %327 = tpu.matmul %303, %18, %cst_176 {dimension_numbers = #tpu.dot_dimension_numbers<[1], [0], [0], [1], [0, 0, 1, 1], [], []>} : vector<8x16xf32>, vector<16x16xf32>, vector<8x16xf32> -> vector<8x16xf32>
    %cst_177 = arith.constant dense<0.000000e+00> : vector<8x16xf32>
    %328 = tpu.matmul %251, %34, %cst_177 {dimension_numbers = #tpu.dot_dimension_numbers<[1], [0], [0], [1], [0, 0, 1, 1], [], []>} : vector<8x16xf32>, vector<16x16xf32>, vector<8x16xf32> -> vector<8x16xf32>
    %329 = arith.addf %327, %328 : vector<8x16xf32>
    %330 = arith.addf %329, %66 : vector<8x16xf32>
    %331 = arith.negf %330 : vector<8x16xf32>
    %332 = math.exp %331 : vector<8x16xf32>
    %cst_178 = arith.constant 1.000000e+00 : f32
    %333 = vector.broadcast %cst_178 : f32 to vector<8x16xf32>
    %334 = arith.addf %333, %332 : vector<8x16xf32>
    %335 = arith.divf %333, %334 : vector<8x16xf32>
    %336 = arith.mulf %321, %249 : vector<8x16xf32>
    %337 = arith.mulf %312, %326 : vector<8x16xf32>
    %338 = arith.addf %336, %337 : vector<8x16xf32>
    %339 = math.tanh %338 : vector<8x16xf32>
    %340 = arith.mulf %335, %339 : vector<8x16xf32>
    %cst_179 = arith.constant dense<0.000000e+00> : vector<8x128xf32>
    %341 = tpu.matmul %303, %68, %cst_179 {dimension_numbers = #tpu.dot_dimension_numbers<[1], [0], [0], [1], [0, 0, 1, 1], [], []>} : vector<8x16xf32>, vector<16x128xf32>, vector<8x128xf32> -> vector<8x128xf32>
    %342 = arith.addf %77, %341 : vector<8x128xf32>
    %cst_180 = arith.constant dense<0.000000e+00> : vector<8x128xf32>
    %343 = tpu.matmul %301, %70, %cst_180 {dimension_numbers = #tpu.dot_dimension_numbers<[1], [0], [0], [1], [0, 0, 1, 1], [], []>} : vector<8x16xf32>, vector<16x128xf32>, vector<8x128xf32> -> vector<8x128xf32>
    %344 = arith.addf %342, %343 : vector<8x128xf32>
    %cst_181 = arith.constant dense<0.000000e+00> : vector<8x128xf32>
    %345 = tpu.matmul %340, %72, %cst_181 {dimension_numbers = #tpu.dot_dimension_numbers<[1], [0], [0], [1], [0, 0, 1, 1], [], []>} : vector<8x16xf32>, vector<16x128xf32>, vector<8x128xf32> -> vector<8x128xf32>
    %346 = arith.addf %344, %345 : vector<8x128xf32>
    %cst_182 = arith.constant dense<0.000000e+00> : vector<8x128xf32>
    %347 = tpu.matmul %338, %74, %cst_182 {dimension_numbers = #tpu.dot_dimension_numbers<[1], [0], [0], [1], [0, 0, 1, 1], [], []>} : vector<8x16xf32>, vector<16x128xf32>, vector<8x128xf32> -> vector<8x128xf32>
    %348 = arith.addf %346, %347 : vector<8x128xf32>
    %349 = arith.index_cast %c2_i32 : i32 to index
    %c0_183 = arith.constant 0 : index
    %c0_184 = arith.constant 0 : index
    %350 = vector.load %arg10[%349, %c0_183, %c0_184] : memref<8x8x128xf32, #tpu.memory_space<vmem>>, vector<1x8x128xf32>
    %351 = vector.shape_cast %350 : vector<1x8x128xf32> to vector<8x128xf32>
    %352 = vector.shape_cast %348 : vector<8x128xf32> to vector<1x8x128xf32>
    tpu.vector_store %arg10[%349, %c0_183, %c0_184], %352 {strides = array<i32>} : memref<8x8x128xf32, #tpu.memory_space<vmem>>, vector<1x8x128xf32>,
    %c3_i32 = arith.constant 3 : i32
    %353 = arith.index_cast %c3_i32 : i32 to index
    %c0_185 = arith.constant 0 : index
    %c0_186 = arith.constant 0 : index
    %354 = vector.load %arg1[%353, %c0_185, %c0_186] : memref<8x8x16xf32, #tpu.memory_space<vmem>>, vector<1x8x16xf32>
    %355 = vector.shape_cast %354 : vector<1x8x16xf32> to vector<8x16xf32>
    %cst_187 = arith.constant dense<0.000000e+00> : vector<8x16xf32>
    %356 = tpu.matmul %355, %4, %cst_187 {dimension_numbers = #tpu.dot_dimension_numbers<[1], [0], [0], [1], [0, 0, 1, 1], [], []>} : vector<8x16xf32>, vector<16x16xf32>, vector<8x16xf32> -> vector<8x16xf32>
    %cst_188 = arith.constant dense<0.000000e+00> : vector<8x16xf32>
    %357 = tpu.matmul %303, %20, %cst_188 {dimension_numbers = #tpu.dot_dimension_numbers<[1], [0], [0], [1], [0, 0, 1, 1], [], []>} : vector<8x16xf32>, vector<16x16xf32>, vector<8x16xf32> -> vector<8x16xf32>
    %358 = arith.addf %356, %357 : vector<8x16xf32>
    %359 = arith.addf %358, %38 : vector<8x16xf32>
    %360 = arith.negf %359 : vector<8x16xf32>
    %361 = math.exp %360 : vector<8x16xf32>
    %cst_189 = arith.constant 1.000000e+00 : f32
    %362 = vector.broadcast %cst_189 : f32 to vector<8x16xf32>
    %363 = arith.addf %362, %361 : vector<8x16xf32>
    %364 = arith.divf %362, %363 : vector<8x16xf32>
    %cst_190 = arith.constant dense<0.000000e+00> : vector<8x16xf32>
    %365 = tpu.matmul %355, %6, %cst_190 {dimension_numbers = #tpu.dot_dimension_numbers<[1], [0], [0], [1], [0, 0, 1, 1], [], []>} : vector<8x16xf32>, vector<16x16xf32>, vector<8x16xf32> -> vector<8x16xf32>
    %cst_191 = arith.constant dense<0.000000e+00> : vector<8x16xf32>
    %366 = tpu.matmul %303, %22, %cst_191 {dimension_numbers = #tpu.dot_dimension_numbers<[1], [0], [0], [1], [0, 0, 1, 1], [], []>} : vector<8x16xf32>, vector<16x16xf32>, vector<8x16xf32> -> vector<8x16xf32>
    %367 = arith.addf %365, %366 : vector<8x16xf32>
    %368 = arith.addf %367, %42 : vector<8x16xf32>
    %369 = arith.negf %368 : vector<8x16xf32>
    %370 = math.exp %369 : vector<8x16xf32>
    %cst_192 = arith.constant 1.000000e+00 : f32
    %371 = vector.broadcast %cst_192 : f32 to vector<8x16xf32>
    %372 = arith.addf %371, %370 : vector<8x16xf32>
    %373 = arith.divf %371, %372 : vector<8x16xf32>
    %cst_193 = arith.constant dense<0.000000e+00> : vector<8x16xf32>
    %374 = tpu.matmul %355, %8, %cst_193 {dimension_numbers = #tpu.dot_dimension_numbers<[1], [0], [0], [1], [0, 0, 1, 1], [], []>} : vector<8x16xf32>, vector<16x16xf32>, vector<8x16xf32> -> vector<8x16xf32>
    %cst_194 = arith.constant dense<0.000000e+00> : vector<8x16xf32>
    %375 = tpu.matmul %303, %24, %cst_194 {dimension_numbers = #tpu.dot_dimension_numbers<[1], [0], [0], [1], [0, 0, 1, 1], [], []>} : vector<8x16xf32>, vector<16x16xf32>, vector<8x16xf32> -> vector<8x16xf32>
    %376 = arith.addf %374, %375 : vector<8x16xf32>
    %377 = arith.addf %376, %46 : vector<8x16xf32>
    %378 = math.tanh %377 : vector<8x16xf32>
    %cst_195 = arith.constant dense<0.000000e+00> : vector<8x16xf32>
    %379 = tpu.matmul %355, %10, %cst_195 {dimension_numbers = #tpu.dot_dimension_numbers<[1], [0], [0], [1], [0, 0, 1, 1], [], []>} : vector<8x16xf32>, vector<16x16xf32>, vector<8x16xf32> -> vector<8x16xf32>
    %cst_196 = arith.constant dense<0.000000e+00> : vector<8x16xf32>
    %380 = tpu.matmul %303, %26, %cst_196 {dimension_numbers = #tpu.dot_dimension_numbers<[1], [0], [0], [1], [0, 0, 1, 1], [], []>} : vector<8x16xf32>, vector<16x16xf32>, vector<8x16xf32> -> vector<8x16xf32>
    %381 = arith.addf %379, %380 : vector<8x16xf32>
    %382 = arith.addf %381, %50 : vector<8x16xf32>
    %383 = arith.negf %382 : vector<8x16xf32>
    %384 = math.exp %383 : vector<8x16xf32>
    %cst_197 = arith.constant 1.000000e+00 : f32
    %385 = vector.broadcast %cst_197 : f32 to vector<8x16xf32>
    %386 = arith.addf %385, %384 : vector<8x16xf32>
    %387 = arith.divf %385, %386 : vector<8x16xf32>
    %388 = arith.mulf %373, %301 : vector<8x16xf32>
    %389 = arith.mulf %364, %378 : vector<8x16xf32>
    %390 = arith.addf %388, %389 : vector<8x16xf32>
    %391 = math.tanh %390 : vector<8x16xf32>
    %392 = arith.mulf %387, %391 : vector<8x16xf32>
    %cst_198 = arith.constant dense<0.000000e+00> : vector<8x16xf32>
    %393 = tpu.matmul %392, %12, %cst_198 {dimension_numbers = #tpu.dot_dimension_numbers<[1], [0], [0], [1], [0, 0, 1, 1], [], []>} : vector<8x16xf32>, vector<16x16xf32>, vector<8x16xf32> -> vector<8x16xf32>
    %cst_199 = arith.constant dense<0.000000e+00> : vector<8x16xf32>
    %394 = tpu.matmul %340, %28, %cst_199 {dimension_numbers = #tpu.dot_dimension_numbers<[1], [0], [0], [1], [0, 0, 1, 1], [], []>} : vector<8x16xf32>, vector<16x16xf32>, vector<8x16xf32> -> vector<8x16xf32>
    %395 = arith.addf %393, %394 : vector<8x16xf32>
    %396 = arith.addf %395, %54 : vector<8x16xf32>
    %397 = arith.negf %396 : vector<8x16xf32>
    %398 = math.exp %397 : vector<8x16xf32>
    %cst_200 = arith.constant 1.000000e+00 : f32
    %399 = vector.broadcast %cst_200 : f32 to vector<8x16xf32>
    %400 = arith.addf %399, %398 : vector<8x16xf32>
    %401 = arith.divf %399, %400 : vector<8x16xf32>
    %cst_201 = arith.constant dense<0.000000e+00> : vector<8x16xf32>
    %402 = tpu.matmul %392, %14, %cst_201 {dimension_numbers = #tpu.dot_dimension_numbers<[1], [0], [0], [1], [0, 0, 1, 1], [], []>} : vector<8x16xf32>, vector<16x16xf32>, vector<8x16xf32> -> vector<8x16xf32>
    %cst_202 = arith.constant dense<0.000000e+00> : vector<8x16xf32>
    %403 = tpu.matmul %340, %30, %cst_202 {dimension_numbers = #tpu.dot_dimension_numbers<[1], [0], [0], [1], [0, 0, 1, 1], [], []>} : vector<8x16xf32>, vector<16x16xf32>, vector<8x16xf32> -> vector<8x16xf32>
    %404 = arith.addf %402, %403 : vector<8x16xf32>
    %405 = arith.addf %404, %58 : vector<8x16xf32>
    %406 = arith.negf %405 : vector<8x16xf32>
    %407 = math.exp %406 : vector<8x16xf32>
    %cst_203 = arith.constant 1.000000e+00 : f32
    %408 = vector.broadcast %cst_203 : f32 to vector<8x16xf32>
    %409 = arith.addf %408, %407 : vector<8x16xf32>
    %410 = arith.divf %408, %409 : vector<8x16xf32>
    %cst_204 = arith.constant dense<0.000000e+00> : vector<8x16xf32>
    %411 = tpu.matmul %392, %16, %cst_204 {dimension_numbers = #tpu.dot_dimension_numbers<[1], [0], [0], [1], [0, 0, 1, 1], [], []>} : vector<8x16xf32>, vector<16x16xf32>, vector<8x16xf32> -> vector<8x16xf32>
    %cst_205 = arith.constant dense<0.000000e+00> : vector<8x16xf32>
    %412 = tpu.matmul %340, %32, %cst_205 {dimension_numbers = #tpu.dot_dimension_numbers<[1], [0], [0], [1], [0, 0, 1, 1], [], []>} : vector<8x16xf32>, vector<16x16xf32>, vector<8x16xf32> -> vector<8x16xf32>
    %413 = arith.addf %411, %412 : vector<8x16xf32>
    %414 = arith.addf %413, %62 : vector<8x16xf32>
    %415 = math.tanh %414 : vector<8x16xf32>
    %cst_206 = arith.constant dense<0.000000e+00> : vector<8x16xf32>
    %416 = tpu.matmul %392, %18, %cst_206 {dimension_numbers = #tpu.dot_dimension_numbers<[1], [0], [0], [1], [0, 0, 1, 1], [], []>} : vector<8x16xf32>, vector<16x16xf32>, vector<8x16xf32> -> vector<8x16xf32>
    %cst_207 = arith.constant dense<0.000000e+00> : vector<8x16xf32>
    %417 = tpu.matmul %340, %34, %cst_207 {dimension_numbers = #tpu.dot_dimension_numbers<[1], [0], [0], [1], [0, 0, 1, 1], [], []>} : vector<8x16xf32>, vector<16x16xf32>, vector<8x16xf32> -> vector<8x16xf32>
    %418 = arith.addf %416, %417 : vector<8x16xf32>
    %419 = arith.addf %418, %66 : vector<8x16xf32>
    %420 = arith.negf %419 : vector<8x16xf32>
    %421 = math.exp %420 : vector<8x16xf32>
    %cst_208 = arith.constant 1.000000e+00 : f32
    %422 = vector.broadcast %cst_208 : f32 to vector<8x16xf32>
    %423 = arith.addf %422, %421 : vector<8x16xf32>
    %424 = arith.divf %422, %423 : vector<8x16xf32>
    %425 = arith.mulf %410, %338 : vector<8x16xf32>
    %426 = arith.mulf %401, %415 : vector<8x16xf32>
    %427 = arith.addf %425, %426 : vector<8x16xf32>
    %428 = math.tanh %427 : vector<8x16xf32>
    %429 = arith.mulf %424, %428 : vector<8x16xf32>
    %cst_209 = arith.constant dense<0.000000e+00> : vector<8x128xf32>
    %430 = tpu.matmul %392, %68, %cst_209 {dimension_numbers = #tpu.dot_dimension_numbers<[1], [0], [0], [1], [0, 0, 1, 1], [], []>} : vector<8x16xf32>, vector<16x128xf32>, vector<8x128xf32> -> vector<8x128xf32>
    %431 = arith.addf %77, %430 : vector<8x128xf32>
    %cst_210 = arith.constant dense<0.000000e+00> : vector<8x128xf32>
    %432 = tpu.matmul %390, %70, %cst_210 {dimension_numbers = #tpu.dot_dimension_numbers<[1], [0], [0], [1], [0, 0, 1, 1], [], []>} : vector<8x16xf32>, vector<16x128xf32>, vector<8x128xf32> -> vector<8x128xf32>
    %433 = arith.addf %431, %432 : vector<8x128xf32>
    %cst_211 = arith.constant dense<0.000000e+00> : vector<8x128xf32>
    %434 = tpu.matmul %429, %72, %cst_211 {dimension_numbers = #tpu.dot_dimension_numbers<[1], [0], [0], [1], [0, 0, 1, 1], [], []>} : vector<8x16xf32>, vector<16x128xf32>, vector<8x128xf32> -> vector<8x128xf32>
    %435 = arith.addf %433, %434 : vector<8x128xf32>
    %cst_212 = arith.constant dense<0.000000e+00> : vector<8x128xf32>
    %436 = tpu.matmul %427, %74, %cst_212 {dimension_numbers = #tpu.dot_dimension_numbers<[1], [0], [0], [1], [0, 0, 1, 1], [], []>} : vector<8x16xf32>, vector<16x128xf32>, vector<8x128xf32> -> vector<8x128xf32>
    %437 = arith.addf %435, %436 : vector<8x128xf32>
    %438 = arith.index_cast %c3_i32 : i32 to index
    %c0_213 = arith.constant 0 : index
    %c0_214 = arith.constant 0 : index
    %439 = vector.load %arg10[%438, %c0_213, %c0_214] : memref<8x8x128xf32, #tpu.memory_space<vmem>>, vector<1x8x128xf32>
    %440 = vector.shape_cast %439 : vector<1x8x128xf32> to vector<8x128xf32>
    %441 = vector.shape_cast %437 : vector<8x128xf32> to vector<1x8x128xf32>
    tpu.vector_store %arg10[%438, %c0_213, %c0_214], %441 {strides = array<i32>} : memref<8x8x128xf32, #tpu.memory_space<vmem>>, vector<1x8x128xf32>,
    %c4_i32 = arith.constant 4 : i32
    %442 = arith.index_cast %c4_i32 : i32 to index
    %c0_215 = arith.constant 0 : index
    %c0_216 = arith.constant 0 : index
    %443 = vector.load %arg1[%442, %c0_215, %c0_216] : memref<8x8x16xf32, #tpu.memory_space<vmem>>, vector<1x8x16xf32>
    %444 = vector.shape_cast %443 : vector<1x8x16xf32> to vector<8x16xf32>
    %cst_217 = arith.constant dense<0.000000e+00> : vector<8x16xf32>
    %445 = tpu.matmul %444, %4, %cst_217 {dimension_numbers = #tpu.dot_dimension_numbers<[1], [0], [0], [1], [0, 0, 1, 1], [], []>} : vector<8x16xf32>, vector<16x16xf32>, vector<8x16xf32> -> vector<8x16xf32>
    %cst_218 = arith.constant dense<0.000000e+00> : vector<8x16xf32>
    %446 = tpu.matmul %392, %20, %cst_218 {dimension_numbers = #tpu.dot_dimension_numbers<[1], [0], [0], [1], [0, 0, 1, 1], [], []>} : vector<8x16xf32>, vector<16x16xf32>, vector<8x16xf32> -> vector<8x16xf32>
    %447 = arith.addf %445, %446 : vector<8x16xf32>
    %448 = arith.addf %447, %38 : vector<8x16xf32>
    %449 = arith.negf %448 : vector<8x16xf32>
    %450 = math.exp %449 : vector<8x16xf32>
    %cst_219 = arith.constant 1.000000e+00 : f32
    %451 = vector.broadcast %cst_219 : f32 to vector<8x16xf32>
    %452 = arith.addf %451, %450 : vector<8x16xf32>
    %453 = arith.divf %451, %452 : vector<8x16xf32>
    %cst_220 = arith.constant dense<0.000000e+00> : vector<8x16xf32>
    %454 = tpu.matmul %444, %6, %cst_220 {dimension_numbers = #tpu.dot_dimension_numbers<[1], [0], [0], [1], [0, 0, 1, 1], [], []>} : vector<8x16xf32>, vector<16x16xf32>, vector<8x16xf32> -> vector<8x16xf32>
    %cst_221 = arith.constant dense<0.000000e+00> : vector<8x16xf32>
    %455 = tpu.matmul %392, %22, %cst_221 {dimension_numbers = #tpu.dot_dimension_numbers<[1], [0], [0], [1], [0, 0, 1, 1], [], []>} : vector<8x16xf32>, vector<16x16xf32>, vector<8x16xf32> -> vector<8x16xf32>
    %456 = arith.addf %454, %455 : vector<8x16xf32>
    %457 = arith.addf %456, %42 : vector<8x16xf32>
    %458 = arith.negf %457 : vector<8x16xf32>
    %459 = math.exp %458 : vector<8x16xf32>
    %cst_222 = arith.constant 1.000000e+00 : f32
    %460 = vector.broadcast %cst_222 : f32 to vector<8x16xf32>
    %461 = arith.addf %460, %459 : vector<8x16xf32>
    %462 = arith.divf %460, %461 : vector<8x16xf32>
    %cst_223 = arith.constant dense<0.000000e+00> : vector<8x16xf32>
    %463 = tpu.matmul %444, %8, %cst_223 {dimension_numbers = #tpu.dot_dimension_numbers<[1], [0], [0], [1], [0, 0, 1, 1], [], []>} : vector<8x16xf32>, vector<16x16xf32>, vector<8x16xf32> -> vector<8x16xf32>
    %cst_224 = arith.constant dense<0.000000e+00> : vector<8x16xf32>
    %464 = tpu.matmul %392, %24, %cst_224 {dimension_numbers = #tpu.dot_dimension_numbers<[1], [0], [0], [1], [0, 0, 1, 1], [], []>} : vector<8x16xf32>, vector<16x16xf32>, vector<8x16xf32> -> vector<8x16xf32>
    %465 = arith.addf %463, %464 : vector<8x16xf32>
    %466 = arith.addf %465, %46 : vector<8x16xf32>
    %467 = math.tanh %466 : vector<8x16xf32>
    %cst_225 = arith.constant dense<0.000000e+00> : vector<8x16xf32>
    %468 = tpu.matmul %444, %10, %cst_225 {dimension_numbers = #tpu.dot_dimension_numbers<[1], [0], [0], [1], [0, 0, 1, 1], [], []>} : vector<8x16xf32>, vector<16x16xf32>, vector<8x16xf32> -> vector<8x16xf32>
    %cst_226 = arith.constant dense<0.000000e+00> : vector<8x16xf32>
    %469 = tpu.matmul %392, %26, %cst_226 {dimension_numbers = #tpu.dot_dimension_numbers<[1], [0], [0], [1], [0, 0, 1, 1], [], []>} : vector<8x16xf32>, vector<16x16xf32>, vector<8x16xf32> -> vector<8x16xf32>
    %470 = arith.addf %468, %469 : vector<8x16xf32>
    %471 = arith.addf %470, %50 : vector<8x16xf32>
    %472 = arith.negf %471 : vector<8x16xf32>
    %473 = math.exp %472 : vector<8x16xf32>
    %cst_227 = arith.constant 1.000000e+00 : f32
    %474 = vector.broadcast %cst_227 : f32 to vector<8x16xf32>
    %475 = arith.addf %474, %473 : vector<8x16xf32>
    %476 = arith.divf %474, %475 : vector<8x16xf32>
    %477 = arith.mulf %462, %390 : vector<8x16xf32>
    %478 = arith.mulf %453, %467 : vector<8x16xf32>
    %479 = arith.addf %477, %478 : vector<8x16xf32>
    %480 = math.tanh %479 : vector<8x16xf32>
    %481 = arith.mulf %476, %480 : vector<8x16xf32>
    %cst_228 = arith.constant dense<0.000000e+00> : vector<8x16xf32>
    %482 = tpu.matmul %481, %12, %cst_228 {dimension_numbers = #tpu.dot_dimension_numbers<[1], [0], [0], [1], [0, 0, 1, 1], [], []>} : vector<8x16xf32>, vector<16x16xf32>, vector<8x16xf32> -> vector<8x16xf32>
    %cst_229 = arith.constant dense<0.000000e+00> : vector<8x16xf32>
    %483 = tpu.matmul %429, %28, %cst_229 {dimension_numbers = #tpu.dot_dimension_numbers<[1], [0], [0], [1], [0, 0, 1, 1], [], []>} : vector<8x16xf32>, vector<16x16xf32>, vector<8x16xf32> -> vector<8x16xf32>
    %484 = arith.addf %482, %483 : vector<8x16xf32>
    %485 = arith.addf %484, %54 : vector<8x16xf32>
    %486 = arith.negf %485 : vector<8x16xf32>
    %487 = math.exp %486 : vector<8x16xf32>
    %cst_230 = arith.constant 1.000000e+00 : f32
    %488 = vector.broadcast %cst_230 : f32 to vector<8x16xf32>
    %489 = arith.addf %488, %487 : vector<8x16xf32>
    %490 = arith.divf %488, %489 : vector<8x16xf32>
    %cst_231 = arith.constant dense<0.000000e+00> : vector<8x16xf32>
    %491 = tpu.matmul %481, %14, %cst_231 {dimension_numbers = #tpu.dot_dimension_numbers<[1], [0], [0], [1], [0, 0, 1, 1], [], []>} : vector<8x16xf32>, vector<16x16xf32>, vector<8x16xf32> -> vector<8x16xf32>
    %cst_232 = arith.constant dense<0.000000e+00> : vector<8x16xf32>
    %492 = tpu.matmul %429, %30, %cst_232 {dimension_numbers = #tpu.dot_dimension_numbers<[1], [0], [0], [1], [0, 0, 1, 1], [], []>} : vector<8x16xf32>, vector<16x16xf32>, vector<8x16xf32> -> vector<8x16xf32>
    %493 = arith.addf %491, %492 : vector<8x16xf32>
    %494 = arith.addf %493, %58 : vector<8x16xf32>
    %495 = arith.negf %494 : vector<8x16xf32>
    %496 = math.exp %495 : vector<8x16xf32>
    %cst_233 = arith.constant 1.000000e+00 : f32
    %497 = vector.broadcast %cst_233 : f32 to vector<8x16xf32>
    %498 = arith.addf %497, %496 : vector<8x16xf32>
    %499 = arith.divf %497, %498 : vector<8x16xf32>
    %cst_234 = arith.constant dense<0.000000e+00> : vector<8x16xf32>
    %500 = tpu.matmul %481, %16, %cst_234 {dimension_numbers = #tpu.dot_dimension_numbers<[1], [0], [0], [1], [0, 0, 1, 1], [], []>} : vector<8x16xf32>, vector<16x16xf32>, vector<8x16xf32> -> vector<8x16xf32>
    %cst_235 = arith.constant dense<0.000000e+00> : vector<8x16xf32>
    %501 = tpu.matmul %429, %32, %cst_235 {dimension_numbers = #tpu.dot_dimension_numbers<[1], [0], [0], [1], [0, 0, 1, 1], [], []>} : vector<8x16xf32>, vector<16x16xf32>, vector<8x16xf32> -> vector<8x16xf32>
    %502 = arith.addf %500, %501 : vector<8x16xf32>
    %503 = arith.addf %502, %62 : vector<8x16xf32>
    %504 = math.tanh %503 : vector<8x16xf32>
    %cst_236 = arith.constant dense<0.000000e+00> : vector<8x16xf32>
    %505 = tpu.matmul %481, %18, %cst_236 {dimension_numbers = #tpu.dot_dimension_numbers<[1], [0], [0], [1], [0, 0, 1, 1], [], []>} : vector<8x16xf32>, vector<16x16xf32>, vector<8x16xf32> -> vector<8x16xf32>
    %cst_237 = arith.constant dense<0.000000e+00> : vector<8x16xf32>
    %506 = tpu.matmul %429, %34, %cst_237 {dimension_numbers = #tpu.dot_dimension_numbers<[1], [0], [0], [1], [0, 0, 1, 1], [], []>} : vector<8x16xf32>, vector<16x16xf32>, vector<8x16xf32> -> vector<8x16xf32>
    %507 = arith.addf %505, %506 : vector<8x16xf32>
    %508 = arith.addf %507, %66 : vector<8x16xf32>
    %509 = arith.negf %508 : vector<8x16xf32>
    %510 = math.exp %509 : vector<8x16xf32>
    %cst_238 = arith.constant 1.000000e+00 : f32
    %511 = vector.broadcast %cst_238 : f32 to vector<8x16xf32>
    %512 = arith.addf %511, %510 : vector<8x16xf32>
    %513 = arith.divf %511, %512 : vector<8x16xf32>
    %514 = arith.mulf %499, %427 : vector<8x16xf32>
    %515 = arith.mulf %490, %504 : vector<8x16xf32>
    %516 = arith.addf %514, %515 : vector<8x16xf32>
    %517 = math.tanh %516 : vector<8x16xf32>
    %518 = arith.mulf %513, %517 : vector<8x16xf32>
    %cst_239 = arith.constant dense<0.000000e+00> : vector<8x128xf32>
    %519 = tpu.matmul %481, %68, %cst_239 {dimension_numbers = #tpu.dot_dimension_numbers<[1], [0], [0], [1], [0, 0, 1, 1], [], []>} : vector<8x16xf32>, vector<16x128xf32>, vector<8x128xf32> -> vector<8x128xf32>
    %520 = arith.addf %77, %519 : vector<8x128xf32>
    %cst_240 = arith.constant dense<0.000000e+00> : vector<8x128xf32>
    %521 = tpu.matmul %479, %70, %cst_240 {dimension_numbers = #tpu.dot_dimension_numbers<[1], [0], [0], [1], [0, 0, 1, 1], [], []>} : vector<8x16xf32>, vector<16x128xf32>, vector<8x128xf32> -> vector<8x128xf32>
    %522 = arith.addf %520, %521 : vector<8x128xf32>
    %cst_241 = arith.constant dense<0.000000e+00> : vector<8x128xf32>
    %523 = tpu.matmul %518, %72, %cst_241 {dimension_numbers = #tpu.dot_dimension_numbers<[1], [0], [0], [1], [0, 0, 1, 1], [], []>} : vector<8x16xf32>, vector<16x128xf32>, vector<8x128xf32> -> vector<8x128xf32>
    %524 = arith.addf %522, %523 : vector<8x128xf32>
    %cst_242 = arith.constant dense<0.000000e+00> : vector<8x128xf32>
    %525 = tpu.matmul %516, %74, %cst_242 {dimension_numbers = #tpu.dot_dimension_numbers<[1], [0], [0], [1], [0, 0, 1, 1], [], []>} : vector<8x16xf32>, vector<16x128xf32>, vector<8x128xf32> -> vector<8x128xf32>
    %526 = arith.addf %524, %525 : vector<8x128xf32>
    %527 = arith.index_cast %c4_i32 : i32 to index
    %c0_243 = arith.constant 0 : index
    %c0_244 = arith.constant 0 : index
    %528 = vector.load %arg10[%527, %c0_243, %c0_244] : memref<8x8x128xf32, #tpu.memory_space<vmem>>, vector<1x8x128xf32>
    %529 = vector.shape_cast %528 : vector<1x8x128xf32> to vector<8x128xf32>
    %530 = vector.shape_cast %526 : vector<8x128xf32> to vector<1x8x128xf32>
    tpu.vector_store %arg10[%527, %c0_243, %c0_244], %530 {strides = array<i32>} : memref<8x8x128xf32, #tpu.memory_space<vmem>>, vector<1x8x128xf32>,
    %c5_i32 = arith.constant 5 : i32
    %531 = arith.index_cast %c5_i32 : i32 to index
    %c0_245 = arith.constant 0 : index
    %c0_246 = arith.constant 0 : index
    %532 = vector.load %arg1[%531, %c0_245, %c0_246] : memref<8x8x16xf32, #tpu.memory_space<vmem>>, vector<1x8x16xf32>
    %533 = vector.shape_cast %532 : vector<1x8x16xf32> to vector<8x16xf32>
    %cst_247 = arith.constant dense<0.000000e+00> : vector<8x16xf32>
    %534 = tpu.matmul %533, %4, %cst_247 {dimension_numbers = #tpu.dot_dimension_numbers<[1], [0], [0], [1], [0, 0, 1, 1], [], []>} : vector<8x16xf32>, vector<16x16xf32>, vector<8x16xf32> -> vector<8x16xf32>
    %cst_248 = arith.constant dense<0.000000e+00> : vector<8x16xf32>
    %535 = tpu.matmul %481, %20, %cst_248 {dimension_numbers = #tpu.dot_dimension_numbers<[1], [0], [0], [1], [0, 0, 1, 1], [], []>} : vector<8x16xf32>, vector<16x16xf32>, vector<8x16xf32> -> vector<8x16xf32>
    %536 = arith.addf %534, %535 : vector<8x16xf32>
    %537 = arith.addf %536, %38 : vector<8x16xf32>
    %538 = arith.negf %537 : vector<8x16xf32>
    %539 = math.exp %538 : vector<8x16xf32>
    %cst_249 = arith.constant 1.000000e+00 : f32
    %540 = vector.broadcast %cst_249 : f32 to vector<8x16xf32>
    %541 = arith.addf %540, %539 : vector<8x16xf32>
    %542 = arith.divf %540, %541 : vector<8x16xf32>
    %cst_250 = arith.constant dense<0.000000e+00> : vector<8x16xf32>
    %543 = tpu.matmul %533, %6, %cst_250 {dimension_numbers = #tpu.dot_dimension_numbers<[1], [0], [0], [1], [0, 0, 1, 1], [], []>} : vector<8x16xf32>, vector<16x16xf32>, vector<8x16xf32> -> vector<8x16xf32>
    %cst_251 = arith.constant dense<0.000000e+00> : vector<8x16xf32>
    %544 = tpu.matmul %481, %22, %cst_251 {dimension_numbers = #tpu.dot_dimension_numbers<[1], [0], [0], [1], [0, 0, 1, 1], [], []>} : vector<8x16xf32>, vector<16x16xf32>, vector<8x16xf32> -> vector<8x16xf32>
    %545 = arith.addf %543, %544 : vector<8x16xf32>
    %546 = arith.addf %545, %42 : vector<8x16xf32>
    %547 = arith.negf %546 : vector<8x16xf32>
    %548 = math.exp %547 : vector<8x16xf32>
    %cst_252 = arith.constant 1.000000e+00 : f32
    %549 = vector.broadcast %cst_252 : f32 to vector<8x16xf32>
    %550 = arith.addf %549, %548 : vector<8x16xf32>
    %551 = arith.divf %549, %550 : vector<8x16xf32>
    %cst_253 = arith.constant dense<0.000000e+00> : vector<8x16xf32>
    %552 = tpu.matmul %533, %8, %cst_253 {dimension_numbers = #tpu.dot_dimension_numbers<[1], [0], [0], [1], [0, 0, 1, 1], [], []>} : vector<8x16xf32>, vector<16x16xf32>, vector<8x16xf32> -> vector<8x16xf32>
    %cst_254 = arith.constant dense<0.000000e+00> : vector<8x16xf32>
    %553 = tpu.matmul %481, %24, %cst_254 {dimension_numbers = #tpu.dot_dimension_numbers<[1], [0], [0], [1], [0, 0, 1, 1], [], []>} : vector<8x16xf32>, vector<16x16xf32>, vector<8x16xf32> -> vector<8x16xf32>
    %554 = arith.addf %552, %553 : vector<8x16xf32>
    %555 = arith.addf %554, %46 : vector<8x16xf32>
    %556 = math.tanh %555 : vector<8x16xf32>
    %cst_255 = arith.constant dense<0.000000e+00> : vector<8x16xf32>
    %557 = tpu.matmul %533, %10, %cst_255 {dimension_numbers = #tpu.dot_dimension_numbers<[1], [0], [0], [1], [0, 0, 1, 1], [], []>} : vector<8x16xf32>, vector<16x16xf32>, vector<8x16xf32> -> vector<8x16xf32>
    %cst_256 = arith.constant dense<0.000000e+00> : vector<8x16xf32>
    %558 = tpu.matmul %481, %26, %cst_256 {dimension_numbers = #tpu.dot_dimension_numbers<[1], [0], [0], [1], [0, 0, 1, 1], [], []>} : vector<8x16xf32>, vector<16x16xf32>, vector<8x16xf32> -> vector<8x16xf32>
    %559 = arith.addf %557, %558 : vector<8x16xf32>
    %560 = arith.addf %559, %50 : vector<8x16xf32>
    %561 = arith.negf %560 : vector<8x16xf32>
    %562 = math.exp %561 : vector<8x16xf32>
    %cst_257 = arith.constant 1.000000e+00 : f32
    %563 = vector.broadcast %cst_257 : f32 to vector<8x16xf32>
    %564 = arith.addf %563, %562 : vector<8x16xf32>
    %565 = arith.divf %563, %564 : vector<8x16xf32>
    %566 = arith.mulf %551, %479 : vector<8x16xf32>
    %567 = arith.mulf %542, %556 : vector<8x16xf32>
    %568 = arith.addf %566, %567 : vector<8x16xf32>
    %569 = math.tanh %568 : vector<8x16xf32>
    %570 = arith.mulf %565, %569 : vector<8x16xf32>
    %cst_258 = arith.constant dense<0.000000e+00> : vector<8x16xf32>
    %571 = tpu.matmul %570, %12, %cst_258 {dimension_numbers = #tpu.dot_dimension_numbers<[1], [0], [0], [1], [0, 0, 1, 1], [], []>} : vector<8x16xf32>, vector<16x16xf32>, vector<8x16xf32> -> vector<8x16xf32>
    %cst_259 = arith.constant dense<0.000000e+00> : vector<8x16xf32>
    %572 = tpu.matmul %518, %28, %cst_259 {dimension_numbers = #tpu.dot_dimension_numbers<[1], [0], [0], [1], [0, 0, 1, 1], [], []>} : vector<8x16xf32>, vector<16x16xf32>, vector<8x16xf32> -> vector<8x16xf32>
    %573 = arith.addf %571, %572 : vector<8x16xf32>
    %574 = arith.addf %573, %54 : vector<8x16xf32>
    %575 = arith.negf %574 : vector<8x16xf32>
    %576 = math.exp %575 : vector<8x16xf32>
    %cst_260 = arith.constant 1.000000e+00 : f32
    %577 = vector.broadcast %cst_260 : f32 to vector<8x16xf32>
    %578 = arith.addf %577, %576 : vector<8x16xf32>
    %579 = arith.divf %577, %578 : vector<8x16xf32>
    %cst_261 = arith.constant dense<0.000000e+00> : vector<8x16xf32>
    %580 = tpu.matmul %570, %14, %cst_261 {dimension_numbers = #tpu.dot_dimension_numbers<[1], [0], [0], [1], [0, 0, 1, 1], [], []>} : vector<8x16xf32>, vector<16x16xf32>, vector<8x16xf32> -> vector<8x16xf32>
    %cst_262 = arith.constant dense<0.000000e+00> : vector<8x16xf32>
    %581 = tpu.matmul %518, %30, %cst_262 {dimension_numbers = #tpu.dot_dimension_numbers<[1], [0], [0], [1], [0, 0, 1, 1], [], []>} : vector<8x16xf32>, vector<16x16xf32>, vector<8x16xf32> -> vector<8x16xf32>
    %582 = arith.addf %580, %581 : vector<8x16xf32>
    %583 = arith.addf %582, %58 : vector<8x16xf32>
    %584 = arith.negf %583 : vector<8x16xf32>
    %585 = math.exp %584 : vector<8x16xf32>
    %cst_263 = arith.constant 1.000000e+00 : f32
    %586 = vector.broadcast %cst_263 : f32 to vector<8x16xf32>
    %587 = arith.addf %586, %585 : vector<8x16xf32>
    %588 = arith.divf %586, %587 : vector<8x16xf32>
    %cst_264 = arith.constant dense<0.000000e+00> : vector<8x16xf32>
    %589 = tpu.matmul %570, %16, %cst_264 {dimension_numbers = #tpu.dot_dimension_numbers<[1], [0], [0], [1], [0, 0, 1, 1], [], []>} : vector<8x16xf32>, vector<16x16xf32>, vector<8x16xf32> -> vector<8x16xf32>
    %cst_265 = arith.constant dense<0.000000e+00> : vector<8x16xf32>
    %590 = tpu.matmul %518, %32, %cst_265 {dimension_numbers = #tpu.dot_dimension_numbers<[1], [0], [0], [1], [0, 0, 1, 1], [], []>} : vector<8x16xf32>, vector<16x16xf32>, vector<8x16xf32> -> vector<8x16xf32>
    %591 = arith.addf %589, %590 : vector<8x16xf32>
    %592 = arith.addf %591, %62 : vector<8x16xf32>
    %593 = math.tanh %592 : vector<8x16xf32>
    %cst_266 = arith.constant dense<0.000000e+00> : vector<8x16xf32>
    %594 = tpu.matmul %570, %18, %cst_266 {dimension_numbers = #tpu.dot_dimension_numbers<[1], [0], [0], [1], [0, 0, 1, 1], [], []>} : vector<8x16xf32>, vector<16x16xf32>, vector<8x16xf32> -> vector<8x16xf32>
    %cst_267 = arith.constant dense<0.000000e+00> : vector<8x16xf32>
    %595 = tpu.matmul %518, %34, %cst_267 {dimension_numbers = #tpu.dot_dimension_numbers<[1], [0], [0], [1], [0, 0, 1, 1], [], []>} : vector<8x16xf32>, vector<16x16xf32>, vector<8x16xf32> -> vector<8x16xf32>
    %596 = arith.addf %594, %595 : vector<8x16xf32>
    %597 = arith.addf %596, %66 : vector<8x16xf32>
    %598 = arith.negf %597 : vector<8x16xf32>
    %599 = math.exp %598 : vector<8x16xf32>
    %cst_268 = arith.constant 1.000000e+00 : f32
    %600 = vector.broadcast %cst_268 : f32 to vector<8x16xf32>
    %601 = arith.addf %600, %599 : vector<8x16xf32>
    %602 = arith.divf %600, %601 : vector<8x16xf32>
    %603 = arith.mulf %588, %516 : vector<8x16xf32>
    %604 = arith.mulf %579, %593 : vector<8x16xf32>
    %605 = arith.addf %603, %604 : vector<8x16xf32>
    %606 = math.tanh %605 : vector<8x16xf32>
    %607 = arith.mulf %602, %606 : vector<8x16xf32>
    %cst_269 = arith.constant dense<0.000000e+00> : vector<8x128xf32>
    %608 = tpu.matmul %570, %68, %cst_269 {dimension_numbers = #tpu.dot_dimension_numbers<[1], [0], [0], [1], [0, 0, 1, 1], [], []>} : vector<8x16xf32>, vector<16x128xf32>, vector<8x128xf32> -> vector<8x128xf32>
    %609 = arith.addf %77, %608 : vector<8x128xf32>
    %cst_270 = arith.constant dense<0.000000e+00> : vector<8x128xf32>
    %610 = tpu.matmul %568, %70, %cst_270 {dimension_numbers = #tpu.dot_dimension_numbers<[1], [0], [0], [1], [0, 0, 1, 1], [], []>} : vector<8x16xf32>, vector<16x128xf32>, vector<8x128xf32> -> vector<8x128xf32>
    %611 = arith.addf %609, %610 : vector<8x128xf32>
    %cst_271 = arith.constant dense<0.000000e+00> : vector<8x128xf32>
    %612 = tpu.matmul %607, %72, %cst_271 {dimension_numbers = #tpu.dot_dimension_numbers<[1], [0], [0], [1], [0, 0, 1, 1], [], []>} : vector<8x16xf32>, vector<16x128xf32>, vector<8x128xf32> -> vector<8x128xf32>
    %613 = arith.addf %611, %612 : vector<8x128xf32>
    %cst_272 = arith.constant dense<0.000000e+00> : vector<8x128xf32>
    %614 = tpu.matmul %605, %74, %cst_272 {dimension_numbers = #tpu.dot_dimension_numbers<[1], [0], [0], [1], [0, 0, 1, 1], [], []>} : vector<8x16xf32>, vector<16x128xf32>, vector<8x128xf32> -> vector<8x128xf32>
    %615 = arith.addf %613, %614 : vector<8x128xf32>
    %616 = arith.index_cast %c5_i32 : i32 to index
    %c0_273 = arith.constant 0 : index
    %c0_274 = arith.constant 0 : index
    %617 = vector.load %arg10[%616, %c0_273, %c0_274] : memref<8x8x128xf32, #tpu.memory_space<vmem>>, vector<1x8x128xf32>
    %618 = vector.shape_cast %617 : vector<1x8x128xf32> to vector<8x128xf32>
    %619 = vector.shape_cast %615 : vector<8x128xf32> to vector<1x8x128xf32>
    tpu.vector_store %arg10[%616, %c0_273, %c0_274], %619 {strides = array<i32>} : memref<8x8x128xf32, #tpu.memory_space<vmem>>, vector<1x8x128xf32>,
    %c6_i32 = arith.constant 6 : i32
    %620 = arith.index_cast %c6_i32 : i32 to index
    %c0_275 = arith.constant 0 : index
    %c0_276 = arith.constant 0 : index
    %621 = vector.load %arg1[%620, %c0_275, %c0_276] : memref<8x8x16xf32, #tpu.memory_space<vmem>>, vector<1x8x16xf32>
    %622 = vector.shape_cast %621 : vector<1x8x16xf32> to vector<8x16xf32>
    %cst_277 = arith.constant dense<0.000000e+00> : vector<8x16xf32>
    %623 = tpu.matmul %622, %4, %cst_277 {dimension_numbers = #tpu.dot_dimension_numbers<[1], [0], [0], [1], [0, 0, 1, 1], [], []>} : vector<8x16xf32>, vector<16x16xf32>, vector<8x16xf32> -> vector<8x16xf32>
    %cst_278 = arith.constant dense<0.000000e+00> : vector<8x16xf32>
    %624 = tpu.matmul %570, %20, %cst_278 {dimension_numbers = #tpu.dot_dimension_numbers<[1], [0], [0], [1], [0, 0, 1, 1], [], []>} : vector<8x16xf32>, vector<16x16xf32>, vector<8x16xf32> -> vector<8x16xf32>
    %625 = arith.addf %623, %624 : vector<8x16xf32>
    %626 = arith.addf %625, %38 : vector<8x16xf32>
    %627 = arith.negf %626 : vector<8x16xf32>
    %628 = math.exp %627 : vector<8x16xf32>
    %cst_279 = arith.constant 1.000000e+00 : f32
    %629 = vector.broadcast %cst_279 : f32 to vector<8x16xf32>
    %630 = arith.addf %629, %628 : vector<8x16xf32>
    %631 = arith.divf %629, %630 : vector<8x16xf32>
    %cst_280 = arith.constant dense<0.000000e+00> : vector<8x16xf32>
    %632 = tpu.matmul %622, %6, %cst_280 {dimension_numbers = #tpu.dot_dimension_numbers<[1], [0], [0], [1], [0, 0, 1, 1], [], []>} : vector<8x16xf32>, vector<16x16xf32>, vector<8x16xf32> -> vector<8x16xf32>
    %cst_281 = arith.constant dense<0.000000e+00> : vector<8x16xf32>
    %633 = tpu.matmul %570, %22, %cst_281 {dimension_numbers = #tpu.dot_dimension_numbers<[1], [0], [0], [1], [0, 0, 1, 1], [], []>} : vector<8x16xf32>, vector<16x16xf32>, vector<8x16xf32> -> vector<8x16xf32>
    %634 = arith.addf %632, %633 : vector<8x16xf32>
    %635 = arith.addf %634, %42 : vector<8x16xf32>
    %636 = arith.negf %635 : vector<8x16xf32>
    %637 = math.exp %636 : vector<8x16xf32>
    %cst_282 = arith.constant 1.000000e+00 : f32
    %638 = vector.broadcast %cst_282 : f32 to vector<8x16xf32>
    %639 = arith.addf %638, %637 : vector<8x16xf32>
    %640 = arith.divf %638, %639 : vector<8x16xf32>
    %cst_283 = arith.constant dense<0.000000e+00> : vector<8x16xf32>
    %641 = tpu.matmul %622, %8, %cst_283 {dimension_numbers = #tpu.dot_dimension_numbers<[1], [0], [0], [1], [0, 0, 1, 1], [], []>} : vector<8x16xf32>, vector<16x16xf32>, vector<8x16xf32> -> vector<8x16xf32>
    %cst_284 = arith.constant dense<0.000000e+00> : vector<8x16xf32>
    %642 = tpu.matmul %570, %24, %cst_284 {dimension_numbers = #tpu.dot_dimension_numbers<[1], [0], [0], [1], [0, 0, 1, 1], [], []>} : vector<8x16xf32>, vector<16x16xf32>, vector<8x16xf32> -> vector<8x16xf32>
    %643 = arith.addf %641, %642 : vector<8x16xf32>
    %644 = arith.addf %643, %46 : vector<8x16xf32>
    %645 = math.tanh %644 : vector<8x16xf32>
    %cst_285 = arith.constant dense<0.000000e+00> : vector<8x16xf32>
    %646 = tpu.matmul %622, %10, %cst_285 {dimension_numbers = #tpu.dot_dimension_numbers<[1], [0], [0], [1], [0, 0, 1, 1], [], []>} : vector<8x16xf32>, vector<16x16xf32>, vector<8x16xf32> -> vector<8x16xf32>
    %cst_286 = arith.constant dense<0.000000e+00> : vector<8x16xf32>
    %647 = tpu.matmul %570, %26, %cst_286 {dimension_numbers = #tpu.dot_dimension_numbers<[1], [0], [0], [1], [0, 0, 1, 1], [], []>} : vector<8x16xf32>, vector<16x16xf32>, vector<8x16xf32> -> vector<8x16xf32>
    %648 = arith.addf %646, %647 : vector<8x16xf32>
    %649 = arith.addf %648, %50 : vector<8x16xf32>
    %650 = arith.negf %649 : vector<8x16xf32>
    %651 = math.exp %650 : vector<8x16xf32>
    %cst_287 = arith.constant 1.000000e+00 : f32
    %652 = vector.broadcast %cst_287 : f32 to vector<8x16xf32>
    %653 = arith.addf %652, %651 : vector<8x16xf32>
    %654 = arith.divf %652, %653 : vector<8x16xf32>
    %655 = arith.mulf %640, %568 : vector<8x16xf32>
    %656 = arith.mulf %631, %645 : vector<8x16xf32>
    %657 = arith.addf %655, %656 : vector<8x16xf32>
    %658 = math.tanh %657 : vector<8x16xf32>
    %659 = arith.mulf %654, %658 : vector<8x16xf32>
    %cst_288 = arith.constant dense<0.000000e+00> : vector<8x16xf32>
    %660 = tpu.matmul %659, %12, %cst_288 {dimension_numbers = #tpu.dot_dimension_numbers<[1], [0], [0], [1], [0, 0, 1, 1], [], []>} : vector<8x16xf32>, vector<16x16xf32>, vector<8x16xf32> -> vector<8x16xf32>
    %cst_289 = arith.constant dense<0.000000e+00> : vector<8x16xf32>
    %661 = tpu.matmul %607, %28, %cst_289 {dimension_numbers = #tpu.dot_dimension_numbers<[1], [0], [0], [1], [0, 0, 1, 1], [], []>} : vector<8x16xf32>, vector<16x16xf32>, vector<8x16xf32> -> vector<8x16xf32>
    %662 = arith.addf %660, %661 : vector<8x16xf32>
    %663 = arith.addf %662, %54 : vector<8x16xf32>
    %664 = arith.negf %663 : vector<8x16xf32>
    %665 = math.exp %664 : vector<8x16xf32>
    %cst_290 = arith.constant 1.000000e+00 : f32
    %666 = vector.broadcast %cst_290 : f32 to vector<8x16xf32>
    %667 = arith.addf %666, %665 : vector<8x16xf32>
    %668 = arith.divf %666, %667 : vector<8x16xf32>
    %cst_291 = arith.constant dense<0.000000e+00> : vector<8x16xf32>
    %669 = tpu.matmul %659, %14, %cst_291 {dimension_numbers = #tpu.dot_dimension_numbers<[1], [0], [0], [1], [0, 0, 1, 1], [], []>} : vector<8x16xf32>, vector<16x16xf32>, vector<8x16xf32> -> vector<8x16xf32>
    %cst_292 = arith.constant dense<0.000000e+00> : vector<8x16xf32>
    %670 = tpu.matmul %607, %30, %cst_292 {dimension_numbers = #tpu.dot_dimension_numbers<[1], [0], [0], [1], [0, 0, 1, 1], [], []>} : vector<8x16xf32>, vector<16x16xf32>, vector<8x16xf32> -> vector<8x16xf32>
    %671 = arith.addf %669, %670 : vector<8x16xf32>
    %672 = arith.addf %671, %58 : vector<8x16xf32>
    %673 = arith.negf %672 : vector<8x16xf32>
    %674 = math.exp %673 : vector<8x16xf32>
    %cst_293 = arith.constant 1.000000e+00 : f32
    %675 = vector.broadcast %cst_293 : f32 to vector<8x16xf32>
    %676 = arith.addf %675, %674 : vector<8x16xf32>
    %677 = arith.divf %675, %676 : vector<8x16xf32>
    %cst_294 = arith.constant dense<0.000000e+00> : vector<8x16xf32>
    %678 = tpu.matmul %659, %16, %cst_294 {dimension_numbers = #tpu.dot_dimension_numbers<[1], [0], [0], [1], [0, 0, 1, 1], [], []>} : vector<8x16xf32>, vector<16x16xf32>, vector<8x16xf32> -> vector<8x16xf32>
    %cst_295 = arith.constant dense<0.000000e+00> : vector<8x16xf32>
    %679 = tpu.matmul %607, %32, %cst_295 {dimension_numbers = #tpu.dot_dimension_numbers<[1], [0], [0], [1], [0, 0, 1, 1], [], []>} : vector<8x16xf32>, vector<16x16xf32>, vector<8x16xf32> -> vector<8x16xf32>
    %680 = arith.addf %678, %679 : vector<8x16xf32>
    %681 = arith.addf %680, %62 : vector<8x16xf32>
    %682 = math.tanh %681 : vector<8x16xf32>
    %cst_296 = arith.constant dense<0.000000e+00> : vector<8x16xf32>
    %683 = tpu.matmul %659, %18, %cst_296 {dimension_numbers = #tpu.dot_dimension_numbers<[1], [0], [0], [1], [0, 0, 1, 1], [], []>} : vector<8x16xf32>, vector<16x16xf32>, vector<8x16xf32> -> vector<8x16xf32>
    %cst_297 = arith.constant dense<0.000000e+00> : vector<8x16xf32>
    %684 = tpu.matmul %607, %34, %cst_297 {dimension_numbers = #tpu.dot_dimension_numbers<[1], [0], [0], [1], [0, 0, 1, 1], [], []>} : vector<8x16xf32>, vector<16x16xf32>, vector<8x16xf32> -> vector<8x16xf32>
    %685 = arith.addf %683, %684 : vector<8x16xf32>
    %686 = arith.addf %685, %66 : vector<8x16xf32>
    %687 = arith.negf %686 : vector<8x16xf32>
    %688 = math.exp %687 : vector<8x16xf32>
    %cst_298 = arith.constant 1.000000e+00 : f32
    %689 = vector.broadcast %cst_298 : f32 to vector<8x16xf32>
    %690 = arith.addf %689, %688 : vector<8x16xf32>
    %691 = arith.divf %689, %690 : vector<8x16xf32>
    %692 = arith.mulf %677, %605 : vector<8x16xf32>
    %693 = arith.mulf %668, %682 : vector<8x16xf32>
    %694 = arith.addf %692, %693 : vector<8x16xf32>
    %695 = math.tanh %694 : vector<8x16xf32>
    %696 = arith.mulf %691, %695 : vector<8x16xf32>
    %cst_299 = arith.constant dense<0.000000e+00> : vector<8x128xf32>
    %697 = tpu.matmul %659, %68, %cst_299 {dimension_numbers = #tpu.dot_dimension_numbers<[1], [0], [0], [1], [0, 0, 1, 1], [], []>} : vector<8x16xf32>, vector<16x128xf32>, vector<8x128xf32> -> vector<8x128xf32>
    %698 = arith.addf %77, %697 : vector<8x128xf32>
    %cst_300 = arith.constant dense<0.000000e+00> : vector<8x128xf32>
    %699 = tpu.matmul %657, %70, %cst_300 {dimension_numbers = #tpu.dot_dimension_numbers<[1], [0], [0], [1], [0, 0, 1, 1], [], []>} : vector<8x16xf32>, vector<16x128xf32>, vector<8x128xf32> -> vector<8x128xf32>
    %700 = arith.addf %698, %699 : vector<8x128xf32>
    %cst_301 = arith.constant dense<0.000000e+00> : vector<8x128xf32>
    %701 = tpu.matmul %696, %72, %cst_301 {dimension_numbers = #tpu.dot_dimension_numbers<[1], [0], [0], [1], [0, 0, 1, 1], [], []>} : vector<8x16xf32>, vector<16x128xf32>, vector<8x128xf32> -> vector<8x128xf32>
    %702 = arith.addf %700, %701 : vector<8x128xf32>
    %cst_302 = arith.constant dense<0.000000e+00> : vector<8x128xf32>
    %703 = tpu.matmul %694, %74, %cst_302 {dimension_numbers = #tpu.dot_dimension_numbers<[1], [0], [0], [1], [0, 0, 1, 1], [], []>} : vector<8x16xf32>, vector<16x128xf32>, vector<8x128xf32> -> vector<8x128xf32>
    %704 = arith.addf %702, %703 : vector<8x128xf32>
    %705 = arith.index_cast %c6_i32 : i32 to index
    %c0_303 = arith.constant 0 : index
    %c0_304 = arith.constant 0 : index
    %706 = vector.load %arg10[%705, %c0_303, %c0_304] : memref<8x8x128xf32, #tpu.memory_space<vmem>>, vector<1x8x128xf32>
    %707 = vector.shape_cast %706 : vector<1x8x128xf32> to vector<8x128xf32>
    %708 = vector.shape_cast %704 : vector<8x128xf32> to vector<1x8x128xf32>
    tpu.vector_store %arg10[%705, %c0_303, %c0_304], %708 {strides = array<i32>} : memref<8x8x128xf32, #tpu.memory_space<vmem>>, vector<1x8x128xf32>,
    %c7_i32 = arith.constant 7 : i32
    %709 = arith.index_cast %c7_i32 : i32 to index
    %c0_305 = arith.constant 0 : index
    %c0_306 = arith.constant 0 : index
    %710 = vector.load %arg1[%709, %c0_305, %c0_306] : memref<8x8x16xf32, #tpu.memory_space<vmem>>, vector<1x8x16xf32>
    %711 = vector.shape_cast %710 : vector<1x8x16xf32> to vector<8x16xf32>
    %cst_307 = arith.constant dense<0.000000e+00> : vector<8x16xf32>
    %712 = tpu.matmul %711, %4, %cst_307 {dimension_numbers = #tpu.dot_dimension_numbers<[1], [0], [0], [1], [0, 0, 1, 1], [], []>} : vector<8x16xf32>, vector<16x16xf32>, vector<8x16xf32> -> vector<8x16xf32>
    %cst_308 = arith.constant dense<0.000000e+00> : vector<8x16xf32>
    %713 = tpu.matmul %659, %20, %cst_308 {dimension_numbers = #tpu.dot_dimension_numbers<[1], [0], [0], [1], [0, 0, 1, 1], [], []>} : vector<8x16xf32>, vector<16x16xf32>, vector<8x16xf32> -> vector<8x16xf32>
    %714 = arith.addf %712, %713 : vector<8x16xf32>
    %715 = arith.addf %714, %38 : vector<8x16xf32>
    %716 = arith.negf %715 : vector<8x16xf32>
    %717 = math.exp %716 : vector<8x16xf32>
    %cst_309 = arith.constant 1.000000e+00 : f32
    %718 = vector.broadcast %cst_309 : f32 to vector<8x16xf32>
    %719 = arith.addf %718, %717 : vector<8x16xf32>
    %720 = arith.divf %718, %719 : vector<8x16xf32>
    %cst_310 = arith.constant dense<0.000000e+00> : vector<8x16xf32>
    %721 = tpu.matmul %711, %6, %cst_310 {dimension_numbers = #tpu.dot_dimension_numbers<[1], [0], [0], [1], [0, 0, 1, 1], [], []>} : vector<8x16xf32>, vector<16x16xf32>, vector<8x16xf32> -> vector<8x16xf32>
    %cst_311 = arith.constant dense<0.000000e+00> : vector<8x16xf32>
    %722 = tpu.matmul %659, %22, %cst_311 {dimension_numbers = #tpu.dot_dimension_numbers<[1], [0], [0], [1], [0, 0, 1, 1], [], []>} : vector<8x16xf32>, vector<16x16xf32>, vector<8x16xf32> -> vector<8x16xf32>
    %723 = arith.addf %721, %722 : vector<8x16xf32>
    %724 = arith.addf %723, %42 : vector<8x16xf32>
    %725 = arith.negf %724 : vector<8x16xf32>
    %726 = math.exp %725 : vector<8x16xf32>
    %cst_312 = arith.constant 1.000000e+00 : f32
    %727 = vector.broadcast %cst_312 : f32 to vector<8x16xf32>
    %728 = arith.addf %727, %726 : vector<8x16xf32>
    %729 = arith.divf %727, %728 : vector<8x16xf32>
    %cst_313 = arith.constant dense<0.000000e+00> : vector<8x16xf32>
    %730 = tpu.matmul %711, %8, %cst_313 {dimension_numbers = #tpu.dot_dimension_numbers<[1], [0], [0], [1], [0, 0, 1, 1], [], []>} : vector<8x16xf32>, vector<16x16xf32>, vector<8x16xf32> -> vector<8x16xf32>
    %cst_314 = arith.constant dense<0.000000e+00> : vector<8x16xf32>
    %731 = tpu.matmul %659, %24, %cst_314 {dimension_numbers = #tpu.dot_dimension_numbers<[1], [0], [0], [1], [0, 0, 1, 1], [], []>} : vector<8x16xf32>, vector<16x16xf32>, vector<8x16xf32> -> vector<8x16xf32>
    %732 = arith.addf %730, %731 : vector<8x16xf32>
    %733 = arith.addf %732, %46 : vector<8x16xf32>
    %734 = math.tanh %733 : vector<8x16xf32>
    %cst_315 = arith.constant dense<0.000000e+00> : vector<8x16xf32>
    %735 = tpu.matmul %711, %10, %cst_315 {dimension_numbers = #tpu.dot_dimension_numbers<[1], [0], [0], [1], [0, 0, 1, 1], [], []>} : vector<8x16xf32>, vector<16x16xf32>, vector<8x16xf32> -> vector<8x16xf32>
    %cst_316 = arith.constant dense<0.000000e+00> : vector<8x16xf32>
    %736 = tpu.matmul %659, %26, %cst_316 {dimension_numbers = #tpu.dot_dimension_numbers<[1], [0], [0], [1], [0, 0, 1, 1], [], []>} : vector<8x16xf32>, vector<16x16xf32>, vector<8x16xf32> -> vector<8x16xf32>
    %737 = arith.addf %735, %736 : vector<8x16xf32>
    %738 = arith.addf %737, %50 : vector<8x16xf32>
    %739 = arith.negf %738 : vector<8x16xf32>
    %740 = math.exp %739 : vector<8x16xf32>
    %cst_317 = arith.constant 1.000000e+00 : f32
    %741 = vector.broadcast %cst_317 : f32 to vector<8x16xf32>
    %742 = arith.addf %741, %740 : vector<8x16xf32>
    %743 = arith.divf %741, %742 : vector<8x16xf32>
    %744 = arith.mulf %729, %657 : vector<8x16xf32>
    %745 = arith.mulf %720, %734 : vector<8x16xf32>
    %746 = arith.addf %744, %745 : vector<8x16xf32>
    %747 = math.tanh %746 : vector<8x16xf32>
    %748 = arith.mulf %743, %747 : vector<8x16xf32>
    %cst_318 = arith.constant dense<0.000000e+00> : vector<8x16xf32>
    %749 = tpu.matmul %748, %12, %cst_318 {dimension_numbers = #tpu.dot_dimension_numbers<[1], [0], [0], [1], [0, 0, 1, 1], [], []>} : vector<8x16xf32>, vector<16x16xf32>, vector<8x16xf32> -> vector<8x16xf32>
    %cst_319 = arith.constant dense<0.000000e+00> : vector<8x16xf32>
    %750 = tpu.matmul %696, %28, %cst_319 {dimension_numbers = #tpu.dot_dimension_numbers<[1], [0], [0], [1], [0, 0, 1, 1], [], []>} : vector<8x16xf32>, vector<16x16xf32>, vector<8x16xf32> -> vector<8x16xf32>
    %751 = arith.addf %749, %750 : vector<8x16xf32>
    %752 = arith.addf %751, %54 : vector<8x16xf32>
    %753 = arith.negf %752 : vector<8x16xf32>
    %754 = math.exp %753 : vector<8x16xf32>
    %cst_320 = arith.constant 1.000000e+00 : f32
    %755 = vector.broadcast %cst_320 : f32 to vector<8x16xf32>
    %756 = arith.addf %755, %754 : vector<8x16xf32>
    %757 = arith.divf %755, %756 : vector<8x16xf32>
    %cst_321 = arith.constant dense<0.000000e+00> : vector<8x16xf32>
    %758 = tpu.matmul %748, %14, %cst_321 {dimension_numbers = #tpu.dot_dimension_numbers<[1], [0], [0], [1], [0, 0, 1, 1], [], []>} : vector<8x16xf32>, vector<16x16xf32>, vector<8x16xf32> -> vector<8x16xf32>
    %cst_322 = arith.constant dense<0.000000e+00> : vector<8x16xf32>
    %759 = tpu.matmul %696, %30, %cst_322 {dimension_numbers = #tpu.dot_dimension_numbers<[1], [0], [0], [1], [0, 0, 1, 1], [], []>} : vector<8x16xf32>, vector<16x16xf32>, vector<8x16xf32> -> vector<8x16xf32>
    %760 = arith.addf %758, %759 : vector<8x16xf32>
    %761 = arith.addf %760, %58 : vector<8x16xf32>
    %762 = arith.negf %761 : vector<8x16xf32>
    %763 = math.exp %762 : vector<8x16xf32>
    %cst_323 = arith.constant 1.000000e+00 : f32
    %764 = vector.broadcast %cst_323 : f32 to vector<8x16xf32>
    %765 = arith.addf %764, %763 : vector<8x16xf32>
    %766 = arith.divf %764, %765 : vector<8x16xf32>
    %cst_324 = arith.constant dense<0.000000e+00> : vector<8x16xf32>
    %767 = tpu.matmul %748, %16, %cst_324 {dimension_numbers = #tpu.dot_dimension_numbers<[1], [0], [0], [1], [0, 0, 1, 1], [], []>} : vector<8x16xf32>, vector<16x16xf32>, vector<8x16xf32> -> vector<8x16xf32>
    %cst_325 = arith.constant dense<0.000000e+00> : vector<8x16xf32>
    %768 = tpu.matmul %696, %32, %cst_325 {dimension_numbers = #tpu.dot_dimension_numbers<[1], [0], [0], [1], [0, 0, 1, 1], [], []>} : vector<8x16xf32>, vector<16x16xf32>, vector<8x16xf32> -> vector<8x16xf32>
    %769 = arith.addf %767, %768 : vector<8x16xf32>
    %770 = arith.addf %769, %62 : vector<8x16xf32>
    %771 = math.tanh %770 : vector<8x16xf32>
    %cst_326 = arith.constant dense<0.000000e+00> : vector<8x16xf32>
    %772 = tpu.matmul %748, %18, %cst_326 {dimension_numbers = #tpu.dot_dimension_numbers<[1], [0], [0], [1], [0, 0, 1, 1], [], []>} : vector<8x16xf32>, vector<16x16xf32>, vector<8x16xf32> -> vector<8x16xf32>
    %cst_327 = arith.constant dense<0.000000e+00> : vector<8x16xf32>
    %773 = tpu.matmul %696, %34, %cst_327 {dimension_numbers = #tpu.dot_dimension_numbers<[1], [0], [0], [1], [0, 0, 1, 1], [], []>} : vector<8x16xf32>, vector<16x16xf32>, vector<8x16xf32> -> vector<8x16xf32>
    %774 = arith.addf %772, %773 : vector<8x16xf32>
    %775 = arith.addf %774, %66 : vector<8x16xf32>
    %776 = arith.negf %775 : vector<8x16xf32>
    %777 = math.exp %776 : vector<8x16xf32>
    %cst_328 = arith.constant 1.000000e+00 : f32
    %778 = vector.broadcast %cst_328 : f32 to vector<8x16xf32>
    %779 = arith.addf %778, %777 : vector<8x16xf32>
    %780 = arith.divf %778, %779 : vector<8x16xf32>
    %781 = arith.mulf %766, %694 : vector<8x16xf32>
    %782 = arith.mulf %757, %771 : vector<8x16xf32>
    %783 = arith.addf %781, %782 : vector<8x16xf32>
    %784 = math.tanh %783 : vector<8x16xf32>
    %785 = arith.mulf %780, %784 : vector<8x16xf32>
    %cst_329 = arith.constant dense<0.000000e+00> : vector<8x128xf32>
    %786 = tpu.matmul %748, %68, %cst_329 {dimension_numbers = #tpu.dot_dimension_numbers<[1], [0], [0], [1], [0, 0, 1, 1], [], []>} : vector<8x16xf32>, vector<16x128xf32>, vector<8x128xf32> -> vector<8x128xf32>
    %787 = arith.addf %77, %786 : vector<8x128xf32>
    %cst_330 = arith.constant dense<0.000000e+00> : vector<8x128xf32>
    %788 = tpu.matmul %746, %70, %cst_330 {dimension_numbers = #tpu.dot_dimension_numbers<[1], [0], [0], [1], [0, 0, 1, 1], [], []>} : vector<8x16xf32>, vector<16x128xf32>, vector<8x128xf32> -> vector<8x128xf32>
    %789 = arith.addf %787, %788 : vector<8x128xf32>
    %cst_331 = arith.constant dense<0.000000e+00> : vector<8x128xf32>
    %790 = tpu.matmul %785, %72, %cst_331 {dimension_numbers = #tpu.dot_dimension_numbers<[1], [0], [0], [1], [0, 0, 1, 1], [], []>} : vector<8x16xf32>, vector<16x128xf32>, vector<8x128xf32> -> vector<8x128xf32>
    %791 = arith.addf %789, %790 : vector<8x128xf32>
    %cst_332 = arith.constant dense<0.000000e+00> : vector<8x128xf32>
    %792 = tpu.matmul %783, %74, %cst_332 {dimension_numbers = #tpu.dot_dimension_numbers<[1], [0], [0], [1], [0, 0, 1, 1], [], []>} : vector<8x16xf32>, vector<16x128xf32>, vector<8x128xf32> -> vector<8x128xf32>
    %793 = arith.addf %791, %792 : vector<8x128xf32>
    %794 = arith.index_cast %c7_i32 : i32 to index
    %c0_333 = arith.constant 0 : index
    %c0_334 = arith.constant 0 : index
    %795 = vector.load %arg10[%794, %c0_333, %c0_334] : memref<8x8x128xf32, #tpu.memory_space<vmem>>, vector<1x8x128xf32>
    %796 = vector.shape_cast %795 : vector<1x8x128xf32> to vector<8x128xf32>
    %797 = vector.shape_cast %793 : vector<8x128xf32> to vector<1x8x128xf32>
    tpu.vector_store %arg10[%794, %c0_333, %c0_334], %797 {strides = array<i32>} : memref<8x8x128xf32, #tpu.memory_space<vmem>>, vector<1x8x128xf32>,
    %c8_i32 = arith.constant 8 : i32
    %c0_335 = arith.constant 0 : index
    %c0_336 = arith.constant 0 : index
    %c0_337 = arith.constant 0 : index
    %798 = vector.load %arg11[%c0_335, %c0_336, %c0_337] : memref<2x8x16xf32, #tpu.memory_space<vmem>>, vector<1x8x16xf32>
    %799 = vector.shape_cast %798 : vector<1x8x16xf32> to vector<8x16xf32>
    %800 = vector.shape_cast %748 : vector<8x16xf32> to vector<1x8x16xf32>
    tpu.vector_store %arg11[%c0_335, %c0_336, %c0_337], %800 {strides = array<i32>} : memref<2x8x16xf32, #tpu.memory_space<vmem>>, vector<1x8x16xf32>,
    %c0_338 = arith.constant 0 : index
    %c0_339 = arith.constant 0 : index
    %c0_340 = arith.constant 0 : index
    %801 = vector.load %arg12[%c0_338, %c0_339, %c0_340] : memref<2x8x16xf32, #tpu.memory_space<vmem>>, vector<1x8x16xf32>
    %802 = vector.shape_cast %801 : vector<1x8x16xf32> to vector<8x16xf32>
    %803 = vector.shape_cast %746 : vector<8x16xf32> to vector<1x8x16xf32>
    tpu.vector_store %arg12[%c0_338, %c0_339, %c0_340], %803 {strides = array<i32>} : memref<2x8x16xf32, #tpu.memory_space<vmem>>, vector<1x8x16xf32>,
    %c1_341 = arith.constant 1 : index
    %c0_342 = arith.constant 0 : index
    %c0_343 = arith.constant 0 : index
    %804 = vector.load %arg11[%c1_341, %c0_342, %c0_343] : memref<2x8x16xf32, #tpu.memory_space<vmem>>, vector<1x8x16xf32>
    %805 = vector.shape_cast %804 : vector<1x8x16xf32> to vector<8x16xf32>
    %806 = vector.shape_cast %785 : vector<8x16xf32> to vector<1x8x16xf32>
    tpu.vector_store %arg11[%c1_341, %c0_342, %c0_343], %806 {strides = array<i32>} : memref<2x8x16xf32, #tpu.memory_space<vmem>>, vector<1x8x16xf32>,
    %c1_344 = arith.constant 1 : index
    %c0_345 = arith.constant 0 : index
    %c0_346 = arith.constant 0 : index
    %807 = vector.load %arg12[%c1_344, %c0_345, %c0_346] : memref<2x8x16xf32, #tpu.memory_space<vmem>>, vector<1x8x16xf32>
    %808 = vector.shape_cast %807 : vector<1x8x16xf32> to vector<8x16xf32>
    %809 = vector.shape_cast %783 : vector<8x16xf32> to vector<1x8x16xf32>
    tpu.vector_store %arg12[%c1_344, %c0_345, %c0_346], %809 {strides = array<i32>} : memref<2x8x16xf32, #tpu.memory_space<vmem>>, vector<1x8x16xf32>,
    return
  }
  func.func @transform_0(%arg0: i32) -> (i32, i32, i32) {
    %c0_i32 = arith.constant 0 : i32
    %c0_i32_0 = arith.constant 0 : i32
    %c0_i32_1 = arith.constant 0 : i32
    return %arg0, %c0_i32, %c0_i32_0 : i32, i32, i32
  }
  func.func @transform_1(%arg0: i32) -> (i32, i32, i32) {
    %c0_i32 = arith.constant 0 : i32
    %c0_i32_0 = arith.constant 0 : i32
    %c0_i32_1 = arith.constant 0 : i32
    %c0_i32_2 = arith.constant 0 : i32
    return %c0_i32, %c0_i32_0, %c0_i32_1 : i32, i32, i32
  }
  func.func @transform_2(%arg0: i32) -> (i32, i32, i32) {
    %c0_i32 = arith.constant 0 : i32
    %c0_i32_0 = arith.constant 0 : i32
    %c0_i32_1 = arith.constant 0 : i32
    %c0_i32_2 = arith.constant 0 : i32
    return %c0_i32, %c0_i32_0, %c0_i32_1 : i32, i32, i32
  }
  func.func @transform_3(%arg0: i32) -> (i32, i32, i32) {
    %c0_i32 = arith.constant 0 : i32
    %c0_i32_0 = arith.constant 0 : i32
    %c0_i32_1 = arith.constant 0 : i32
    %c0_i32_2 = arith.constant 0 : i32
    return %c0_i32, %c0_i32_0, %c0_i32_1 : i32, i32, i32
  }
  func.func @transform_4(%arg0: i32) -> (i32, i32, i32) {
    %c0_i32 = arith.constant 0 : i32
    %c0_i32_0 = arith.constant 0 : i32
    %c0_i32_1 = arith.constant 0 : i32
    %c0_i32_2 = arith.constant 0 : i32
    return %c0_i32, %c0_i32_0, %c0_i32_1 : i32, i32, i32
  }
  func.func @transform_5(%arg0: i32) -> (i32, i32, i32) {
    %c0_i32 = arith.constant 0 : i32
    %c0_i32_0 = arith.constant 0 : i32
    %c0_i32_1 = arith.constant 0 : i32
    %c0_i32_2 = arith.constant 0 : i32
    return %c0_i32, %c0_i32_0, %c0_i32_1 : i32, i32, i32
  }
  func.func @transform_6(%arg0: i32) -> (i32, i32, i32) {
    %c0_i32 = arith.constant 0 : i32
    %c0_i32_0 = arith.constant 0 : i32
    %c0_i32_1 = arith.constant 0 : i32
    %c0_i32_2 = arith.constant 0 : i32
    return %c0_i32, %c0_i32_0, %c0_i32_1 : i32, i32, i32
  }
  func.func @transform_7(%arg0: i32) -> (i32, i32, i32) {
    %c0_i32 = arith.constant 0 : i32
    %c0_i32_0 = arith.constant 0 : i32
    %c0_i32_1 = arith.constant 0 : i32
    %c0_i32_2 = arith.constant 0 : i32
    return %c0_i32, %c0_i32_0, %c0_i32_1 : i32, i32, i32
  }
  func.func @transform_8(%arg0: i32) -> (i32, i32) {
    %c0_i32 = arith.constant 0 : i32
    %c0_i32_0 = arith.constant 0 : i32
    %c0_i32_1 = arith.constant 0 : i32
    return %c0_i32, %c0_i32_0 : i32, i32
  }
  func.func @transform_9(%arg0: i32) -> (i32, i32, i32) {
    %c0_i32 = arith.constant 0 : i32
    %c0_i32_0 = arith.constant 0 : i32
    %c0_i32_1 = arith.constant 0 : i32
    return %arg0, %c0_i32, %c0_i32_0 : i32, i32, i32
  }
}

</mosaic_0001>

<bundles_post_ra>
// kernel: tpu_custom_call.1
= control target key start
LH: loop header
LB: loop body
LE: loop exit
PB: predicated region body
PF: predicated region fallthrough
CT: control target
= control target key end

     0   :  { %14 = vsyncpa [#allocation5], 0  ;;  %s6739_s0 = inlined_call_operand.hbm [shape: f32[8,8,16], index: 0, kind: input, shape index: {}]   ;;  %s6740_s1 = inlined_call_operand.hbm [shape: f32[4,16,16], index: 1, kind: input, shape index: {}]   ;;  %s6741_s2 = inlined_call_operand.hbm [shape: f32[4,16,16], index: 2, kind: input, shape index: {}]   ;;  %s6742_s3 = inlined_call_operand.hbm [shape: f32[4,1,16], index: 3, kind: input, shape index: {}]   ;;  %s6743_s4 = inlined_call_operand.hbm [shape: f32[4,16,16], index: 4, kind: input, shape index: {}]   ;;  %s6744_s5 = inlined_call_operand.hbm [shape: f32[4,16,16], index: 5, kind: input, shape index: {}]   ;;  %s6745_s6 = inlined_call_operand.vmem [shape: f32[4,1,16], index: 6, kind: input, shape index: {}]   ;;  %s6746_s7 = inlined_call_operand.hbm [shape: f32[4,16,128], index: 7, kind: input, shape index: {}]   ;;  %s6747_s8 = inlined_call_operand.vmem [shape: f32[1,128], index: 8, kind: input, shape index: {}]   ;;  %s6748_s9 = inlined_call_operand.hbm [shape: f32[8,8,128], index: 9, kind: output, shape index: {}]  }
   0x1   :  { %15 = vsyncpa [#allocation8], 0 }
   0x2   :  { %16 = vsyncpa [#allocation11], 0 }
   0x3   :  { %17 = vsyncpa [#allocation14], 0 }
   0x4   :  { %18 = vsyncpa [#allocation6], 0  ;;  %s36_s11 = sshll.u32 %s6740_s1, 4  ;;  %s5530_s12 = smov [#allocation7]   ;;  %s37_s11 = int_to_ptr.hbm [resolvable:$true] %s36_s11 }
   0x5   :  { %s38_s13 = sshll.u32 %s5530_s12, 4  ;;  %s62_s16 = sshll.u32 %s6742_s3, 4  ;;  %s39_s13 = int_to_ptr.vmem [resolvable:$true] %s38_s13  ;;  %s63_s16 = int_to_ptr.hbm [resolvable:$true] %s62_s16 }
   0x6   :  { %s5531_s17 = smov 128   ;;  %s5532_s18 = smov 8  }
   0x7   :  { %44 = dma.hbm_to_vmem [thread:$0]  %s37_s11, 1024, %s39_s13, [#allocation8], %s5531_s17, %s5531_s17, %s5532_s18  }
   0x8   :  { %s5533_s19 = smov [#allocation10]   ;;  %s5534_s21 = smov 16  }
   0x9   :  { %s64_s20 = sshll.u32 %s5533_s19, 4  ;;  %s5535_s1 = smov 1   ;;  %s65_s20 = int_to_ptr.vmem [resolvable:$true] %s64_s20 }
   0xa   :  { %70 = dma.hbm_to_vmem [thread:$0]  %s63_s16, 64, %s65_s20, [#allocation11], %s5534_s21, %s5534_s21, %s5535_s1  }
   0xb   :  { %s88_s24 = sshll.u32 %s6744_s5, 4  ;;  %s5536_s25 = smov [#allocation13]   ;;  %s89_s24 = int_to_ptr.hbm [resolvable:$true] %s88_s24 }
   0xc   :  { %s90_s3 = sshll.u32 %s5536_s25, 4  ;;  %s23_s28 = sshll.u32 %s6739_s0, 4  ;;  %s91_s3 = int_to_ptr.vmem [resolvable:$true] %s90_s3  ;;  %s24_s28 = int_to_ptr.hbm [resolvable:$true] %s23_s28 }
   0xd   :  { %96 = dma.hbm_to_vmem [thread:$0]  %s89_s24, 1024, %s91_s3, [#allocation14], %s5531_s17, %s5531_s17, %s5532_s18  }
   0xe   :  { %s5537_s29 = smov [#allocation4]   ;;  %s49_s12 = sshll.u32 %s6741_s2, 4  ;;  %s50_s12 = int_to_ptr.hbm [resolvable:$true] %s49_s12 }
   0xf   :  { %s25_s30 = sshll.u32 %s5537_s29, 4  ;;  %s75_s0 = sshll.u32 %s6743_s4, 4  ;;  %s26_s30 = int_to_ptr.vmem [resolvable:$true] %s25_s30  ;;  %s76_s0 = int_to_ptr.hbm [resolvable:$true] %s75_s0 }
  0x10   :  { %31 = dma.hbm_to_vmem [thread:$0]  %s24_s28, 1024, %s26_s30, [#allocation5], %s5531_s17, %s5531_s17, %s5532_s18  }
  0x11   :  { %s5538_s14 = smov [#allocation9]   ;;  %s5539_s16 = smov [#allocation12]  }
  0x12   :  { %s51_s15 = sshll.u32 %s5538_s14, 4  ;;  %s77_s2 = sshll.u32 %s5539_s16, 4  ;;  %s52_s15 = int_to_ptr.vmem [resolvable:$true] %s51_s15  ;;  %s78_s2 = int_to_ptr.vmem [resolvable:$true] %s77_s2 }
  0x13   :  { %57 = dma.hbm_to_vmem [thread:$0]  %s50_s12, 1024, %s52_s15, [#allocation8], %s5531_s17, %s5531_s17, %s5532_s18  }
  0x14   :  { %s103_s21 = sshll.u32 %s6746_s7, 4  ;;  %s5540_s4 = smov [#allocation15]   ;;  %s104_s21 = int_to_ptr.hbm [resolvable:$true] %s103_s21 }
  0x15   :  { %83 = dma.hbm_to_vmem [thread:$0]  %s76_s0, 1024, %s78_s2, [#allocation11], %s5531_s17, %s5531_s17, %s5532_s18  }
  0x16   :  { %s105_s1 = sshll.u32 %s5540_s4, 4  ;;  %s106_s1 = int_to_ptr.vmem [resolvable:$true] %s105_s1 }
  0x17   :  { %111 = dma.hbm_to_vmem [thread:$0]  %s104_s21, 1024, %s106_s1, [#allocation14], %s5531_s17, %s5531_s17, %s5532_s18  }
  0x18   :  { %5520 = dma.done.wait [#allocation5], 1024  }
  0x19   :  { %5521 = vsyncadd [#allocation5], 4294966272 }
  0x1a   :  { %5522 = dma.done.wait [#allocation8], 2048  }
  0x1b   :  { %5523 = vsyncadd [#allocation8], 4294965248 }
  0x1c   :  { %5524 = dma.done.wait [#allocation11], 1088  }
  0x1d   :  { %5525 = vsyncadd [#allocation11], 4294966208 }
  0x1e   :  { %5526 = dma.done.wait [#allocation14], 2048  }
  0x1f   :  { %5527 = vsyncadd [#allocation14], 4294965248  ;;  %vm146_vm0 = vcmask 130048   ;;  %v5541_v0 = vmov 0.0   ;;  %v5636_v1 = vld [vmem:[#allocation9 + $0x8] sm:$0xff]  ;;  %v5640_v3 = vld [vmem:[#allocation9 + $0x18] sm:$0xff] }
  0x20   :  { %147 = vst.msk [vmem:[#allocation2] sm:$0xff] %vm146_vm0, %v5541_v0  ;;  %v5638_v2 = vld [vmem:[#allocation7 + $0x8] sm:$0xff]  ;;  %273 = vmatpush.msra.mxu0 %v5636_v1  ;;  %v5644_v4 = vld [vmem:[#allocation7 + $0x18] sm:$0xff]  ;;  %v5646_v5 = vld [vmem:[#allocation9] sm:$0xff]  ;;  %336 = vmatpush.msra.mxu2 %v5640_v3  ;;  %s4725_s26 = sshll.u32 %s6748_s9, 4  ;;  %s4726_s26 = int_to_ptr.hbm [resolvable:$true] %s4725_s26 }
  0x21   :  { %149 = vst.msk [vmem:[#allocation3] sm:$0xff] %vm146_vm0, %v5541_v0  ;;  %296 = vmatpush.msra.mxu1 %v5638_v2  ;;  %v5648_v6 = vld [vmem:[#allocation7] sm:$0xff]  ;;  %356 = vmatpush.msra.mxu3 %v5644_v4  ;;  %v5652_v7 = vld [vmem:[#allocation9 + $0x10] sm:$0xff]  ;;  %v5658_v11 = vld [vmem:[#allocation9 + $0x38] sm:$0xff] }
  0x22   :  { %150 = vst.msk [vmem:[#allocation3 + $0x8] sm:$0xff] %vm146_vm0, %v5541_v0  ;;  %v5654_v8 = vld [vmem:[#allocation7 + $0x10] sm:$0xff]  ;;  %274 = vmatpush.msra.mxu0 %v5646_v5  ;;  %v254_v10 = vld [vmem:[#allocation4] sm:$0xff]  ;;  %v5660_v12 = vld [vmem:[#allocation7 + $0x38] sm:$0xff]  ;;  %337 = vmatpush.msra.mxu2 %v5652_v7 }
  0x23   :  { %148 = vst.msk [vmem:[#allocation2 + $0x8] sm:$0xff] %vm146_vm0, %v5541_v0  ;;  %297 = vmatpush.msra.mxu1 %v5648_v6  ;;  %357 = vmatpush.msra.mxu3 %v5654_v8  ;;  %v5664_v13 = vld [vmem:[#allocation9 + $0x30] sm:$0xff]  ;;  %v5668_v15 = vld [vmem:[#allocation9 + $0x28] sm:$0xff]  ;;  %v5674_v17 = vld [vmem:[#allocation9 + $0x20] sm:$0xff] }
  0x24   :  { %v5666_v14 = vld [vmem:[#allocation7 + $0x30] sm:$0xff]  ;;  %4745 = vmatmul.msk.f32.vlgmr.msra.gmra.mxu1 %vm146_vm0, %v254_v10  ;;  %v5672_v16 = vld [vmem:[#allocation7 + $0x28] sm:$0xff]  ;;  %v5676_v18 = vld [vmem:[#allocation7 + $0x20] sm:$0xff]  ;;  %4748 = vmatmul.msk.f32.vlgmr.msra.gmra.mxu3 %vm146_vm0, %v254_v10 }
  0x25   :  { %6781 = vst [vmem:[#allocation22_spill] sm:$0xff] %v5676_v18  ;;  %438 = vmatpush.msrb.mxu2 %v5658_v11  ;;  %458 = vmatpush.msrb.mxu3 %v5660_v12  ;;  %v5692_v19 = vld [vmem:[#allocation10] ss:$0 sm:$0xff]  ;;  %v5694_v23 = vld [vmem:[#allocation13 + $0x8] sm:$0xff]  ;;  %v5698_v25 = vld [vmem:[#allocation13] sm:$0xff] }
  0x26   :  { %396 = vmatpush.msrb.mxu0 %v5668_v15  ;;  %416 = vmatpush.msrb.mxu1 %v5672_v16  ;;  %v5703_v28 = vld [vmem:[#allocation10 + $0x1] ss:$0 sm:$0xff]  ;;  %v5708_v33 = vld [vmem:[#allocation13 + $0x28] sm:$0xff]  ;;  %v5711_v35 = vld [vmem:[#allocation13 + $0x20] sm:$0xff] }
  0x27   :  { %v248_v9 = vld [vmem:[#allocation2] sm:$0xff]  ;;  %439 = vmatpush.msrb.mxu2 %v5664_v13  ;;  %459 = vmatpush.msrb.mxu3 %v5666_v14  ;;  %6782 = vst [vmem:[#allocation23_spill] sm:$0xff] %v5708_v33  ;;  %v5726_v47 = vld [vmem:[#allocation12 + $0x8] sm:$0xff]  ;;  %v5730_v48 = vld [vmem:[#allocation13 + $0x10] sm:$0xff] }
  0x28   :  { %4744 = vmatmul.msk.f32.vlgmr.msra.gmra.mxu0 %vm146_vm0, %v248_v9  ;;  %4747 = vmatmul.msk.f32.vlgmr.msra.gmra.mxu2 %vm146_vm0, %v248_v9  ;;  %6783 = vst [vmem:[#allocation24_spill] sm:$0xff] %v5711_v35  ;;  %v5716_v38 = vld [vmem:[#allocation10 + $0x3] ss:$0 sm:$0xff]  ;;  %v5732_v49 = vld [vmem:[#allocation12 + $0x10] sm:$0xff]  ;;  %v5734_v50 = vld [vmem:[#allocation15 + $0x8] sm:$0xff] }
  0x29   :  { %397 = vmatpush.msrb.mxu0 %v5674_v17  ;;  %417 = vmatpush.msrb.mxu1 %v5676_v18  ;;  %v5722_v45 = vld [vmem:[#allocation13 + $0x18] sm:$0xff]  ;;  %6784 = vst [vmem:[#allocation25_spill] sm:$0xff] %v5726_v47  ;;  %v5738_v53 = vld [vmem:[#allocation12] sm:$0xff]  ;;  %v5752_v61 = vld [vmem:[#allocation12 + $0x28] sm:$0xff] }
  0x2a   :  { %v5701_v27 = vld [vmem:[#allocation2 + $0x8] sm:$0xff]  ;;  %v5724_v46 = vld [vmem:[#allocation12 + $0x18] sm:$0xff]  ;;  %569 = vmatpush.msra.mxu2 %v5722_v45  ;;  %6785 = vst [vmem:[#allocation26_spill] sm:$0xff] %v5738_v53  ;;  %v5760_v0 = vld [vmem:[#allocation13 + $0x30] sm:$0xff] }
  0x2b   :  { %506 = vmatpush.msra.mxu0 %v5694_v23  ;;  %589 = vmatpush.msra.mxu3 %v5724_v46  ;;  %v5740_v54 = vld [vmem:[#allocation15] sm:$0xff]  ;;  %v5742_v56 = vld [vmem:[#allocation10 + $0x2] ss:$0 sm:$0xff]  ;;  %6786 = vst [vmem:[#allocation27_spill] sm:$0xff] %v5752_v61 }
  0x2c   :  { %4751 = vmatmul.msk.f32.vlgmr.msrb.gmra.mxu1 %vm146_vm0, %v254_v10  ;;  %4753 = vmatmul.msk.f32.vlgmr.msrb.gmra.mxu3 %vm146_vm0, %v254_v10  ;;  %v5748_v59 = vld [vmem:[#allocation13 + $0x38] sm:$0xff]  ;;  %v5758_v63 = vld [vmem:[#allocation12 + $0x20] sm:$0xff] }
  0x2d   :  { %507 = vmatpush.msra.mxu0 %v5698_v25  ;;  %529 = vmatpush.msra.mxu1 %v5726_v47  ;;  %v5750_v60 = vld [vmem:[#allocation12 + $0x38] sm:$0xff]  ;;  %6787 = vst [vmem:[#allocation28_spill] sm:$0xff] %v5758_v63 }
  0x2e   :  { %570 = vmatpush.msra.mxu2 %v5730_v48  ;;  %590 = vmatpush.msra.mxu3 %v5732_v49 }
  0x2f   :  { %530 = vmatpush.msra.mxu1 %v5738_v53 }
  0x30   :  { %4750 = vmatmul.msk.f32.vlgmr.msrb.gmra.mxu0 %vm146_vm0, %v248_v9  ;;  %4752 = vmatmul.msk.f32.vlgmr.msrb.gmra.mxu2 %vm146_vm0, %v248_v9  ;;  %v5762_v9 = vld [vmem:[#allocation12 + $0x30] sm:$0xff] }
  0x31   :  { %629 = vmatpush.msrb.mxu0 %v5708_v33  ;;  %691 = vmatpush.msrb.mxu3 %v5750_v60 }
  0x32   :  { %671 = vmatpush.msrb.mxu2 %v5748_v59  ;;  %649 = vmatpush.msrb.mxu1 %v5752_v61 }
  0x33   :  { %630 = vmatpush.msrb.mxu0 %v5711_v35  ;;  %692 = vmatpush.msrb.mxu3 %v5762_v9 }
  0x34   :  { %650 = vmatpush.msrb.mxu1 %v5758_v63  ;;  %672 = vmatpush.msrb.mxu2 %v5760_v0 }
  0x38   :  { %4755 = vmatmul.msk.f32.vlgmr.msra.gmra.mxu0 %vm146_vm0, %v5701_v27  ;;  %4758 = vmatmul.msk.f32.vlgmr.msra.gmra.mxu2 %vm146_vm0, %v5701_v27 }
  0x39   :  { %736 = vmatpush.msra.mxu0 %v5734_v50 }
  0x3b   :  { %737 = vmatpush.msra.mxu0 %v5740_v54 }
  0x40   :  { %4761 = vmatmul.msk.f32.vlgmr.msrb.gmra.mxu0 %vm146_vm0, %v5701_v27  ;;  %4763 = vmatmul.msk.f32.vlgmr.msrb.gmra.mxu2 %vm146_vm0, %v5701_v27 }
  0x41   :  { %832 = vmatpush.msrb.mxu0 %v5636_v1 }
  0x43   :  { %833 = vmatpush.msrb.mxu0 %v5646_v5 }
  0xa1   :  { %v299_v21 = vpop.f32.mrf.mxu1 }
  0xa5   :  { %v276_v20 = vpop.f32.mrf.mxu0 }
  0xa6   :  { %v300_v22 = vadd.f32 %v299_v21, %v276_v20 }
  0xa7   :  { %v359_v30 = vpop.f32.mrf.mxu3 }
  0xa8   :  { %v302_v24 = vadd.f32 %v5692_v19, %v300_v22 }
  0xa9   :  { %v419_v44 = vpop.f32.mrf.mxu1 }
  0xaa   :  { %v4746_v26 = vmul.f32 -1.442695, %v302_v24 }
  0xab   :  { %v339_v29 = vpop.f32.mrf.mxu2 }
  0xac   :  { %4974 = vpow2.f32 %v4746_v26  ;;  %v360_v31 = vadd.f32 %v359_v30, %v339_v29 }
  0xad   :  { %v399_v43 = vpop.f32.mrf.mxu0 }
  0xae   :  { %v362_v32 = vadd.f32 %v5703_v28, %v360_v31  ;;  %v420_v57 = vadd.f32 %v419_v44, %v399_v43 }
  0xaf   :  { %v461_v40 = vpop.f32.mrf.mxu3 }
  0xb0   :  { %v4749_v34 = vmul.f32 -1.442695, %v362_v32  ;;  %v422_v20 = vadd.f32 %v5742_v56, %v420_v57  ;;  %v251_v57 = vld [vmem:[#allocation3] sm:$0xff] }
  0xb2   :  { %v4975_v36 = vpop.eup %4974  ;;  %4976 = vpow2.f32 %v4749_v34 }
  0xb3   :  { %v5714_v37 = vadd.f32 1.0, %v4975_v36  ;;  %v441_v39 = vpop.f32.mrf.mxu2 }
  0xb4   :  { %v462_v41 = vadd.f32 %v461_v40, %v441_v39 }
  0xb5   :  { %4978 = vrcp.f32 %v5714_v37  ;;  %vm312_vm1 = vweird.f32 %v5714_v37  ;;  %v318_v31 = vand.u32 2147483648, %v5714_v37  ;;  %v316_v34 = vand.u32 2147483647, %v5714_v37 }
  0xb6   :  { %v464_v42 = vadd.f32 %v5716_v38, %v462_v41 }
  0xb7   :  { %v319_v43 = vor.u32 1.1754944e-38, %v318_v31  ;;  %vm317_vm6 = vcmp.eq.f32.partialorder %v316_v34, 8.507059e+37 }
  0xb8   :  { %v4977_v51 = vpop.eup %4976  ;;  %v4754_v52 = vmul.f32 -1.442695, %v464_v42 }
  0xb9   :  { %v366_v55 = vadd.f32 1.0, %v4977_v51 }
  0xba   :  { %4980 = vpow2.f32 %v4754_v52 }
  0xbb   :  { %v4979_v58 = vpop.eup %4978  ;;  %4982 = vrcp.f32 %v366_v55  ;;  %v378_v36 = vand.u32 2147483648, %v366_v55  ;;  %v376_v41 = vand.u32 2147483647, %v366_v55  ;;  %vm372_vm5 = vweird.f32 %v366_v55 }
  0xbc   :  { %v308_v62 = vmul.f32 %v4979_v58, %v5714_v37  ;;  %4984 = vtanh.f32 %v422_v20  ;;  %vm313_vm2 = vweird.f32 %v4979_v58 }
  0xbd   :  { %vm314_vm3 = vmor %vm312_vm1, %vm313_vm2  ;;  %v379_v52 = vor.u32 1.1754944e-38, %v378_v36  ;;  %vm377_vm8 = vcmp.eq.f32.partialorder %v376_v41, 8.507059e+37  ;;  %v5788_v41 = vld [vmem:[#allocation15 + $0x10] sm:$0xff] }
  0xbe   :  { %v309_v10 = vsub.f32 1.0, %v308_v62 }
  0xc0   :  { %v310_v21 = vmul.f32 %v4979_v58, %v309_v10  ;;  %v4981_v22 = vpop.eup %4980 }
  0xc1   :  { %v4983_v24 = vpop.eup %4982  ;;  %v468_v26 = vadd.f32 1.0, %v4981_v22 }
  0xc2   :  { %v368_v29 = vmul.f32 %v4983_v24, %v366_v55  ;;  %v311_v30 = vadd.f32 %v4979_v58, %v310_v21  ;;  %vm373_vm4 = vweird.f32 %v4983_v24  ;;  %v4985_v42 = vpop.eup %4984 }
  0xc3   :  { %4986 = vrcp.f32 %v468_v26  ;;  %vm374_vm7 = vmor %vm372_vm5, %vm373_vm4  ;;  %v480_v55 = vand.u32 2147483648, %v468_v26  ;;  %vm474_vm10 = vweird.f32 %v468_v26  ;;  %v478_v31 = vand.u32 2147483647, %v468_v26 }
  0xc4   :  { %v369_v32 = vsub.f32 1.0, %v368_v29  ;;  %v315_v40 = vsel %vm314_vm3, %v4979_v58, %v311_v30 }
  0xc5   :  { %v320_v62 = vsel %vm317_vm6, %v319_v43, %v315_v40  ;;  %v481_v34 = vor.u32 1.1754944e-38, %v480_v55  ;;  %vm479_vm12 = vcmp.eq.f32.partialorder %v478_v31, 8.507059e+37  ;;  %v5782_v40 = vld [vmem:[#allocation15 + $0x18] sm:$0xff]  ;;  %v509_v43 = vpop.f32.mrf.mxu0 }
  0xc6   :  { %v370_v39 = vmul.f32 %v4983_v24, %v369_v32  ;;  %v485_v22 = vmul.f32 %v4985_v42, %v320_v62  ;;  %v5827_v42 = vld [vmem:[%s6745_s6] ss:$0 sm:$0xff]  ;;  %v5846_v31 = vld [vmem:[%s6745_s6 + $0x3] ss:$0 sm:$0xff] }
  0xc7   :  { %6788 = vst [vmem:[#allocation29_spill] sm:$0xff] %v5827_v42 }
  0xc8   :  { %v371_v44 = vadd.f32 %v4983_v24, %v370_v39  ;;  %6790 = vst [vmem:[#allocation31_spill] sm:$0xff] %v5846_v31 }
  0xc9   :  { %v4987_v51 = vpop.eup %4986 }
  0xca   :  { %v470_v27 = vmul.f32 %v4987_v51, %v468_v26  ;;  %v375_v10 = vsel %vm374_vm7, %v4983_v24, %v371_v44  ;;  %vm475_vm9 = vweird.f32 %v4987_v51  ;;  %v5814_v26 = vld [vmem:[#allocation4 + $0x8] sm:$0xff] }
  0xcb   :  { %v380_v37 = vsel %vm377_vm8, %v379_v52, %v375_v10  ;;  %vm476_vm11 = vmor %vm474_vm10, %vm475_vm9  ;;  %v572_v52 = vpop.f32.mrf.mxu2 }
  0xcc   :  { %v471_v20 = vsub.f32 1.0, %v470_v27  ;;  %v484_v21 = vmul.f32 %v380_v37, %v251_v57  ;;  %v5833_v27 = vld [vmem:[%s6745_s6 + $0x1] ss:$0 sm:$0xff] }
  0xcd   :  { %6789 = vst [vmem:[#allocation30_spill] sm:$0xff] %v5833_v27 }
  0xce   :  { %v472_v29 = vmul.f32 %v4987_v51, %v471_v20  ;;  %v5777_v58 = vadd.f32 %v485_v22, %v484_v21  ;;  %v5835_v20 = vld [vmem:[#allocation15 + $0x38] sm:$0xff]  ;;  %v5839_v22 = vld [vmem:[#allocation15 + $0x30] sm:$0xff] }
  0xd0   :  { %v473_v30 = vadd.f32 %v4987_v51, %v472_v29  ;;  %4988 = vtanh.f32 %v5777_v58 }
  0xd2   :  { %v477_v32 = vsel %vm476_vm11, %v4987_v51, %v473_v30 }
  0xd3   :  { %v482_v36 = vsel %vm479_vm12, %v481_v34, %v477_v32  ;;  %v674_v30 = vpop.f32.mrf.mxu2 }
  0xd6   :  { %v4989_v24 = vpop.eup %4988 }
  0xd7   :  { %v5780_v39 = vmul.f32 %v4989_v24, %v482_v36 }
  0xd9   :  { %4756 = vmatmul.msk.f32.vlgmr.msra.gmra.mxu1 %vm146_vm0, %v5780_v39  ;;  %4759 = vmatmul.msk.f32.vlgmr.msra.gmra.mxu3 %vm146_vm0, %v5780_v39 }
  0xda   :  { %4766 = vmatmul.msk.f32.vlgmr.msra.gmra.mxu0 %vm146_vm0, %v5780_v39  ;;  %760 = vmatpush.msra.mxu1 %v5782_v40 }
  0xdb   :  { %955 = vmatpush.msra.mxu0 %v5668_v15  ;;  %808 = vmatpush.msra.mxu3 %v5835_v20 }
  0xdc   :  { %761 = vmatpush.msra.mxu1 %v5788_v41 }
  0xdd   :  { %956 = vmatpush.msra.mxu0 %v5674_v17  ;;  %809 = vmatpush.msra.mxu3 %v5839_v22 }
  0xe1   :  { %4762 = vmatmul.msk.f32.vlgmr.msrb.gmra.mxu1 %vm146_vm0, %v5780_v39  ;;  %4764 = vmatmul.msk.f32.vlgmr.msrb.gmra.mxu3 %vm146_vm0, %v5780_v39 }
  0xe2   :  { %4770 = vmatmul.msk.f32.vlgmr.msrb.gmra.mxu0 %vm146_vm0, %v5780_v39  ;;  %855 = vmatpush.msrb.mxu1 %v5638_v2 }
  0xe3   :  { %1062 = vmatpush.msrb.mxu0 %v5694_v23  ;;  %915 = vmatpush.msrb.mxu3 %v5644_v4 }
  0xe4   :  { %856 = vmatpush.msrb.mxu1 %v5648_v6 }
  0xe5   :  { %1063 = vmatpush.msrb.mxu0 %v5698_v25  ;;  %916 = vmatpush.msrb.mxu3 %v5654_v8 }
  0xe9   :  { %4767 = vmatmul.msk.f32.vlgmr.msra.gmra.mxu1 %vm146_vm0, %v5777_v58 }
  0xea   :  { %4776 = vmatmul.msk.f32.vlgmr.msra.gmra.mxu0 %vm146_vm0, %v5780_v39  ;;  %975 = vmatpush.msra.mxu1 %v5672_v16 }
  0xeb   :  { %1185 = vmatpush.msra.mxu0 %v5708_v33 }
  0xec   :  { %976 = vmatpush.msra.mxu1 %v5676_v18 }
  0xed   :  { %1186 = vmatpush.msra.mxu0 %v5711_v35 }
  0xf1   :  { %4771 = vmatmul.msk.f32.vlgmr.msrb.gmra.mxu1 %vm146_vm0, %v5814_v26 }
  0xf2   :  { %1085 = vmatpush.msrb.mxu1 %v5726_v47 }
  0xf4   :  { %1086 = vmatpush.msrb.mxu1 %v5738_v53 }
  0xf9   :  { %4777 = vmatmul.msk.f32.vlgmr.msra.gmra.mxu1 %vm146_vm0, %v5814_v26 }
  0xfa   :  { %1205 = vmatpush.msra.mxu1 %v5752_v61 }
  0xfc   :  { %1206 = vmatpush.msra.mxu1 %v5758_v63 }
 0x156   :  { %v532_v44 = vpop.f32.mrf.mxu1 }
 0x157   :  { %v533_v51 = vadd.f32 %v532_v44, %v509_v43  ;;  %v5850_v43 = vld [vmem:[#allocation15 + $0x28] sm:$0xff] }
 0x158   :  { %784 = vmatpush.msra.mxu2 %v5850_v43 }
 0x159   :  { %v535_v57 = vadd.f32 %v5827_v42, %v533_v51 }
 0x15b   :  { %v4757_v62 = vmul.f32 -1.442695, %v535_v57 }
 0x15c   :  { %v592_v10 = vpop.f32.mrf.mxu3 }
 0x15d   :  { %4990 = vpow2.f32 %v4757_v62  ;;  %v593_v37 = vadd.f32 %v592_v10, %v572_v52  ;;  %v5853_v52 = vld [vmem:[#allocation15 + $0x20] sm:$0xff] }
 0x15e   :  { %785 = vmatpush.msra.mxu2 %v5853_v52  ;;  %v652_v62 = vpop.f32.mrf.mxu1 }
 0x15f   :  { %v595_v21 = vadd.f32 %v5833_v27, %v593_v37  ;;  %v632_v37 = vpop.f32.mrf.mxu0 }
 0x160   :  { %895 = vmatpush.msrb.mxu2 %v5640_v3 }
 0x161   :  { %v4760_v29 = vmul.f32 -1.442695, %v595_v21 }
 0x162   :  { %896 = vmatpush.msrb.mxu2 %v5652_v7 }
 0x163   :  { %v4991_v55 = vpop.eup %4990  ;;  %4992 = vpow2.f32 %v4760_v29  ;;  %v5861_v29 = vld [vmem:[%s6745_s6 + $0x2] ss:$0 sm:$0xff] }
 0x164   :  { %v539_v32 = vadd.f32 1.0, %v4991_v55  ;;  %v694_v34 = vpop.f32.mrf.mxu3  ;;  %6791 = vst [vmem:[#allocation32_spill] sm:$0xff] %v5861_v29 }
 0x165   :  { %v695_v24 = vadd.f32 %v694_v34, %v674_v30  ;;  %v653_v30 = vadd.f32 %v652_v62, %v632_v37 }
 0x166   :  { %4994 = vrcp.f32 %v539_v32  ;;  %v551_v42 = vand.u32 2147483648, %v539_v32  ;;  %vm545_vm14 = vweird.f32 %v539_v32  ;;  %v549_v61 = vand.u32 2147483647, %v539_v32 }
 0x167   :  { %v697_v36 = vadd.f32 %v5846_v31, %v695_v24 }
 0x168   :  { %vm550_vm3 = vcmp.eq.f32.partialorder %v549_v61, 8.507059e+37 }
 0x169   :  { %v4993_v44 = vpop.eup %4992  ;;  %v4765_v51 = vmul.f32 -1.442695, %v697_v36 }
 0x16a   :  { %v599_v57 = vadd.f32 1.0, %v4993_v44  ;;  %v655_v44 = vadd.f32 %v5861_v29, %v653_v30 }
 0x16b   :  { %4996 = vpow2.f32 %v4765_v51 }
 0x16c   :  { %v4995_v10 = vpop.eup %4994  ;;  %4998 = vrcp.f32 %v599_v57  ;;  %v611_v53 = vand.u32 2147483648, %v599_v57  ;;  %v609_v37 = vand.u32 2147483647, %v599_v57  ;;  %vm605_vm2 = vweird.f32 %v599_v57 }
 0x16d   :  { %v541_v21 = vmul.f32 %v4995_v10, %v539_v32  ;;  %vm546_vm13 = vweird.f32 %v4995_v10 }
 0x16e   :  { %vm547_vm15 = vmor %vm545_vm14, %vm546_vm13  ;;  %v612_v29 = vor.u32 1.1754944e-38, %v611_v53  ;;  %vm610_vm5 = vcmp.eq.f32.partialorder %v609_v37, 8.507059e+37 }
 0x16f   :  { %v542_v55 = vsub.f32 1.0, %v541_v21  ;;  %v552_v21 = vor.u32 1.1754944e-38, %v551_v42 }
 0x171   :  { %v4997_v34 = vpop.eup %4996  ;;  %v543_v24 = vmul.f32 %v4995_v10, %v542_v55 }
 0x172   :  { %v4999_v36 = vpop.eup %4998  ;;  %v701_v51 = vadd.f32 1.0, %v4997_v34 }
 0x173   :  { %v601_v31 = vmul.f32 %v4999_v36, %v599_v57  ;;  %v544_v27 = vadd.f32 %v4995_v10, %v543_v24  ;;  %vm606_vm1 = vweird.f32 %v4999_v36  ;;  %v253_v24 = vld [vmem:[#allocation3 + $0x8] sm:$0xff] }
 0x174   :  { %5000 = vrcp.f32 %v701_v51  ;;  %vm607_vm4 = vmor %vm605_vm2, %vm606_vm1  ;;  %v713_v61 = vand.u32 2147483648, %v701_v51  ;;  %vm707_vm7 = vweird.f32 %v701_v51  ;;  %v711_v53 = vand.u32 2147483647, %v701_v51 }
 0x175   :  { %v602_v63 = vsub.f32 1.0, %v601_v31  ;;  %5002 = vtanh.f32 %v655_v44  ;;  %v548_v62 = vsel %vm547_vm15, %v4995_v10, %v544_v27 }
 0x176   :  { %v553_v34 = vsel %vm550_vm3, %v552_v21, %v548_v62  ;;  %vm712_vm9 = vcmp.eq.f32.partialorder %v711_v53, 8.507059e+37 }
 0x177   :  { %v603_v47 = vmul.f32 %v4999_v36, %v602_v63 }
 0x179   :  { %v604_v30 = vadd.f32 %v4999_v36, %v603_v47 }
 0x17a   :  { %v5001_v55 = vpop.eup %5000 }
 0x17b   :  { %v703_v35 = vmul.f32 %v5001_v55, %v701_v51  ;;  %v608_v31 = vsel %vm607_vm4, %v4999_v36, %v604_v30  ;;  %v5003_v32 = vpop.eup %5002  ;;  %vm708_vm6 = vweird.f32 %v5001_v55 }
 0x17c   :  { %v613_v18 = vsel %vm610_vm5, %v612_v29, %v608_v31  ;;  %v718_v33 = vmul.f32 %v5003_v32, %v553_v34  ;;  %vm709_vm8 = vmor %vm707_vm7, %vm708_vm6 }
 0x17d   :  { %v704_v44 = vsub.f32 1.0, %v703_v35  ;;  %v717_v63 = vmul.f32 %v613_v18, %v253_v24  ;;  %v714_v18 = vor.u32 1.1754944e-38, %v713_v61 }
 0x17f   :  { %v705_v27 = vmul.f32 %v5001_v55, %v704_v44  ;;  %v5864_v10 = vadd.f32 %v718_v33, %v717_v63 }
 0x181   :  { %5004 = vtanh.f32 %v5864_v10  ;;  %4769 = vmatmul.msk.f32.vlgmr.msra.gmra.mxu3 %vm146_vm0, %v5864_v10  ;;  %v706_v47 = vadd.f32 %v5001_v55, %v705_v27 }
 0x182   :  { %1017 = vmatpush.msra.mxu3 %v5660_v12 }
 0x183   :  { %v710_v42 = vsel %vm709_vm8, %v5001_v55, %v706_v47 }
 0x184   :  { %1018 = vmatpush.msra.mxu3 %v5666_v14  ;;  %v715_v35 = vsel %vm712_vm9, %v714_v18, %v710_v42 }
 0x187   :  { %v5005_v33 = vpop.eup %5004 }
 0x188   :  { %v721_v57 = vmul.f32 %v5005_v33, %v715_v35 }
 0x189   :  { %4774 = vmatmul.msk.f32.vlgmr.msrb.gmra.mxu3 %vm146_vm0, %v5814_v26 }
 0x18a   :  { %4768 = vmatmul.msk.f32.vlgmr.msra.gmra.mxu2 %vm146_vm0, %v721_v57  ;;  %4781 = vmatmul.msk.f32.vlgmr.msrb.gmra.mxu0 %vm146_vm0, %v721_v57 }
 0x18b   :  { %997 = vmatpush.msra.mxu2 %v5658_v11  ;;  %1145 = vmatpush.msrb.mxu3 %v5724_v46 }
 0x18c   :  { %1292 = vmatpush.msrb.mxu0 %v5734_v50 }
 0x18d   :  { %998 = vmatpush.msra.mxu2 %v5664_v13  ;;  %1146 = vmatpush.msrb.mxu3 %v5732_v49 }
 0x18e   :  { %1293 = vmatpush.msrb.mxu0 %v5740_v54 }
 0x191   :  { %4779 = vmatmul.msk.f32.vlgmr.msra.gmra.mxu3 %vm146_vm0, %v5814_v26 }
 0x192   :  { %4773 = vmatmul.msk.f32.vlgmr.msrb.gmra.mxu2 %vm146_vm0, %v5780_v39  ;;  %4787 = vmatmul.msk.f32.vlgmr.msra.gmra.mxu0 %vm146_vm0, %v721_v57 }
 0x193   :  { %1125 = vmatpush.msrb.mxu2 %v5722_v45  ;;  %1247 = vmatpush.msra.mxu3 %v5750_v60 }
 0x194   :  { %1389 = vmatpush.msra.mxu0 %v5636_v1  ;;  %v763_v1 = vpop.f32.mrf.mxu1 }
 0x195   :  { %1126 = vmatpush.msrb.mxu2 %v5730_v48  ;;  %1248 = vmatpush.msra.mxu3 %v5762_v9 }
 0x196   :  { %1390 = vmatpush.msra.mxu0 %v5646_v5  ;;  %v739_v5 = vpop.f32.mrf.mxu0 }
 0x19a   :  { %4778 = vmatmul.msk.f32.vlgmr.msra.gmra.mxu2 %vm146_vm0, %v5780_v39  ;;  %v5906_v39 = vld [vmem:[%s6747_s8] ss:$0 sm:$0xff] }
 0x19b   :  { %1227 = vmatpush.msra.mxu2 %v5748_v59  ;;  %v742_v36 = vadd.f32 %v5906_v39, %v739_v5 }
 0x19c   :  { %v858_v11 = vpop.f32.mrf.mxu1 }
 0x19d   :  { %1228 = vmatpush.msra.mxu2 %v5760_v0 }
 0x19e   :  { %v835_v12 = vpop.f32.mrf.mxu0 }
 0x19f   :  { %v859_v13 = vadd.f32 %v858_v11, %v835_v12 }
 0x1a1   :  { %v861_v14 = vadd.f32 %v5692_v19, %v859_v13 }
 0x1a2   :  { %4784 = vmatmul.msk.f32.vlgmr.msrb.gmra.mxu2 %vm146_vm0, %v721_v57 }
 0x1a3   :  { %1340 = vmatpush.msrb.mxu2 %v5850_v43  ;;  %v4772_v26 = vmul.f32 -1.442695, %v861_v14 }
 0x1a4   :  { %v978_v33 = vpop.f32.mrf.mxu1 }
 0x1a5   :  { %1341 = vmatpush.msrb.mxu2 %v5853_v52  ;;  %5006 = vpow2.f32 %v4772_v26 }
 0x1a6   :  { %v958_v35 = vpop.f32.mrf.mxu0 }
 0x1aa   :  { %4789 = vmatmul.msk.f32.vlgmr.msra.gmra.mxu2 %vm146_vm0, %v721_v57  ;;  %v979_v57 = vadd.f32 %v978_v33, %v958_v35 }
 0x1ab   :  { %1452 = vmatpush.msra.mxu2 %v5640_v3  ;;  %v766_v3 = vadd.f32 %v763_v1, %v742_v36  ;;  %v5007_v62 = vpop.eup %5006 }
 0x1ac   :  { %v865_v30 = vadd.f32 1.0, %v5007_v62  ;;  %v981_v11 = vadd.f32 %v5742_v56, %v979_v57 }
 0x1ad   :  { %1453 = vmatpush.msra.mxu2 %v5652_v7 }
 0x1ae   :  { %5008 = vrcp.f32 %v865_v30  ;;  %v877_v26 = vand.u32 2147483648, %v865_v30  ;;  %vm871_vm11 = vweird.f32 %v865_v30 }
 0x1b0   :  { %v878_v62 = vor.u32 1.1754944e-38, %v877_v26 }
 0x1b4   :  { %v5009_v32 = vpop.eup %5008 }
 0x1b5   :  { %v867_v27 = vmul.f32 %v5009_v32, %v865_v30  ;;  %vm872_vm10 = vweird.f32 %v5009_v32 }
 0x1b6   :  { %vm873_vm12 = vmor %vm871_vm11, %vm872_vm10 }
 0x1b7   :  { %v868_v18 = vsub.f32 1.0, %v867_v27 }
 0x1b9   :  { %v869_v1 = vmul.f32 %v5009_v32, %v868_v18 }
 0x1bb   :  { %v870_v13 = vadd.f32 %v5009_v32, %v869_v1 }
 0x204   :  { %v811_v29 = vpop.f32.mrf.mxu3 }
 0x20c   :  { %v918_v21 = vpop.f32.mrf.mxu3 }
 0x20d   :  { %v787_v51 = vpop.f32.mrf.mxu2 }
 0x20e   :  { %v790_v7 = vadd.f32 %v787_v51, %v766_v3  ;;  %v874_v3 = vsel %vm873_vm12, %v5009_v32, %v870_v13 }
 0x210   :  { %v814_v37 = vadd.f32 %v811_v29, %v790_v7 }
 0x212   :  { %815 = vst [vmem:[#allocation16] sm:$0xff] %v814_v37 }
 0x214   :  { %v1020_v31 = vpop.f32.mrf.mxu3 }
 0x215   :  { %v898_v55 = vpop.f32.mrf.mxu2 }
 0x216   :  { %v919_v19 = vadd.f32 %v918_v21, %v898_v55 }
 0x218   :  { %v921_v34 = vadd.f32 %v5703_v28, %v919_v19 }
 0x21a   :  { %v4775_v24 = vmul.f32 -1.442695, %v921_v34 }
 0x21c   :  { %5010 = vpow2.f32 %v4775_v24 }
 0x21d   :  { %v1000_v44 = vpop.f32.mrf.mxu2 }
 0x21e   :  { %v1021_v63 = vadd.f32 %v1020_v31, %v1000_v44 }
 0x220   :  { %v1023_v47 = vadd.f32 %v5716_v38, %v1021_v63  ;;  %v875_v38 = vand.u32 2147483647, %v865_v30 }
 0x222   :  { %v5011_v61 = vpop.eup %5010  ;;  %v4780_v53 = vmul.f32 -1.442695, %v1023_v47  ;;  %vm876_vm14 = vcmp.eq.f32.partialorder %v875_v38, 8.507059e+37  ;;  %v6800_v38 = vld [vmem:[#allocation30_spill] sm:$0xff] }
 0x223   :  { %v925_v42 = vadd.f32 1.0, %v5011_v61  ;;  %v879_v55 = vsel %vm876_vm14, %v878_v62, %v874_v3 }
 0x224   :  { %5012 = vpow2.f32 %v4780_v53 }
 0x225   :  { %5014 = vrcp.f32 %v925_v42  ;;  %v937_v36 = vand.u32 2147483648, %v925_v42  ;;  %v935_v7 = vand.u32 2147483647, %v925_v42  ;;  %vm931_vm15 = vweird.f32 %v925_v42 }
 0x227   :  { %v938_v19 = vor.u32 1.1754944e-38, %v937_v36  ;;  %vm936_vm2 = vcmp.eq.f32.partialorder %v935_v7, 8.507059e+37 }
 0x22a   :  { %v5013_v28 = vpop.eup %5012 }
 0x22b   :  { %v5015_v5 = vpop.eup %5014  ;;  %v1027_v12 = vadd.f32 1.0, %v5013_v28 }
 0x22c   :  { %v927_v14 = vmul.f32 %v5015_v5, %v925_v42  ;;  %vm932_vm13 = vweird.f32 %v5015_v5 }
 0x22d   :  { %5016 = vrcp.f32 %v1027_v12  ;;  %vm933_vm1 = vmor %vm931_vm15, %vm932_vm13  ;;  %v1039_v53 = vand.u32 2147483648, %v1027_v12  ;;  %vm1033_vm4 = vweird.f32 %v1027_v12  ;;  %v1037_v42 = vand.u32 2147483647, %v1027_v12 }
 0x22e   :  { %v928_v29 = vsub.f32 1.0, %v927_v14  ;;  %5018 = vtanh.f32 %v981_v11 }
 0x22f   :  { %v1040_v33 = vor.u32 1.1754944e-38, %v1039_v53  ;;  %vm1038_vm6 = vcmp.eq.f32.partialorder %v1037_v42, 8.507059e+37 }
 0x230   :  { %v929_v51 = vmul.f32 %v5015_v5, %v928_v29 }
 0x232   :  { %v930_v37 = vadd.f32 %v5015_v5, %v929_v51 }
 0x233   :  { %v5017_v21 = vpop.eup %5016 }
 0x234   :  { %v934_v34 = vsel %vm933_vm1, %v5015_v5, %v930_v37  ;;  %v1029_v24 = vmul.f32 %v5017_v21, %v1027_v12  ;;  %v5019_v30 = vpop.eup %5018  ;;  %vm1034_vm3 = vweird.f32 %v5017_v21  ;;  %v6799_v5 = vld [vmem:[#allocation29_spill] sm:$0xff]  ;;  %v1128_v12 = vpop.f32.mrf.mxu2 }
 0x235   :  { %v939_v31 = vsel %vm936_vm2, %v938_v19, %v934_v34  ;;  %v1044_v44 = vmul.f32 %v5019_v30, %v879_v55  ;;  %vm1035_vm5 = vmor %vm1033_vm4, %vm1034_vm3 }
 0x236   :  { %v1043_v63 = vmul.f32 %v939_v31, %v5777_v58  ;;  %v1030_v32 = vsub.f32 1.0, %v1029_v24 }
 0x238   :  { %v5913_v27 = vadd.f32 %v1044_v44, %v1043_v63  ;;  %v1031_v47 = vmul.f32 %v5017_v21, %v1030_v32 }
 0x23a   :  { %5020 = vtanh.f32 %v5913_v27  ;;  %v1032_v61 = vadd.f32 %v5017_v21, %v1031_v47 }
 0x23c   :  { %v1036_v18 = vsel %vm1035_vm5, %v5017_v21, %v1032_v61  ;;  %v1230_v51 = vpop.f32.mrf.mxu2  ;;  %v6801_v21 = vld [vmem:[#allocation31_spill] sm:$0xff] }
 0x23d   :  { %v1041_v57 = vsel %vm1038_vm6, %v1040_v33, %v1036_v18  ;;  %v6802_v18 = vld [vmem:[#allocation32_spill] sm:$0xff] }
 0x240   :  { %v5021_v35 = vpop.eup %5020 }
 0x241   :  { %v5916_v1 = vmul.f32 %v5021_v35, %v1041_v57 }
 0x243   :  { %4782 = vmatmul.msk.f32.vlgmr.msrb.gmra.mxu1 %vm146_vm0, %v5916_v1  ;;  %4785 = vmatmul.msk.f32.vlgmr.msrb.gmra.mxu3 %vm146_vm0, %v5916_v1 }
 0x244   :  { %4792 = vmatmul.msk.f32.vlgmr.msrb.gmra.mxu0 %vm146_vm0, %v5916_v1  ;;  %1316 = vmatpush.msrb.mxu1 %v5782_v40 }
 0x245   :  { %1512 = vmatpush.msrb.mxu0 %v5668_v15  ;;  %1364 = vmatpush.msrb.mxu3 %v5835_v20  ;;  %v6792_v15 = vld [vmem:[#allocation23_spill] sm:$0xff] }
 0x246   :  { %1317 = vmatpush.msrb.mxu1 %v5788_v41 }
 0x247   :  { %1513 = vmatpush.msrb.mxu0 %v5674_v17  ;;  %1365 = vmatpush.msrb.mxu3 %v5839_v22  ;;  %v6794_v17 = vld [vmem:[#allocation24_spill] sm:$0xff] }
 0x24b   :  { %4788 = vmatmul.msk.f32.vlgmr.msra.gmra.mxu1 %vm146_vm0, %v5916_v1  ;;  %4790 = vmatmul.msk.f32.vlgmr.msra.gmra.mxu3 %vm146_vm0, %v5916_v1 }
 0x24c   :  { %4796 = vmatmul.msk.f32.vlgmr.msra.gmra.mxu0 %vm146_vm0, %v5916_v1  ;;  %1412 = vmatpush.msra.mxu1 %v5638_v2  ;;  %v6793_v2 = vld [vmem:[#allocation22_spill] sm:$0xff] }
 0x24d   :  { %1619 = vmatpush.msra.mxu0 %v5694_v23  ;;  %1472 = vmatpush.msra.mxu3 %v5644_v4  ;;  %v5950_v4 = vld [vmem:[#allocation4 + $0x10] sm:$0xff] }
 0x24e   :  { %1413 = vmatpush.msra.mxu1 %v5648_v6  ;;  %v6795_v6 = vld [vmem:[#allocation25_spill] sm:$0xff]  ;;  %v6797_v23 = vld [vmem:[#allocation27_spill] sm:$0xff] }
 0x24f   :  { %1620 = vmatpush.msra.mxu0 %v5698_v25  ;;  %1473 = vmatpush.msra.mxu3 %v5654_v8  ;;  %v6796_v8 = vld [vmem:[#allocation26_spill] sm:$0xff]  ;;  %v1065_v25 = vpop.f32.mrf.mxu0 }
 0x253   :  { %4793 = vmatmul.msk.f32.vlgmr.msrb.gmra.mxu1 %vm146_vm0, %v5913_v27 }
 0x254   :  { %4802 = vmatmul.msk.f32.vlgmr.msrb.gmra.mxu0 %vm146_vm0, %v5916_v1  ;;  %1532 = vmatpush.msrb.mxu1 %v5672_v16  ;;  %v6798_v16 = vld [vmem:[#allocation28_spill] sm:$0xff] }
 0x255   :  { %1742 = vmatpush.msrb.mxu0 %v6792_v15 }
 0x256   :  { %1533 = vmatpush.msrb.mxu1 %v6793_v2 }
 0x257   :  { %1743 = vmatpush.msrb.mxu0 %v6794_v17  ;;  %v1188_v44 = vpop.f32.mrf.mxu0 }
 0x25b   :  { %4797 = vmatmul.msk.f32.vlgmr.msra.gmra.mxu1 %vm146_vm0, %v5950_v4 }
 0x25c   :  { %1642 = vmatpush.msra.mxu1 %v6795_v6 }
 0x25e   :  { %1643 = vmatpush.msra.mxu1 %v6796_v8 }
 0x263   :  { %4803 = vmatmul.msk.f32.vlgmr.msrb.gmra.mxu1 %vm146_vm0, %v5950_v4 }
 0x264   :  { %1762 = vmatpush.msrb.mxu1 %v6797_v23 }
 0x266   :  { %1763 = vmatpush.msrb.mxu1 %v6798_v16 }
 0x2c0   :  { %v1088_v58 = vpop.f32.mrf.mxu1 }
 0x2c1   :  { %v1089_v28 = vadd.f32 %v1088_v58, %v1065_v25 }
 0x2c3   :  { %v1091_v11 = vadd.f32 %v6799_v5, %v1089_v28 }
 0x2c5   :  { %v4783_v13 = vmul.f32 -1.442695, %v1091_v11 }
 0x2c6   :  { %v1148_v14 = vpop.f32.mrf.mxu3 }
 0x2c7   :  { %5022 = vpow2.f32 %v4783_v13  ;;  %v1149_v26 = vadd.f32 %v1148_v14, %v1128_v12 }
 0x2c8   :  { %v1208_v30 = vpop.f32.mrf.mxu1 }
 0x2c9   :  { %v1151_v29 = vadd.f32 %v6800_v38, %v1149_v26  ;;  %v1209_v32 = vadd.f32 %v1208_v30, %v1188_v44 }
 0x2cb   :  { %v4786_v36 = vmul.f32 -1.442695, %v1151_v29  ;;  %v1211_v33 = vadd.f32 %v6802_v18, %v1209_v32 }
 0x2cd   :  { %v5023_v3 = vpop.eup %5022  ;;  %5024 = vpow2.f32 %v4786_v36 }
 0x2ce   :  { %v1095_v7 = vadd.f32 1.0, %v5023_v3  ;;  %v1250_v62 = vpop.f32.mrf.mxu3 }
 0x2cf   :  { %v1251_v37 = vadd.f32 %v1250_v62, %v1230_v51 }
 0x2d0   :  { %5026 = vrcp.f32 %v1095_v7  ;;  %v1107_v2 = vand.u32 2147483648, %v1095_v7  ;;  %vm1101_vm8 = vweird.f32 %v1095_v7  ;;  %v1105_v6 = vand.u32 2147483647, %v1095_v7 }
 0x2d1   :  { %v1253_v55 = vadd.f32 %v6801_v21, %v1251_v37 }
 0x2d2   :  { %v1108_v58 = vor.u32 1.1754944e-38, %v1107_v2  ;;  %vm1106_vm12 = vcmp.eq.f32.partialorder %v1105_v6, 8.507059e+37 }
 0x2d3   :  { %v5025_v19 = vpop.eup %5024  ;;  %v4791_v34 = vmul.f32 -1.442695, %v1253_v55 }
 0x2d4   :  { %v1155_v24 = vadd.f32 1.0, %v5025_v19 }
 0x2d5   :  { %5028 = vpow2.f32 %v4791_v34 }
 0x2d6   :  { %v5027_v31 = vpop.eup %5026  ;;  %5030 = vrcp.f32 %v1155_v24  ;;  %v1167_v8 = vand.u32 2147483648, %v1155_v24  ;;  %v1165_v25 = vand.u32 2147483647, %v1155_v24  ;;  %vm1161_vm11 = vweird.f32 %v1155_v24 }
 0x2d7   :  { %v1097_v63 = vmul.f32 %v5027_v31, %v1095_v7  ;;  %vm1102_vm7 = vweird.f32 %v5027_v31 }
 0x2d8   :  { %vm1103_vm9 = vmor %vm1101_vm8, %vm1102_vm7  ;;  %v1168_v13 = vor.u32 1.1754944e-38, %v1167_v8  ;;  %vm1166_vm14 = vcmp.eq.f32.partialorder %v1165_v25, 8.507059e+37  ;;  %v6023_v8 = vld [vmem:[#allocation10 + $0x1] ss:$0 sm:$0xff] }
 0x2d9   :  { %v1098_v47 = vsub.f32 1.0, %v1097_v63 }
 0x2db   :  { %v5029_v61 = vpop.eup %5028  ;;  %v1099_v53 = vmul.f32 %v5027_v31, %v1098_v47  ;;  %v5980_v47 = vld [vmem:[#allocation9 + $0x38] sm:$0xff] }
 0x2dc   :  { %v5031_v42 = vpop.eup %5030  ;;  %v1257_v35 = vadd.f32 1.0, %v5029_v61  ;;  %v5985_v61 = vld [vmem:[#allocation9 + $0x30] sm:$0xff] }
 0x2dd   :  { %v1157_v57 = vmul.f32 %v5031_v42, %v1155_v24  ;;  %v1100_v15 = vadd.f32 %v5027_v31, %v1099_v53  ;;  %vm1162_vm10 = vweird.f32 %v5031_v42  ;;  %v5970_v24 = vld [vmem:[#allocation7 + $0x38] sm:$0xff] }
 0x2de   :  { %5032 = vrcp.f32 %v1257_v35  ;;  %vm1163_vm13 = vmor %vm1161_vm11, %vm1162_vm10  ;;  %v1269_v19 = vand.u32 2147483648, %v1257_v35  ;;  %vm1263_vm1 = vweird.f32 %v1257_v35  ;;  %v1267_v34 = vand.u32 2147483647, %v1257_v35 }
 0x2df   :  { %v1158_v17 = vsub.f32 1.0, %v1157_v57  ;;  %5034 = vtanh.f32 %v1211_v33  ;;  %v1104_v16 = vsel %vm1103_vm9, %v5027_v31, %v1100_v15 }
 0x2e0   :  { %v1109_v12 = vsel %vm1106_vm12, %v1108_v58, %v1104_v16  ;;  %v1270_v31 = vor.u32 1.1754944e-38, %v1269_v19  ;;  %vm1268_vm3 = vcmp.eq.f32.partialorder %v1267_v34, 8.507059e+37 }
 0x2e1   :  { %v1159_v23 = vmul.f32 %v5031_v42, %v1158_v17 }
 0x2e3   :  { %v1160_v28 = vadd.f32 %v5031_v42, %v1159_v23 }
 0x2e4   :  { %v5033_v11 = vpop.eup %5032 }
 0x2e5   :  { %v1259_v14 = vmul.f32 %v5033_v11, %v1257_v35  ;;  %v1164_v26 = vsel %vm1163_vm13, %v5031_v42, %v1160_v28  ;;  %v5035_v29 = vpop.eup %5034  ;;  %vm1264_vm15 = vweird.f32 %v5033_v11 }
 0x2e6   :  { %v1169_v36 = vsel %vm1166_vm14, %v1168_v13, %v1164_v26  ;;  %v1274_v3 = vmul.f32 %v5035_v29, %v1109_v12  ;;  %vm1265_vm2 = vmor %vm1263_vm1, %vm1264_vm15  ;;  %v6026_v13 = vld [vmem:[#allocation10 + $0x3] ss:$0 sm:$0xff] }
 0x2e7   :  { %v1260_v51 = vsub.f32 1.0, %v1259_v14  ;;  %v1273_v7 = vmul.f32 %v1169_v36, %v5864_v10  ;;  %v5973_v10 = vld [vmem:[#allocation7 + $0x30] sm:$0xff] }
 0x2e9   :  { %v1261_v62 = vmul.f32 %v5033_v11, %v1260_v51  ;;  %v5965_v37 = vadd.f32 %v1274_v3, %v1273_v7 }
 0x2eb   :  { %5036 = vtanh.f32 %v5965_v37  ;;  %4795 = vmatmul.msk.f32.vlgmr.msrb.gmra.mxu3 %vm146_vm0, %v5965_v37  ;;  %v1262_v55 = vadd.f32 %v5033_v11, %v1261_v62 }
 0x2ec   :  { %1574 = vmatpush.msrb.mxu3 %v5970_v24 }
 0x2ed   :  { %v1266_v30 = vsel %vm1265_vm2, %v5033_v11, %v1262_v55 }
 0x2ee   :  { %1575 = vmatpush.msrb.mxu3 %v5973_v10  ;;  %v1271_v63 = vsel %vm1268_vm3, %v1270_v31, %v1266_v30 }
 0x2f1   :  { %v5037_v44 = vpop.eup %5036 }
 0x2f2   :  { %v1277_v32 = vmul.f32 %v5037_v44, %v1271_v63 }
 0x2f3   :  { %4800 = vmatmul.msk.f32.vlgmr.msra.gmra.mxu3 %vm146_vm0, %v5950_v4 }
 0x2f4   :  { %4794 = vmatmul.msk.f32.vlgmr.msrb.gmra.mxu2 %vm146_vm0, %v1277_v32  ;;  %4807 = vmatmul.msk.f32.vlgmr.msra.gmra.mxu0 %vm146_vm0, %v1277_v32 }
 0x2f5   :  { %1554 = vmatpush.msrb.mxu2 %v5980_v47  ;;  %1702 = vmatpush.msra.mxu3 %v5724_v46  ;;  %v5997_v46 = vld [vmem:[#allocation9 + $0x8] sm:$0xff] }
 0x2f6   :  { %1849 = vmatpush.msra.mxu0 %v5734_v50  ;;  %v1319_v50 = vpop.f32.mrf.mxu1 }
 0x2f7   :  { %1555 = vmatpush.msrb.mxu2 %v5985_v61  ;;  %1703 = vmatpush.msra.mxu3 %v5732_v49  ;;  %v6002_v49 = vld [vmem:[#allocation9] sm:$0xff] }
 0x2f8   :  { %1850 = vmatpush.msra.mxu0 %v5740_v54  ;;  %v1295_v54 = vpop.f32.mrf.mxu0 }
 0x2fb   :  { %4805 = vmatmul.msk.f32.vlgmr.msrb.gmra.mxu3 %vm146_vm0, %v5950_v4  ;;  %v1298_v4 = vadd.f32 %v5906_v39, %v1295_v54 }
 0x2fc   :  { %4799 = vmatmul.msk.f32.vlgmr.msra.gmra.mxu2 %vm146_vm0, %v5916_v1  ;;  %4813 = vmatmul.msk.f32.vlgmr.msrb.gmra.mxu0 %vm146_vm0, %v1277_v32 }
 0x2fd   :  { %1682 = vmatpush.msra.mxu2 %v5722_v45  ;;  %1804 = vmatpush.msrb.mxu3 %v5750_v60  ;;  %v6013_v45 = vld [vmem:[#allocation9 + $0x18] sm:$0xff]  ;;  %v1322_v53 = vadd.f32 %v1319_v50, %v1298_v4 }
 0x2fe   :  { %1946 = vmatpush.msrb.mxu0 %v5997_v46 }
 0x2ff   :  { %1683 = vmatpush.msra.mxu2 %v5730_v48  ;;  %1805 = vmatpush.msrb.mxu3 %v5762_v9  ;;  %v6016_v48 = vld [vmem:[#allocation9 + $0x10] sm:$0xff]  ;;  %v6019_v9 = vld [vmem:[#allocation10] ss:$0 sm:$0xff] }
 0x300   :  { %1947 = vmatpush.msrb.mxu0 %v6002_v49  ;;  %v1392_v60 = vpop.f32.mrf.mxu0 }
 0x304   :  { %4804 = vmatmul.msk.f32.vlgmr.msrb.gmra.mxu2 %vm146_vm0, %v5916_v1 }
 0x305   :  { %1784 = vmatpush.msrb.mxu2 %v5748_v59  ;;  %v1415_v59 = vpop.f32.mrf.mxu1 }
 0x307   :  { %1785 = vmatpush.msrb.mxu2 %v5760_v0  ;;  %v1416_v0 = vadd.f32 %v1415_v59, %v1392_v60 }
 0x308   :  { %v1515_v7 = vpop.f32.mrf.mxu0 }
 0x30c   :  { %4810 = vmatmul.msk.f32.vlgmr.msra.gmra.mxu2 %vm146_vm0, %v1277_v32 }
 0x30d   :  { %1897 = vmatpush.msra.mxu2 %v5850_v43  ;;  %v1418_v43 = vadd.f32 %v6019_v9, %v1416_v0  ;;  %v1535_v51 = vpop.f32.mrf.mxu1 }
 0x30e   :  { %v1536_v62 = vadd.f32 %v1535_v51, %v1515_v7  ;;  %v6080_v51 = vld [vmem:[#allocation7 + $0x28] sm:$0xff] }
 0x30f   :  { %1898 = vmatpush.msra.mxu2 %v5853_v52  ;;  %v4798_v52 = vmul.f32 -1.442695, %v1418_v43  ;;  %v6083_v7 = vld [vmem:[#allocation13 + $0x28] sm:$0xff] }
 0x310   :  { %v1538_v30 = vadd.f32 %v5742_v56, %v1536_v62  ;;  %6803 = vst [vmem:[#allocation23_spill] sm:$0xff] %v6083_v7  ;;  %v6086_v62 = vld [vmem:[#allocation7 + $0x20] sm:$0xff] }
 0x311   :  { %5038 = vpow2.f32 %v4798_v52  ;;  %6804 = vst [vmem:[#allocation22_spill] sm:$0xff] %v6086_v62 }
 0x314   :  { %4815 = vmatmul.msk.f32.vlgmr.msrb.gmra.mxu2 %vm146_vm0, %v1277_v32 }
 0x315   :  { %2009 = vmatpush.msrb.mxu2 %v6013_v45 }
 0x317   :  { %2010 = vmatpush.msrb.mxu2 %v6016_v48  ;;  %v5039_v35 = vpop.eup %5038 }
 0x318   :  { %v1422_v2 = vadd.f32 1.0, %v5039_v35 }
 0x31a   :  { %5040 = vrcp.f32 %v1422_v2  ;;  %v1434_v32 = vand.u32 2147483648, %v1422_v2  ;;  %vm1428_vm5 = vweird.f32 %v1422_v2  ;;  %v1432_v50 = vand.u32 2147483647, %v1422_v2 }
 0x31c   :  { %v1435_v52 = vor.u32 1.1754944e-38, %v1434_v32  ;;  %vm1433_vm8 = vcmp.eq.f32.partialorder %v1432_v50, 8.507059e+37 }
 0x320   :  { %v5041_v58 = vpop.eup %5040 }
 0x321   :  { %v1424_v12 = vmul.f32 %v5041_v58, %v1422_v2  ;;  %vm1429_vm4 = vweird.f32 %v5041_v58 }
 0x322   :  { %vm1430_vm6 = vmor %vm1428_vm5, %vm1429_vm4 }
 0x323   :  { %v1425_v3 = vsub.f32 1.0, %v1424_v12 }
 0x325   :  { %v1426_v55 = vmul.f32 %v5041_v58, %v1425_v3  ;;  %v6073_v3 = vld [vmem:[#allocation7 + $0x10] sm:$0xff] }
 0x327   :  { %v1427_v44 = vadd.f32 %v5041_v58, %v1426_v55  ;;  %v6089_v55 = vld [vmem:[#allocation13 + $0x20] sm:$0xff] }
 0x328   :  { %6805 = vst [vmem:[#allocation24_spill] sm:$0xff] %v6089_v55 }
 0x329   :  { %v1431_v60 = vsel %vm1430_vm6, %v5041_v58, %v1427_v44  ;;  %v6107_v44 = vld [vmem:[#allocation12 + $0x20] sm:$0xff] }
 0x32a   :  { %v1436_v4 = vsel %vm1433_vm8, %v1435_v52, %v1431_v60  ;;  %6809 = vst [vmem:[#allocation28_spill] sm:$0xff] %v6107_v44 }
 0x36e   :  { %v1367_v1 = vpop.f32.mrf.mxu3 }
 0x376   :  { %v1475_v15 = vpop.f32.mrf.mxu3 }
 0x377   :  { %v1343_v42 = vpop.f32.mrf.mxu2 }
 0x378   :  { %v1346_v33 = vadd.f32 %v1343_v42, %v1322_v53 }
 0x37a   :  { %v1370_v57 = vadd.f32 %v1367_v1, %v1346_v33 }
 0x37c   :  { %1372 = vst [vmem:[#allocation16 + $0x8] sm:$0xff] %v1370_v57 }
 0x37e   :  { %v1577_v25 = vpop.f32.mrf.mxu3 }
 0x37f   :  { %v1455_v17 = vpop.f32.mrf.mxu2 }
 0x380   :  { %v1476_v6 = vadd.f32 %v1475_v15, %v1455_v17 }
 0x382   :  { %v1478_v23 = vadd.f32 %v6023_v8, %v1476_v6 }
 0x384   :  { %v4801_v16 = vmul.f32 -1.442695, %v1478_v23 }
 0x386   :  { %5042 = vpow2.f32 %v4801_v16 }
 0x387   :  { %v1557_v28 = vpop.f32.mrf.mxu2 }
 0x388   :  { %v1578_v11 = vadd.f32 %v1577_v25, %v1557_v28 }
 0x38a   :  { %v1580_v14 = vadd.f32 %v6026_v13, %v1578_v11 }
 0x38c   :  { %v5043_v26 = vpop.eup %5042  ;;  %v4806_v29 = vmul.f32 -1.442695, %v1580_v14 }
 0x38d   :  { %v1482_v36 = vadd.f32 1.0, %v5043_v26 }
 0x38e   :  { %5044 = vpow2.f32 %v4806_v29  ;;  %v6048_v29 = vld [vmem:[#allocation9 + $0x20] sm:$0xff] }
 0x38f   :  { %5046 = vrcp.f32 %v1482_v36  ;;  %v1494_v59 = vand.u32 2147483648, %v1482_v36  ;;  %v1492_v43 = vand.u32 2147483647, %v1482_v36  ;;  %vm1488_vm9 = vweird.f32 %v1482_v36 }
 0x391   :  { %v1495_v53 = vor.u32 1.1754944e-38, %v1494_v59  ;;  %vm1493_vm11 = vcmp.eq.f32.partialorder %v1492_v43, 8.507059e+37  ;;  %v1685_v59 = vpop.f32.mrf.mxu2 }
 0x394   :  { %v5045_v19 = vpop.eup %5044 }
 0x395   :  { %v5047_v34 = vpop.eup %5046  ;;  %v1584_v31 = vadd.f32 1.0, %v5045_v19  ;;  %v6092_v19 = vld [vmem:[#allocation4 + $0x18] sm:$0xff] }
 0x396   :  { %v1484_v63 = vmul.f32 %v5047_v34, %v1482_v36  ;;  %vm1489_vm7 = vweird.f32 %v5047_v34  ;;  %v6070_v36 = vld [vmem:[#allocation13] sm:$0xff] }
 0x397   :  { %5048 = vrcp.f32 %v1584_v31  ;;  %vm1490_vm10 = vmor %vm1488_vm9, %vm1489_vm7  ;;  %v1596_v25 = vand.u32 2147483648, %v1584_v31  ;;  %vm1590_vm13 = vweird.f32 %v1584_v31  ;;  %v1594_v58 = vand.u32 2147483647, %v1584_v31 }
 0x398   :  { %v1485_v54 = vsub.f32 1.0, %v1484_v63  ;;  %5050 = vtanh.f32 %v1538_v30  ;;  %v6099_v30 = vld [vmem:[#allocation12] sm:$0xff]  ;;  %v1622_v63 = vpop.f32.mrf.mxu0 }
 0x399   :  { %v1597_v11 = vor.u32 1.1754944e-38, %v1596_v25  ;;  %vm1595_vm15 = vcmp.eq.f32.partialorder %v1594_v58, 8.507059e+37  ;;  %6807 = vst [vmem:[#allocation26_spill] sm:$0xff] %v6099_v30 }
 0x39a   :  { %v1486_v0 = vmul.f32 %v5047_v34, %v1485_v54 }
 0x39c   :  { %v1487_v1 = vadd.f32 %v5047_v34, %v1486_v0 }
 0x39d   :  { %v5049_v56 = vpop.eup %5048 }
 0x39e   :  { %v1491_v42 = vsel %vm1490_vm10, %v5047_v34, %v1487_v1  ;;  %v1586_v33 = vmul.f32 %v5049_v56, %v1584_v31  ;;  %v5051_v35 = vpop.eup %5050  ;;  %vm1591_vm12 = vweird.f32 %v5049_v56  ;;  %v6096_v34 = vld [vmem:[#allocation12 + $0x8] sm:$0xff] }
 0x39f   :  { %v1496_v57 = vsel %vm1493_vm11, %v1495_v53, %v1491_v42  ;;  %v1601_v15 = vmul.f32 %v5051_v35, %v1436_v4  ;;  %vm1592_vm14 = vmor %vm1590_vm13, %vm1591_vm12  ;;  %6806 = vst [vmem:[#allocation25_spill] sm:$0xff] %v6096_v34  ;;  %v6104_v31 = vld [vmem:[#allocation12 + $0x28] sm:$0xff]  ;;  %v1787_v4 = vpop.f32.mrf.mxu2 }
 0x3a0   :  { %v1600_v2 = vmul.f32 %v1496_v57, %v5913_v27  ;;  %v1587_v17 = vsub.f32 1.0, %v1586_v33  ;;  %v6043_v27 = vld [vmem:[#allocation9 + $0x28] sm:$0xff]  ;;  %6808 = vst [vmem:[#allocation27_spill] sm:$0xff] %v6104_v31 }
 0x3a2   :  { %v6031_v6 = vadd.f32 %v1601_v15, %v1600_v2  ;;  %v1588_v23 = vmul.f32 %v5049_v56, %v1587_v17 }
 0x3a4   :  { %5052 = vtanh.f32 %v6031_v6  ;;  %v1589_v16 = vadd.f32 %v5049_v56, %v1588_v23  ;;  %v1745_v23 = vpop.f32.mrf.mxu0 }
 0x3a6   :  { %v1593_v28 = vsel %vm1592_vm14, %v5049_v56, %v1589_v16 }
 0x3a7   :  { %v1598_v14 = vsel %vm1595_vm15, %v1597_v11, %v1593_v28 }
 0x3aa   :  { %v5053_v12 = vpop.eup %5052 }
 0x3ab   :  { %v6034_v26 = vmul.f32 %v5053_v12, %v1598_v14 }
 0x3ad   :  { %4808 = vmatmul.msk.f32.vlgmr.msra.gmra.mxu1 %vm146_vm0, %v6034_v26  ;;  %4811 = vmatmul.msk.f32.vlgmr.msra.gmra.mxu3 %vm146_vm0, %v6034_v26 }
 0x3ae   :  { %4818 = vmatmul.msk.f32.vlgmr.msra.gmra.mxu0 %vm146_vm0, %v6034_v26  ;;  %1873 = vmatpush.msra.mxu1 %v5782_v40  ;;  %v6058_v40 = vld [vmem:[#allocation7 + $0x8] sm:$0xff] }
 0x3af   :  { %2069 = vmatpush.msra.mxu0 %v6043_v27  ;;  %1921 = vmatpush.msra.mxu3 %v5835_v20  ;;  %v6064_v20 = vld [vmem:[#allocation7 + $0x18] sm:$0xff] }
 0x3b0   :  { %1874 = vmatpush.msra.mxu1 %v5788_v41  ;;  %v6061_v41 = vld [vmem:[#allocation13 + $0x8] sm:$0xff] }
 0x3b1   :  { %2070 = vmatpush.msra.mxu0 %v6048_v29  ;;  %1922 = vmatpush.msra.mxu3 %v5839_v22  ;;  %v6067_v22 = vld [vmem:[#allocation7] sm:$0xff] }
 0x3b5   :  { %4814 = vmatmul.msk.f32.vlgmr.msrb.gmra.mxu1 %vm146_vm0, %v6034_v26  ;;  %4816 = vmatmul.msk.f32.vlgmr.msrb.gmra.mxu3 %vm146_vm0, %v6034_v26 }
 0x3b6   :  { %4822 = vmatmul.msk.f32.vlgmr.msrb.gmra.mxu0 %vm146_vm0, %v6034_v26  ;;  %1969 = vmatpush.msrb.mxu1 %v6058_v40 }
 0x3b7   :  { %2176 = vmatpush.msrb.mxu0 %v6061_v41  ;;  %2029 = vmatpush.msrb.mxu3 %v6064_v20 }
 0x3b8   :  { %1970 = vmatpush.msrb.mxu1 %v6067_v22 }
 0x3b9   :  { %2177 = vmatpush.msrb.mxu0 %v6070_v36  ;;  %2030 = vmatpush.msrb.mxu3 %v6073_v3 }
 0x3bd   :  { %4819 = vmatmul.msk.f32.vlgmr.msra.gmra.mxu1 %vm146_vm0, %v6031_v6 }
 0x3be   :  { %4828 = vmatmul.msk.f32.vlgmr.msra.gmra.mxu0 %vm146_vm0, %v6034_v26  ;;  %2089 = vmatpush.msra.mxu1 %v6080_v51 }
 0x3bf   :  { %2299 = vmatpush.msra.mxu0 %v6083_v7 }
 0x3c0   :  { %2090 = vmatpush.msra.mxu1 %v6086_v62 }
 0x3c1   :  { %2300 = vmatpush.msra.mxu0 %v6089_v55 }
 0x3c5   :  { %4823 = vmatmul.msk.f32.vlgmr.msrb.gmra.mxu1 %vm146_vm0, %v6092_v19 }
 0x3c6   :  { %2199 = vmatpush.msrb.mxu1 %v6096_v34 }
 0x3c8   :  { %2200 = vmatpush.msrb.mxu1 %v6099_v30 }
 0x3cd   :  { %4829 = vmatmul.msk.f32.vlgmr.msra.gmra.mxu1 %vm146_vm0, %v6092_v19 }
 0x3ce   :  { %2319 = vmatpush.msra.mxu1 %v6104_v31 }
 0x3d0   :  { %2320 = vmatpush.msra.mxu1 %v6107_v44 }
 0x42a   :  { %v1645_v32 = vpop.f32.mrf.mxu1 }
 0x42b   :  { %v1646_v50 = vadd.f32 %v1645_v32, %v1622_v63 }
 0x42d   :  { %v1648_v54 = vadd.f32 %v6799_v5, %v1646_v50 }
 0x42f   :  { %v4809_v60 = vmul.f32 -1.442695, %v1648_v54 }
 0x430   :  { %v1705_v0 = vpop.f32.mrf.mxu3 }
 0x431   :  { %5054 = vpow2.f32 %v4809_v60  ;;  %v1706_v43 = vadd.f32 %v1705_v0, %v1685_v59 }
 0x432   :  { %v1765_v2 = vpop.f32.mrf.mxu1 }
 0x433   :  { %v1708_v52 = vadd.f32 %v6800_v38, %v1706_v43  ;;  %v1766_v38 = vadd.f32 %v1765_v2, %v1745_v23 }
 0x435   :  { %v4812_v1 = vmul.f32 -1.442695, %v1708_v52  ;;  %v1768_v12 = vadd.f32 %v6802_v18, %v1766_v38 }
 0x437   :  { %v5055_v56 = vpop.eup %5054  ;;  %5056 = vpow2.f32 %v4812_v1 }
 0x438   :  { %v1652_v53 = vadd.f32 1.0, %v5055_v56  ;;  %v1807_v42 = vpop.f32.mrf.mxu3 }
 0x439   :  { %v1808_v33 = vadd.f32 %v1807_v42, %v1787_v4 }
 0x43a   :  { %5058 = vrcp.f32 %v1652_v53  ;;  %vm1658_vm2 = vweird.f32 %v1652_v53  ;;  %v1662_v54 = vand.u32 2147483647, %v1652_v53 }
 0x43b   :  { %v1810_v35 = vadd.f32 %v6801_v21, %v1808_v33  ;;  %v1664_v21 = vand.u32 2147483648, %v1652_v53 }
 0x43c   :  { %vm1663_vm6 = vcmp.eq.f32.partialorder %v1662_v54, 8.507059e+37  ;;  %v6152_v54 = vld [vmem:[#allocation13 + $0x10] sm:$0xff] }
 0x43d   :  { %v5057_v57 = vpop.eup %5056  ;;  %v4817_v15 = vmul.f32 -1.442695, %v1810_v35  ;;  %v1665_v52 = vor.u32 1.1754944e-38, %v1664_v21  ;;  %v6145_v21 = vld [vmem:[#allocation13 + $0x18] sm:$0xff] }
 0x43e   :  { %v1712_v5 = vadd.f32 1.0, %v5057_v57 }
 0x43f   :  { %5060 = vpow2.f32 %v4817_v15 }
 0x440   :  { %v5059_v17 = vpop.eup %5058  ;;  %5062 = vrcp.f32 %v1712_v5  ;;  %v1724_v59 = vand.u32 2147483648, %v1712_v5  ;;  %v1722_v43 = vand.u32 2147483647, %v1712_v5  ;;  %vm1718_vm5 = vweird.f32 %v1712_v5 }
 0x441   :  { %v1654_v16 = vmul.f32 %v5059_v17, %v1652_v53  ;;  %vm1659_vm1 = vweird.f32 %v5059_v17 }
 0x442   :  { %vm1660_vm3 = vmor %vm1658_vm2, %vm1659_vm1  ;;  %v1725_v4 = vor.u32 1.1754944e-38, %v1724_v59  ;;  %vm1723_vm8 = vcmp.eq.f32.partialorder %v1722_v43, 8.507059e+37  ;;  %v6161_v59 = vld [vmem:[#allocation13 + $0x38] sm:$0xff]  ;;  %v6171_v43 = vld [vmem:[#allocation15 + $0x20] sm:$0xff] }
 0x443   :  { %v1655_v25 = vsub.f32 1.0, %v1654_v16 }
 0x445   :  { %v5061_v58 = vpop.eup %5060  ;;  %v1656_v28 = vmul.f32 %v5059_v17, %v1655_v25 }
 0x446   :  { %v5063_v11 = vpop.eup %5062  ;;  %v1814_v14 = vadd.f32 1.0, %v5061_v58 }
 0x447   :  { %v1714_v63 = vmul.f32 %v5063_v11, %v1712_v5  ;;  %v1657_v32 = vadd.f32 %v5059_v17, %v1656_v28  ;;  %vm1719_vm4 = vweird.f32 %v5063_v11 }
 0x448   :  { %5064 = vrcp.f32 %v1814_v14  ;;  %vm1720_vm7 = vmor %vm1718_vm5, %vm1719_vm4  ;;  %v1826_v16 = vand.u32 2147483648, %v1814_v14  ;;  %vm1820_vm10 = vweird.f32 %v1814_v14  ;;  %v1824_v38 = vand.u32 2147483647, %v1814_v14 }
 0x449   :  { %v1715_v50 = vsub.f32 1.0, %v1714_v63  ;;  %5066 = vtanh.f32 %v1768_v12  ;;  %v1661_v0 = vsel %vm1660_vm3, %v5059_v17, %v1657_v32  ;;  %v6127_v12 = vld [vmem:[#allocation12 + $0x18] sm:$0xff]  ;;  %v6134_v63 = vld [vmem:[#allocation12 + $0x10] sm:$0xff]  ;;  %v6137_v32 = vld [vmem:[#allocation15] sm:$0xff] }
 0x44a   :  { %v1666_v56 = vsel %vm1663_vm6, %v1665_v52, %v1661_v0  ;;  %vm1825_vm12 = vcmp.eq.f32.partialorder %v1824_v38, 8.507059e+37  ;;  %v6168_v0 = vld [vmem:[#allocation15 + $0x28] sm:$0xff]  ;;  %v1852_v52 = vpop.f32.mrf.mxu0 }
 0x44b   :  { %v1716_v60 = vmul.f32 %v5063_v11, %v1715_v50  ;;  %v6148_v50 = vld [vmem:[#allocation12 + $0x38] sm:$0xff] }
 0x44d   :  { %v1717_v18 = vadd.f32 %v5063_v11, %v1716_v60  ;;  %v6164_v60 = vld [vmem:[#allocation13 + $0x30] sm:$0xff] }
 0x44e   :  { %v5065_v1 = vpop.eup %5064 }
 0x44f   :  { %v1816_v42 = vmul.f32 %v5065_v1, %v1814_v14  ;;  %v1721_v33 = vsel %vm1720_vm7, %v5063_v11, %v1717_v18  ;;  %v5067_v35 = vpop.eup %5066  ;;  %vm1821_vm9 = vweird.f32 %v5065_v1  ;;  %v6130_v14 = vld [vmem:[#allocation15 + $0x8] sm:$0xff] }
 0x450   :  { %v1726_v53 = vsel %vm1723_vm8, %v1725_v4, %v1721_v33  ;;  %v1831_v57 = vmul.f32 %v5067_v35, %v1666_v56  ;;  %vm1822_vm11 = vmor %vm1820_vm10, %vm1821_vm9  ;;  %v1855_v35 = vadd.f32 %v5906_v39, %v1852_v52 }
 0x451   :  { %v1817_v15 = vsub.f32 1.0, %v1816_v42  ;;  %v1830_v2 = vmul.f32 %v1726_v53, %v5965_v37  ;;  %v1827_v37 = vor.u32 1.1754944e-38, %v1826_v16 }
 0x453   :  { %v1818_v17 = vmul.f32 %v5065_v1, %v1817_v15  ;;  %v6115_v23 = vadd.f32 %v1831_v57, %v1830_v2 }
 0x455   :  { %5068 = vtanh.f32 %v6115_v23  ;;  %4821 = vmatmul.msk.f32.vlgmr.msra.gmra.mxu3 %vm146_vm0, %v6115_v23  ;;  %v1819_v5 = vadd.f32 %v5065_v1, %v1818_v17 }
 0x456   :  { %2131 = vmatpush.msra.mxu3 %v5970_v24 }
 0x457   :  { %v1823_v25 = vsel %vm1822_vm11, %v5065_v1, %v1819_v5  ;;  %v1949_v1 = vpop.f32.mrf.mxu0 }
 0x458   :  { %2132 = vmatpush.msra.mxu3 %v5973_v10  ;;  %v1828_v28 = vsel %vm1825_vm12, %v1827_v37, %v1823_v25 }
 0x45b   :  { %v5069_v58 = vpop.eup %5068 }
 0x45c   :  { %v1834_v11 = vmul.f32 %v5069_v58, %v1828_v28 }
 0x45d   :  { %4826 = vmatmul.msk.f32.vlgmr.msrb.gmra.mxu3 %vm146_vm0, %v6092_v19 }
 0x45e   :  { %4820 = vmatmul.msk.f32.vlgmr.msra.gmra.mxu2 %vm146_vm0, %v1834_v11  ;;  %4833 = vmatmul.msk.f32.vlgmr.msrb.gmra.mxu0 %vm146_vm0, %v1834_v11 }
 0x45f   :  { %2111 = vmatpush.msra.mxu2 %v5980_v47  ;;  %2259 = vmatpush.msrb.mxu3 %v6127_v12 }
 0x460   :  { %2406 = vmatpush.msrb.mxu0 %v6130_v14 }
 0x461   :  { %2112 = vmatpush.msra.mxu2 %v5985_v61  ;;  %2260 = vmatpush.msrb.mxu3 %v6134_v63 }
 0x462   :  { %2407 = vmatpush.msrb.mxu0 %v6137_v32 }
 0x465   :  { %4831 = vmatmul.msk.f32.vlgmr.msra.gmra.mxu3 %vm146_vm0, %v6092_v19  ;;  %v6155_v19 = vld [vmem:[#allocation12 + $0x30] sm:$0xff] }
 0x466   :  { %4825 = vmatmul.msk.f32.vlgmr.msrb.gmra.mxu2 %vm146_vm0, %v6034_v26  ;;  %4839 = vmatmul.msk.f32.vlgmr.msra.gmra.mxu0 %vm146_vm0, %v1834_v11 }
 0x467   :  { %2239 = vmatpush.msrb.mxu2 %v6145_v21  ;;  %2361 = vmatpush.msra.mxu3 %v6148_v50 }
 0x468   :  { %2503 = vmatpush.msra.mxu0 %v5997_v46 }
 0x469   :  { %2240 = vmatpush.msrb.mxu2 %v6152_v54  ;;  %2362 = vmatpush.msra.mxu3 %v6155_v19 }
 0x46a   :  { %2504 = vmatpush.msra.mxu0 %v6002_v49 }
 0x46e   :  { %4830 = vmatmul.msk.f32.vlgmr.msra.gmra.mxu2 %vm146_vm0, %v6034_v26  ;;  %v1876_v26 = vpop.f32.mrf.mxu1 }
 0x46f   :  { %2341 = vmatpush.msra.mxu2 %v6161_v59  ;;  %v1879_v53 = vadd.f32 %v1876_v26, %v1855_v35  ;;  %v2072_v35 = vpop.f32.mrf.mxu0 }
 0x471   :  { %2342 = vmatpush.msra.mxu2 %v6164_v60 }
 0x476   :  { %4836 = vmatmul.msk.f32.vlgmr.msrb.gmra.mxu2 %vm146_vm0, %v1834_v11  ;;  %v1972_v18 = vpop.f32.mrf.mxu1 }
 0x477   :  { %2454 = vmatpush.msrb.mxu2 %v6168_v0  ;;  %v1973_v56 = vadd.f32 %v1972_v18, %v1949_v1 }
 0x479   :  { %2455 = vmatpush.msrb.mxu2 %v6171_v43  ;;  %v1975_v4 = vadd.f32 %v6019_v9, %v1973_v56 }
 0x47b   :  { %v4824_v42 = vmul.f32 -1.442695, %v1975_v4 }
 0x47d   :  { %5070 = vpow2.f32 %v4824_v42 }
 0x47e   :  { %4841 = vmatmul.msk.f32.vlgmr.msra.gmra.mxu2 %vm146_vm0, %v1834_v11 }
 0x47f   :  { %2566 = vmatpush.msra.mxu2 %v6013_v45 }
 0x481   :  { %2567 = vmatpush.msra.mxu2 %v6016_v48 }
 0x483   :  { %v5071_v2 = vpop.eup %5070 }
 0x484   :  { %v1979_v16 = vadd.f32 1.0, %v5071_v2 }
 0x486   :  { %5072 = vrcp.f32 %v1979_v16  ;;  %vm1985_vm14 = vweird.f32 %v1979_v16 }
 0x48c   :  { %v5073_v11 = vpop.eup %5072 }
 0x48d   :  { %v1981_v52 = vmul.f32 %v5073_v11, %v1979_v16  ;;  %vm1986_vm13 = vweird.f32 %v5073_v11 }
 0x48e   :  { %vm1987_vm15 = vmor %vm1985_vm14, %vm1986_vm13 }
 0x48f   :  { %v1982_v42 = vsub.f32 1.0, %v1981_v52 }
 0x4d8   :  { %v1924_v33 = vpop.f32.mrf.mxu3 }
 0x4e0   :  { %v2032_v5 = vpop.f32.mrf.mxu3 }
 0x4e1   :  { %v1900_v57 = vpop.f32.mrf.mxu2 }
 0x4e2   :  { %v1903_v15 = vadd.f32 %v1900_v57, %v1879_v53  ;;  %v1983_v57 = vmul.f32 %v5073_v11, %v1982_v42 }
 0x4e4   :  { %v1927_v17 = vadd.f32 %v1924_v33, %v1903_v15  ;;  %v2092_v33 = vpop.f32.mrf.mxu1 }
 0x4e5   :  { %v2093_v53 = vadd.f32 %v2092_v33, %v2072_v35 }
 0x4e6   :  { %1929 = vst [vmem:[#allocation16 + $0x10] sm:$0xff] %v1927_v17  ;;  %v6181_v17 = vld [vmem:[#allocation10 + $0x2] ss:$0 sm:$0xff] }
 0x4e7   :  { %6810 = vst [vmem:[#allocation29_spill] sm:$0xff] %v6181_v17 }
 0x4e8   :  { %v2134_v28 = vpop.f32.mrf.mxu3 }
 0x4e9   :  { %v2012_v38 = vpop.f32.mrf.mxu2 }
 0x4ea   :  { %v2033_v25 = vadd.f32 %v2032_v5, %v2012_v38  ;;  %v2095_v5 = vadd.f32 %v6181_v17, %v2093_v53 }
 0x4ec   :  { %v2035_v37 = vadd.f32 %v6023_v8, %v2033_v25  ;;  %v1984_v25 = vadd.f32 %v5073_v11, %v1983_v57 }
 0x4ee   :  { %v4827_v58 = vmul.f32 -1.442695, %v2035_v37  ;;  %v1988_v52 = vsel %vm1987_vm15, %v5073_v11, %v1984_v25 }
 0x4f0   :  { %5074 = vpow2.f32 %v4827_v58  ;;  %v1991_v58 = vand.u32 2147483648, %v1979_v16 }
 0x4f1   :  { %v2114_v18 = vpop.f32.mrf.mxu2 }
 0x4f2   :  { %v2135_v39 = vadd.f32 %v2134_v28, %v2114_v18  ;;  %v1989_v28 = vand.u32 2147483647, %v1979_v16 }
 0x4f4   :  { %v2137_v26 = vadd.f32 %v6026_v13, %v2135_v39  ;;  %vm1990_vm2 = vcmp.eq.f32.partialorder %v1989_v28, 8.507059e+37 }
 0x4f6   :  { %v5075_v1 = vpop.eup %5074  ;;  %v4832_v56 = vmul.f32 -1.442695, %v2137_v26 }
 0x4f7   :  { %v2039_v4 = vadd.f32 1.0, %v5075_v1 }
 0x4f8   :  { %5076 = vpow2.f32 %v4832_v56  ;;  %v1992_v56 = vor.u32 1.1754944e-38, %v1991_v58 }
 0x4f9   :  { %5078 = vrcp.f32 %v2039_v4  ;;  %v2051_v39 = vand.u32 2147483648, %v2039_v4  ;;  %v2049_v1 = vand.u32 2147483647, %v2039_v4  ;;  %vm2045_vm3 = vweird.f32 %v2039_v4 }
 0x4fa   :  { %v1993_v35 = vsel %vm1990_vm2, %v1992_v56, %v1988_v52  ;;  %v6207_v56 = vld [vmem:[#allocation15 + $0x30] sm:$0xff] }
 0x4fb   :  { %v2052_v53 = vor.u32 1.1754944e-38, %v2051_v39  ;;  %vm2050_vm5 = vcmp.eq.f32.partialorder %v2049_v1, 8.507059e+37 }
 0x4fe   :  { %v5077_v15 = vpop.eup %5076 }
 0x4ff   :  { %v5079_v2 = vpop.eup %5078  ;;  %v2141_v38 = vadd.f32 1.0, %v5077_v15 }
 0x500   :  { %v2041_v37 = vmul.f32 %v5079_v2, %v2039_v4  ;;  %vm2046_vm1 = vweird.f32 %v5079_v2 }
 0x501   :  { %5080 = vrcp.f32 %v2141_v38  ;;  %vm2047_vm4 = vmor %vm2045_vm3, %vm2046_vm1  ;;  %v2153_v28 = vand.u32 2147483648, %v2141_v38  ;;  %vm2147_vm7 = vweird.f32 %v2141_v38  ;;  %v2151_v4 = vand.u32 2147483647, %v2141_v38 }
 0x502   :  { %v2042_v18 = vsub.f32 1.0, %v2041_v37  ;;  %5082 = vtanh.f32 %v2095_v5 }
 0x503   :  { %v2154_v39 = vor.u32 1.1754944e-38, %v2153_v28  ;;  %vm2152_vm9 = vcmp.eq.f32.partialorder %v2151_v4, 8.507059e+37 }
 0x504   :  { %v2043_v26 = vmul.f32 %v5079_v2, %v2042_v18 }
 0x506   :  { %v2044_v42 = vadd.f32 %v5079_v2, %v2043_v26 }
 0x507   :  { %v5081_v33 = vpop.eup %5080 }
 0x508   :  { %v2048_v57 = vsel %vm2047_vm4, %v5079_v2, %v2044_v42  ;;  %v2143_v15 = vmul.f32 %v5081_v33, %v2141_v38  ;;  %v5083_v16 = vpop.eup %5082  ;;  %vm2148_vm6 = vweird.f32 %v5081_v33  ;;  %v6203_v38 = vld [vmem:[#allocation15 + $0x10] sm:$0xff]  ;;  %v6230_v42 = vld [vmem:[#allocation4 + $0x20] sm:$0xff] }
 0x509   :  { %v2053_v37 = vsel %vm2050_vm5, %v2052_v53, %v2048_v57  ;;  %v2158_v17 = vmul.f32 %v5083_v16, %v1993_v35  ;;  %vm2149_vm8 = vmor %vm2147_vm7, %vm2148_vm6  ;;  %v6243_v57 = vld [vmem:[%s6745_s6] ss:$0 sm:$0xff]  ;;  %v2242_v16 = vpop.f32.mrf.mxu2 }
 0x50a   :  { %v2157_v5 = vmul.f32 %v2053_v37, %v6031_v6  ;;  %v2144_v11 = vsub.f32 1.0, %v2143_v15  ;;  %v6196_v6 = vld [vmem:[#allocation15 + $0x18] sm:$0xff]  ;;  %6811 = vst [vmem:[#allocation30_spill] sm:$0xff] %v6243_v57 }
 0x50c   :  { %v6185_v25 = vadd.f32 %v2158_v17, %v2157_v5  ;;  %v2145_v18 = vmul.f32 %v5081_v33, %v2144_v11  ;;  %v6200_v17 = vld [vmem:[#allocation15 + $0x38] sm:$0xff] }
 0x50e   :  { %v2146_v58 = vadd.f32 %v5081_v33, %v2145_v18  ;;  %5084 = vtanh.f32 %v6185_v25  ;;  %v6249_v18 = vld [vmem:[%s6745_s6 + $0x1] ss:$0 sm:$0xff] }
 0x50f   :  { %6812 = vst [vmem:[#allocation31_spill] sm:$0xff] %v6249_v18 }
 0x510   :  { %v2150_v2 = vsel %vm2149_vm8, %v5081_v33, %v2146_v58  ;;  %v2179_v33 = vpop.f32.mrf.mxu0 }
 0x511   :  { %v2155_v26 = vsel %vm2152_vm9, %v2154_v39, %v2150_v2  ;;  %v2344_v2 = vpop.f32.mrf.mxu2 }
 0x514   :  { %v5085_v52 = vpop.eup %5084 }
 0x515   :  { %v6188_v1 = vmul.f32 %v5085_v52, %v2155_v26 }
 0x517   :  { %4834 = vmatmul.msk.f32.vlgmr.msrb.gmra.mxu1 %vm146_vm0, %v6188_v1  ;;  %4837 = vmatmul.msk.f32.vlgmr.msrb.gmra.mxu3 %vm146_vm0, %v6188_v1 }
 0x518   :  { %4844 = vmatmul.msk.f32.vlgmr.msrb.gmra.mxu0 %vm146_vm0, %v6188_v1  ;;  %2430 = vmatpush.msrb.mxu1 %v6196_v6 }
 0x519   :  { %2626 = vmatpush.msrb.mxu0 %v6043_v27  ;;  %2478 = vmatpush.msrb.mxu3 %v6200_v17 }
 0x51a   :  { %2431 = vmatpush.msrb.mxu1 %v6203_v38 }
 0x51b   :  { %2627 = vmatpush.msrb.mxu0 %v6048_v29  ;;  %2479 = vmatpush.msrb.mxu3 %v6207_v56 }
 0x51f   :  { %4840 = vmatmul.msk.f32.vlgmr.msra.gmra.mxu1 %vm146_vm0, %v6188_v1  ;;  %4842 = vmatmul.msk.f32.vlgmr.msra.gmra.mxu3 %vm146_vm0, %v6188_v1 }
 0x520   :  { %4848 = vmatmul.msk.f32.vlgmr.msra.gmra.mxu0 %vm146_vm0, %v6188_v1  ;;  %2526 = vmatpush.msra.mxu1 %v6058_v40 }
 0x521   :  { %2733 = vmatpush.msra.mxu0 %v6061_v41  ;;  %2586 = vmatpush.msra.mxu3 %v6064_v20 }
 0x522   :  { %2527 = vmatpush.msra.mxu1 %v6067_v22 }
 0x523   :  { %2734 = vmatpush.msra.mxu0 %v6070_v36  ;;  %2587 = vmatpush.msra.mxu3 %v6073_v3 }
 0x527   :  { %4845 = vmatmul.msk.f32.vlgmr.msrb.gmra.mxu1 %vm146_vm0, %v6185_v25 }
 0x528   :  { %4854 = vmatmul.msk.f32.vlgmr.msrb.gmra.mxu0 %vm146_vm0, %v6188_v1  ;;  %2646 = vmatpush.msrb.mxu1 %v6080_v51 }
 0x529   :  { %2856 = vmatpush.msrb.mxu0 %v6083_v7 }
 0x52a   :  { %2647 = vmatpush.msrb.mxu1 %v6086_v62 }
 0x52b   :  { %2857 = vmatpush.msrb.mxu0 %v6089_v55 }
 0x52f   :  { %4849 = vmatmul.msk.f32.vlgmr.msra.gmra.mxu1 %vm146_vm0, %v6230_v42 }
 0x530   :  { %2756 = vmatpush.msra.mxu1 %v6096_v34 }
 0x532   :  { %2757 = vmatpush.msra.mxu1 %v6099_v30 }
 0x537   :  { %4855 = vmatmul.msk.f32.vlgmr.msrb.gmra.mxu1 %vm146_vm0, %v6230_v42 }
 0x538   :  { %2876 = vmatpush.msrb.mxu1 %v6104_v31 }
 0x53a   :  { %2877 = vmatpush.msrb.mxu1 %v6107_v44 }
 0x594   :  { %v2202_v35 = vpop.f32.mrf.mxu1 }
 0x595   :  { %v2203_v53 = vadd.f32 %v2202_v35, %v2179_v33  ;;  %v6255_v33 = vld [vmem:[%s6745_s6 + $0x3] ss:$0 sm:$0xff] }
 0x596   :  { %6813 = vst [vmem:[#allocation32_spill] sm:$0xff] %v6255_v33 }
 0x597   :  { %v2205_v15 = vadd.f32 %v6243_v57, %v2203_v53  ;;  %v6261_v57 = vld [vmem:[%s6745_s6 + $0x2] ss:$0 sm:$0xff] }
 0x598   :  { %6814 = vst [vmem:[#allocation33_spill] sm:$0xff] %v6261_v57 }
 0x599   :  { %v4835_v37 = vmul.f32 -1.442695, %v2205_v15 }
 0x59a   :  { %v2262_v5 = vpop.f32.mrf.mxu3 }
 0x59b   :  { %5086 = vpow2.f32 %v4835_v37  ;;  %v2263_v11 = vadd.f32 %v2262_v5, %v2242_v16 }
 0x59c   :  { %v2322_v37 = vpop.f32.mrf.mxu1 }
 0x59d   :  { %v2265_v58 = vadd.f32 %v6249_v18, %v2263_v11  ;;  %v2302_v11 = vpop.f32.mrf.mxu0 }
 0x59f   :  { %v4838_v28 = vmul.f32 -1.442695, %v2265_v58 }
 0x5a1   :  { %v5087_v4 = vpop.eup %5086  ;;  %5088 = vpow2.f32 %v4838_v28  ;;  %v2323_v28 = vadd.f32 %v2322_v37, %v2302_v11 }
 0x5a2   :  { %v2209_v39 = vadd.f32 1.0, %v5087_v4  ;;  %v2364_v52 = vpop.f32.mrf.mxu3 }
 0x5a3   :  { %v2365_v26 = vadd.f32 %v2364_v52, %v2344_v2 }
 0x5a4   :  { %5090 = vrcp.f32 %v2209_v39  ;;  %vm2215_vm11 = vweird.f32 %v2209_v39  ;;  %v2219_v37 = vand.u32 2147483647, %v2209_v39 }
 0x5a5   :  { %v2367_v35 = vadd.f32 %v6255_v33, %v2365_v26  ;;  %v2325_v26 = vadd.f32 %v6261_v57, %v2323_v28 }
 0x5a6   :  { %vm2220_vm15 = vcmp.eq.f32.partialorder %v2219_v37, 8.507059e+37 }
 0x5a7   :  { %v5089_v53 = vpop.eup %5088  ;;  %v4843_v15 = vmul.f32 -1.442695, %v2367_v35 }
 0x5a8   :  { %v2269_v16 = vadd.f32 1.0, %v5089_v53 }
 0x5a9   :  { %5092 = vpow2.f32 %v4843_v15  ;;  %v2221_v15 = vand.u32 2147483648, %v2209_v39 }
 0x5aa   :  { %v5091_v5 = vpop.eup %5090  ;;  %5094 = vrcp.f32 %v2269_v16  ;;  %v2281_v11 = vand.u32 2147483648, %v2269_v16  ;;  %v2279_v31 = vand.u32 2147483647, %v2269_v16  ;;  %vm2275_vm14 = vweird.f32 %v2269_v16 }
 0x5ab   :  { %v2211_v58 = vmul.f32 %v5091_v5, %v2209_v39  ;;  %vm2216_vm10 = vweird.f32 %v5091_v5  ;;  %v2222_v30 = vor.u32 1.1754944e-38, %v2221_v15 }
 0x5ac   :  { %vm2217_vm12 = vmor %vm2215_vm11, %vm2216_vm10  ;;  %vm2280_vm2 = vcmp.eq.f32.partialorder %v2279_v31, 8.507059e+37 }
 0x5ad   :  { %v2212_v4 = vsub.f32 1.0, %v2211_v58 }
 0x5af   :  { %v5093_v2 = vpop.eup %5092  ;;  %v2213_v52 = vmul.f32 %v5091_v5, %v2212_v4 }
 0x5b0   :  { %v5095_v18 = vpop.eup %5094  ;;  %v2371_v35 = vadd.f32 1.0, %v5093_v2 }
 0x5b1   :  { %v2271_v53 = vmul.f32 %v5095_v18, %v2269_v16  ;;  %v2214_v33 = vadd.f32 %v5091_v5, %v2213_v52  ;;  %vm2276_vm13 = vweird.f32 %v5095_v18  ;;  %v2282_v52 = vor.u32 1.1754944e-38, %v2281_v11 }
 0x5b2   :  { %5096 = vrcp.f32 %v2371_v35  ;;  %vm2277_vm1 = vmor %vm2275_vm14, %vm2276_vm13  ;;  %v2383_v16 = vand.u32 2147483648, %v2371_v35  ;;  %vm2377_vm4 = vweird.f32 %v2371_v35 }
 0x5b3   :  { %v2272_v44 = vsub.f32 1.0, %v2271_v53  ;;  %5098 = vtanh.f32 %v2325_v26  ;;  %v2218_v4 = vsel %vm2217_vm12, %v5091_v5, %v2214_v33 }
 0x5b4   :  { %v2223_v57 = vsel %vm2220_vm15, %v2222_v30, %v2218_v4 }
 0x5b5   :  { %v2273_v58 = vmul.f32 %v5095_v18, %v2272_v44 }
 0x5b7   :  { %v2274_v28 = vadd.f32 %v5095_v18, %v2273_v58 }
 0x5b8   :  { %v5097_v2 = vpop.eup %5096 }
 0x5b9   :  { %v2373_v34 = vmul.f32 %v5097_v2, %v2371_v35  ;;  %v2278_v55 = vsel %vm2277_vm1, %v5095_v18, %v2274_v28  ;;  %v5099_v53 = vpop.eup %5098  ;;  %vm2378_vm3 = vweird.f32 %v5097_v2  ;;  %v2381_v18 = vand.u32 2147483647, %v2371_v35 }
 0x5ba   :  { %v2283_v39 = vsel %vm2280_vm2, %v2282_v52, %v2278_v55  ;;  %v2388_v62 = vmul.f32 %v5099_v53, %v2223_v57  ;;  %vm2379_vm5 = vmor %vm2377_vm4, %vm2378_vm3 }
 0x5bb   :  { %v2374_v7 = vsub.f32 1.0, %v2373_v34  ;;  %v2387_v44 = vmul.f32 %v2283_v39, %v6115_v23  ;;  %v2384_v34 = vor.u32 1.1754944e-38, %v2383_v16  ;;  %vm2382_vm6 = vcmp.eq.f32.partialorder %v2381_v18, 8.507059e+37 }
 0x5bd   :  { %v2375_v26 = vmul.f32 %v5097_v2, %v2374_v7  ;;  %v6265_v33 = vadd.f32 %v2388_v62, %v2387_v44 }
 0x5bf   :  { %5100 = vtanh.f32 %v6265_v33  ;;  %4847 = vmatmul.msk.f32.vlgmr.msrb.gmra.mxu3 %vm146_vm0, %v6265_v33  ;;  %v2376_v30 = vadd.f32 %v5097_v2, %v2375_v26 }
 0x5c0   :  { %2688 = vmatpush.msrb.mxu3 %v5970_v24  ;;  %v2433_v24 = vpop.f32.mrf.mxu1 }
 0x5c1   :  { %v2380_v55 = vsel %vm2379_vm5, %v5097_v2, %v2376_v30 }
 0x5c2   :  { %2689 = vmatpush.msrb.mxu3 %v5973_v10  ;;  %v2385_v62 = vsel %vm2382_vm6, %v2384_v34, %v2380_v55  ;;  %v2409_v10 = vpop.f32.mrf.mxu0 }
 0x5c5   :  { %v5101_v7 = vpop.eup %5100 }
 0x5c6   :  { %v2391_v31 = vmul.f32 %v5101_v7, %v2385_v62 }
 0x5c7   :  { %4852 = vmatmul.msk.f32.vlgmr.msra.gmra.mxu3 %vm146_vm0, %v6230_v42 }
 0x5c8   :  { %4846 = vmatmul.msk.f32.vlgmr.msrb.gmra.mxu2 %vm146_vm0, %v2391_v31  ;;  %4859 = vmatmul.msk.f32.vlgmr.msra.gmra.mxu0 %vm146_vm0, %v2391_v31 }
 0x5c9   :  { %2668 = vmatpush.msrb.mxu2 %v5980_v47  ;;  %2816 = vmatpush.msra.mxu3 %v6127_v12  ;;  %v2529_v47 = vpop.f32.mrf.mxu1 }
 0x5ca   :  { %2963 = vmatpush.msra.mxu0 %v6130_v14 }
 0x5cb   :  { %2669 = vmatpush.msrb.mxu2 %v5985_v61  ;;  %2817 = vmatpush.msra.mxu3 %v6134_v63  ;;  %v2506_v61 = vpop.f32.mrf.mxu0 }
 0x5cc   :  { %2964 = vmatpush.msra.mxu0 %v6137_v32 }
 0x5cf   :  { %4857 = vmatmul.msk.f32.vlgmr.msrb.gmra.mxu3 %vm146_vm0, %v6230_v42  ;;  %v6307_v42 = vld [vmem:[%s6747_s8] ss:$0 sm:$0xff] }
 0x5d0   :  { %4851 = vmatmul.msk.f32.vlgmr.msra.gmra.mxu2 %vm146_vm0, %v6188_v1  ;;  %4865 = vmatmul.msk.f32.vlgmr.msrb.gmra.mxu0 %vm146_vm0, %v2391_v31  ;;  %v2412_v57 = vadd.f32 %v6307_v42, %v2409_v10  ;;  %v6815_v10 = vld [vmem:[#allocation29_spill] sm:$0xff] }
 0x5d1   :  { %2796 = vmatpush.msra.mxu2 %v6145_v21  ;;  %2918 = vmatpush.msrb.mxu3 %v6148_v50  ;;  %v2649_v34 = vpop.f32.mrf.mxu1 }
 0x5d2   :  { %3060 = vmatpush.msrb.mxu0 %v5997_v46  ;;  %v2530_v46 = vadd.f32 %v2529_v47, %v2506_v61 }
 0x5d3   :  { %2797 = vmatpush.msra.mxu2 %v6152_v54  ;;  %2919 = vmatpush.msrb.mxu3 %v6155_v19  ;;  %v2629_v7 = vpop.f32.mrf.mxu0 }
 0x5d4   :  { %3061 = vmatpush.msrb.mxu0 %v6002_v49  ;;  %v2532_v49 = vadd.f32 %v6019_v9, %v2530_v46  ;;  %v2650_v62 = vadd.f32 %v2649_v34, %v2629_v7 }
 0x5d6   :  { %v4850_v23 = vmul.f32 -1.442695, %v2532_v49  ;;  %v2652_v47 = vadd.f32 %v6815_v10, %v2650_v62 }
 0x5d8   :  { %4856 = vmatmul.msk.f32.vlgmr.msrb.gmra.mxu2 %vm146_vm0, %v6188_v1  ;;  %5102 = vpow2.f32 %v4850_v23 }
 0x5d9   :  { %2898 = vmatpush.msrb.mxu2 %v6161_v59 }
 0x5db   :  { %2899 = vmatpush.msrb.mxu2 %v6164_v60 }
 0x5de   :  { %v5103_v35 = vpop.eup %5102 }
 0x5df   :  { %v2536_v11 = vadd.f32 1.0, %v5103_v35 }
 0x5e0   :  { %4862 = vmatmul.msk.f32.vlgmr.msra.gmra.mxu2 %vm146_vm0, %v2391_v31 }
 0x5e1   :  { %3011 = vmatpush.msra.mxu2 %v6168_v0  ;;  %5104 = vrcp.f32 %v2536_v11  ;;  %v2548_v23 = vand.u32 2147483648, %v2536_v11  ;;  %vm2542_vm8 = vweird.f32 %v2536_v11 }
 0x5e3   :  { %3012 = vmatpush.msra.mxu2 %v6171_v43  ;;  %v2549_v35 = vor.u32 1.1754944e-38, %v2548_v23 }
 0x5e7   :  { %v5105_v52 = vpop.eup %5104 }
 0x5e8   :  { %4867 = vmatmul.msk.f32.vlgmr.msrb.gmra.mxu2 %vm146_vm0, %v2391_v31  ;;  %v2538_v44 = vmul.f32 %v5105_v52, %v2536_v11  ;;  %vm2543_vm7 = vweird.f32 %v5105_v52 }
 0x5e9   :  { %3123 = vmatpush.msrb.mxu2 %v6013_v45  ;;  %v2436_v45 = vadd.f32 %v2433_v24, %v2412_v57  ;;  %vm2544_vm9 = vmor %vm2542_vm8, %vm2543_vm7 }
 0x5ea   :  { %v2539_v55 = vsub.f32 1.0, %v2538_v44 }
 0x5eb   :  { %3124 = vmatpush.msrb.mxu2 %v6016_v48 }
 0x5ec   :  { %v2540_v31 = vmul.f32 %v5105_v52, %v2539_v55 }
 0x5ee   :  { %v2541_v46 = vadd.f32 %v5105_v52, %v2540_v31 }
 0x642   :  { %v2481_v1 = vpop.f32.mrf.mxu3 }
 0x64a   :  { %v2589_v37 = vpop.f32.mrf.mxu3 }
 0x64b   :  { %v2457_v5 = vpop.f32.mrf.mxu2 }
 0x64c   :  { %v2460_v48 = vadd.f32 %v2457_v5, %v2436_v45  ;;  %v2545_v45 = vsel %vm2544_vm9, %v5105_v52, %v2541_v46 }
 0x64e   :  { %v2484_v15 = vadd.f32 %v2481_v1, %v2460_v48 }
 0x650   :  { %2486 = vst [vmem:[#allocation16 + $0x18] sm:$0xff] %v2484_v15 }
 0x652   :  { %v2691_v2 = vpop.f32.mrf.mxu3 }
 0x653   :  { %v2569_v58 = vpop.f32.mrf.mxu2 }
 0x654   :  { %v2590_v9 = vadd.f32 %v2589_v37, %v2569_v58 }
 0x656   :  { %v2592_v4 = vadd.f32 %v6023_v8, %v2590_v9 }
 0x658   :  { %v4853_v28 = vmul.f32 -1.442695, %v2592_v4 }
 0x65a   :  { %5106 = vpow2.f32 %v4853_v28 }
 0x65b   :  { %v2671_v53 = vpop.f32.mrf.mxu2 }
 0x65c   :  { %v2692_v39 = vadd.f32 %v2691_v2, %v2671_v53 }
 0x65e   :  { %v2694_v26 = vadd.f32 %v6026_v13, %v2692_v39  ;;  %v2546_v13 = vand.u32 2147483647, %v2536_v11 }
 0x660   :  { %v5107_v16 = vpop.eup %5106  ;;  %v4858_v30 = vmul.f32 -1.442695, %v2694_v26  ;;  %vm2547_vm11 = vcmp.eq.f32.partialorder %v2546_v13, 8.507059e+37  ;;  %v6824_v13 = vld [vmem:[#allocation31_spill] sm:$0xff] }
 0x661   :  { %v2596_v18 = vadd.f32 1.0, %v5107_v16  ;;  %v2550_v58 = vsel %vm2547_vm11, %v2549_v35, %v2545_v45 }
 0x662   :  { %5108 = vpow2.f32 %v4858_v30 }
 0x663   :  { %5110 = vrcp.f32 %v2596_v18  ;;  %v2608_v57 = vand.u32 2147483648, %v2596_v18  ;;  %v2606_v48 = vand.u32 2147483647, %v2596_v18  ;;  %vm2602_vm12 = vweird.f32 %v2596_v18 }
 0x665   :  { %v2609_v9 = vor.u32 1.1754944e-38, %v2608_v57  ;;  %vm2607_vm14 = vcmp.eq.f32.partialorder %v2606_v48, 8.507059e+37 }
 0x668   :  { %v5109_v8 = vpop.eup %5108 }
 0x669   :  { %v5111_v24 = vpop.eup %5110  ;;  %v2698_v61 = vadd.f32 1.0, %v5109_v8 }
 0x66a   :  { %v2598_v49 = vmul.f32 %v5111_v24, %v2596_v18  ;;  %vm2603_vm10 = vweird.f32 %v5111_v24 }
 0x66b   :  { %5112 = vrcp.f32 %v2698_v61  ;;  %vm2604_vm13 = vmor %vm2602_vm12, %vm2603_vm10  ;;  %v2710_v30 = vand.u32 2147483648, %v2698_v61  ;;  %vm2704_vm1 = vweird.f32 %v2698_v61  ;;  %v2708_v18 = vand.u32 2147483647, %v2698_v61 }
 0x66c   :  { %v2599_v1 = vsub.f32 1.0, %v2598_v49  ;;  %5114 = vtanh.f32 %v2652_v47 }
 0x66d   :  { %v2711_v34 = vor.u32 1.1754944e-38, %v2710_v30  ;;  %vm2709_vm3 = vcmp.eq.f32.partialorder %v2708_v18, 8.507059e+37 }
 0x66e   :  { %v2600_v5 = vmul.f32 %v5111_v24, %v2599_v1 }
 0x670   :  { %v2601_v15 = vadd.f32 %v5111_v24, %v2600_v5 }
 0x671   :  { %v5113_v37 = vpop.eup %5112 }
 0x672   :  { %v2605_v4 = vsel %vm2604_vm13, %v5111_v24, %v2601_v15  ;;  %v2700_v28 = vmul.f32 %v5113_v37, %v2698_v61  ;;  %v5115_v11 = vpop.eup %5114  ;;  %vm2705_vm15 = vweird.f32 %v5113_v37  ;;  %v6823_v24 = vld [vmem:[#allocation30_spill] sm:$0xff]  ;;  %v2799_v61 = vpop.f32.mrf.mxu2 }
 0x673   :  { %v2610_v2 = vsel %vm2607_vm14, %v2609_v9, %v2605_v4  ;;  %v2715_v53 = vmul.f32 %v5115_v11, %v2550_v58  ;;  %vm2706_vm2 = vmor %vm2704_vm1, %vm2705_vm15 }
 0x674   :  { %v2714_v39 = vmul.f32 %v2610_v2, %v6185_v25  ;;  %v2701_v52 = vsub.f32 1.0, %v2700_v28 }
 0x676   :  { %v6314_v44 = vadd.f32 %v2715_v53, %v2714_v39  ;;  %v2702_v26 = vmul.f32 %v5113_v37, %v2701_v52 }
 0x678   :  { %5116 = vtanh.f32 %v6314_v44  ;;  %v2703_v16 = vadd.f32 %v5113_v37, %v2702_v26 }
 0x67a   :  { %v2707_v55 = vsel %vm2706_vm2, %v5113_v37, %v2703_v16  ;;  %v2901_v5 = vpop.f32.mrf.mxu2  ;;  %v6825_v37 = vld [vmem:[#allocation32_spill] sm:$0xff] }
 0x67b   :  { %v2712_v62 = vsel %vm2709_vm3, %v2711_v34, %v2707_v55  ;;  %v6826_v55 = vld [vmem:[#allocation33_spill] sm:$0xff] }
 0x67e   :  { %v5117_v7 = vpop.eup %5116 }
 0x67f   :  { %v6317_v31 = vmul.f32 %v5117_v7, %v2712_v62 }
 0x681   :  { %4860 = vmatmul.msk.f32.vlgmr.msra.gmra.mxu1 %vm146_vm0, %v6317_v31  ;;  %4863 = vmatmul.msk.f32.vlgmr.msra.gmra.mxu3 %vm146_vm0, %v6317_v31 }
 0x682   :  { %4870 = vmatmul.msk.f32.vlgmr.msra.gmra.mxu0 %vm146_vm0, %v6317_v31  ;;  %2987 = vmatpush.msra.mxu1 %v6196_v6 }
 0x683   :  { %3183 = vmatpush.msra.mxu0 %v6043_v27  ;;  %3035 = vmatpush.msra.mxu3 %v6200_v17  ;;  %v6816_v27 = vld [vmem:[#allocation23_spill] sm:$0xff] }
 0x684   :  { %2988 = vmatpush.msra.mxu1 %v6203_v38 }
 0x685   :  { %3184 = vmatpush.msra.mxu0 %v6048_v29  ;;  %3036 = vmatpush.msra.mxu3 %v6207_v56  ;;  %v6817_v29 = vld [vmem:[#allocation22_spill] sm:$0xff] }
 0x689   :  { %4866 = vmatmul.msk.f32.vlgmr.msrb.gmra.mxu1 %vm146_vm0, %v6317_v31  ;;  %4868 = vmatmul.msk.f32.vlgmr.msrb.gmra.mxu3 %vm146_vm0, %v6317_v31 }
 0x68a   :  { %4874 = vmatmul.msk.f32.vlgmr.msrb.gmra.mxu0 %vm146_vm0, %v6317_v31  ;;  %3083 = vmatpush.msrb.mxu1 %v6058_v40  ;;  %v6818_v40 = vld [vmem:[#allocation24_spill] sm:$0xff] }
 0x68b   :  { %3290 = vmatpush.msrb.mxu0 %v6061_v41  ;;  %3143 = vmatpush.msrb.mxu3 %v6064_v20  ;;  %v6351_v41 = vld [vmem:[#allocation4 + $0x28] sm:$0xff]  ;;  %v6819_v20 = vld [vmem:[#allocation25_spill] sm:$0xff] }
 0x68c   :  { %3084 = vmatpush.msrb.mxu1 %v6067_v22  ;;  %v6820_v22 = vld [vmem:[#allocation26_spill] sm:$0xff] }
 0x68d   :  { %3291 = vmatpush.msrb.mxu0 %v6070_v36  ;;  %3144 = vmatpush.msrb.mxu3 %v6073_v3  ;;  %v6821_v36 = vld [vmem:[#allocation27_spill] sm:$0xff]  ;;  %v6822_v3 = vld [vmem:[#allocation28_spill] sm:$0xff] }
 0x691   :  { %4871 = vmatmul.msk.f32.vlgmr.msra.gmra.mxu1 %vm146_vm0, %v6314_v44 }
 0x692   :  { %4880 = vmatmul.msk.f32.vlgmr.msra.gmra.mxu0 %vm146_vm0, %v6317_v31  ;;  %3203 = vmatpush.msra.mxu1 %v6080_v51  ;;  %v2736_v51 = vpop.f32.mrf.mxu0 }
 0x693   :  { %3413 = vmatpush.msra.mxu0 %v6816_v27 }
 0x694   :  { %3204 = vmatpush.msra.mxu1 %v6817_v29 }
 0x695   :  { %3414 = vmatpush.msra.mxu0 %v6818_v40 }
 0x699   :  { %4875 = vmatmul.msk.f32.vlgmr.msrb.gmra.mxu1 %vm146_vm0, %v6351_v41 }
 0x69a   :  { %3313 = vmatpush.msrb.mxu1 %v6819_v20  ;;  %v2859_v53 = vpop.f32.mrf.mxu0 }
 0x69c   :  { %3314 = vmatpush.msrb.mxu1 %v6820_v22 }
 0x6a1   :  { %4881 = vmatmul.msk.f32.vlgmr.msra.gmra.mxu1 %vm146_vm0, %v6351_v41 }
 0x6a2   :  { %3433 = vmatpush.msra.mxu1 %v6821_v36 }
 0x6a4   :  { %3434 = vmatpush.msra.mxu1 %v6822_v3 }
 0x6fe   :  { %v2759_v25 = vpop.f32.mrf.mxu1 }
 0x6ff   :  { %v2760_v8 = vadd.f32 %v2759_v25, %v2736_v51 }
 0x701   :  { %v2762_v47 = vadd.f32 %v6823_v24, %v2760_v8 }
 0x703   :  { %v4861_v46 = vmul.f32 -1.442695, %v2762_v47 }
 0x704   :  { %v2819_v49 = vpop.f32.mrf.mxu3 }
 0x705   :  { %5118 = vpow2.f32 %v4861_v46  ;;  %v2820_v23 = vadd.f32 %v2819_v49, %v2799_v61 }
 0x706   :  { %v2879_v11 = vpop.f32.mrf.mxu1 }
 0x707   :  { %v2822_v1 = vadd.f32 %v6824_v13, %v2820_v23  ;;  %v2880_v52 = vadd.f32 %v2879_v11, %v2859_v53  ;;  %v6374_v11 = vld [vmem:[#allocation7 + $0x30] sm:$0xff] }
 0x709   :  { %v4864_v57 = vmul.f32 -1.442695, %v2822_v1  ;;  %v2882_v34 = vadd.f32 %v6826_v55, %v2880_v52 }
 0x70b   :  { %v5119_v45 = vpop.eup %5118  ;;  %5120 = vpow2.f32 %v4864_v57 }
 0x70c   :  { %v2766_v48 = vadd.f32 1.0, %v5119_v45  ;;  %v2921_v35 = vpop.f32.mrf.mxu3 }
 0x70d   :  { %v2922_v15 = vadd.f32 %v2921_v35, %v2901_v5 }
 0x70e   :  { %5122 = vrcp.f32 %v2766_v48  ;;  %v2778_v29 = vand.u32 2147483648, %v2766_v48  ;;  %vm2772_vm5 = vweird.f32 %v2766_v48  ;;  %v2776_v20 = vand.u32 2147483647, %v2766_v48 }
 0x70f   :  { %v2924_v58 = vadd.f32 %v6825_v37, %v2922_v15 }
 0x710   :  { %v2779_v25 = vor.u32 1.1754944e-38, %v2778_v29  ;;  %vm2777_vm9 = vcmp.eq.f32.partialorder %v2776_v20, 8.507059e+37 }
 0x711   :  { %v5121_v9 = vpop.eup %5120  ;;  %v4869_v4 = vmul.f32 -1.442695, %v2924_v58 }
 0x712   :  { %v2826_v28 = vadd.f32 1.0, %v5121_v9 }
 0x713   :  { %5124 = vpow2.f32 %v4869_v4 }
 0x714   :  { %v5123_v2 = vpop.eup %5122  ;;  %5126 = vrcp.f32 %v2826_v28  ;;  %v2838_v22 = vand.u32 2147483648, %v2826_v28  ;;  %v2836_v51 = vand.u32 2147483647, %v2826_v28  ;;  %vm2832_vm8 = vweird.f32 %v2826_v28 }
 0x715   :  { %v2768_v39 = vmul.f32 %v5123_v2, %v2766_v48  ;;  %vm2773_vm4 = vweird.f32 %v5123_v2 }
 0x716   :  { %vm2774_vm6 = vmor %vm2772_vm5, %vm2773_vm4  ;;  %v2839_v61 = vor.u32 1.1754944e-38, %v2838_v22  ;;  %vm2837_vm11 = vcmp.eq.f32.partialorder %v2836_v51, 8.507059e+37  ;;  %v6424_v22 = vld [vmem:[#allocation10 + $0x1] ss:$0 sm:$0xff] }
 0x717   :  { %v2769_v26 = vsub.f32 1.0, %v2768_v39 }
 0x719   :  { %v5125_v16 = vpop.eup %5124  ;;  %v2770_v30 = vmul.f32 %v5123_v2, %v2769_v26  ;;  %v6381_v26 = vld [vmem:[#allocation9 + $0x38] sm:$0xff] }
 0x71a   :  { %v5127_v18 = vpop.eup %5126  ;;  %v2928_v7 = vadd.f32 1.0, %v5125_v16  ;;  %v6386_v16 = vld [vmem:[#allocation9 + $0x30] sm:$0xff] }
 0x71b   :  { %v2828_v62 = vmul.f32 %v5127_v18, %v2826_v28  ;;  %v2771_v27 = vadd.f32 %v5123_v2, %v2770_v30  ;;  %vm2833_vm7 = vweird.f32 %v5127_v18  ;;  %v6371_v28 = vld [vmem:[#allocation7 + $0x38] sm:$0xff] }
 0x71c   :  { %5128 = vrcp.f32 %v2928_v7  ;;  %vm2834_vm10 = vmor %vm2832_vm8, %vm2833_vm7  ;;  %v2940_v9 = vand.u32 2147483648, %v2928_v7  ;;  %vm2934_vm13 = vweird.f32 %v2928_v7  ;;  %v2938_v4 = vand.u32 2147483647, %v2928_v7 }
 0x71d   :  { %v2829_v40 = vsub.f32 1.0, %v2828_v62  ;;  %5130 = vtanh.f32 %v2882_v34  ;;  %v2775_v3 = vsel %vm2774_vm6, %v5123_v2, %v2771_v27 }
 0x71e   :  { %v2780_v46 = vsel %vm2777_vm9, %v2779_v25, %v2775_v3  ;;  %v2941_v2 = vor.u32 1.1754944e-38, %v2940_v9  ;;  %vm2939_vm15 = vcmp.eq.f32.partialorder %v2938_v4, 8.507059e+37 }
 0x71f   :  { %v2830_v36 = vmul.f32 %v5127_v18, %v2829_v40 }
 0x721   :  { %v2831_v8 = vadd.f32 %v5127_v18, %v2830_v36 }
 0x722   :  { %v5129_v47 = vpop.eup %5128 }
 0x723   :  { %v2835_v49 = vsel %vm2834_vm10, %v5127_v18, %v2831_v8  ;;  %v2930_v23 = vmul.f32 %v5129_v47, %v2928_v7  ;;  %v5131_v1 = vpop.eup %5130  ;;  %vm2935_vm12 = vweird.f32 %v5129_v47 }
 0x724   :  { %v2840_v57 = vsel %vm2837_vm11, %v2839_v61, %v2835_v49  ;;  %v2945_v5 = vmul.f32 %v5131_v1, %v2780_v46  ;;  %vm2936_vm14 = vmor %vm2934_vm13, %vm2935_vm12  ;;  %v6427_v46 = vld [vmem:[#allocation10 + $0x3] ss:$0 sm:$0xff] }
 0x725   :  { %v2944_v45 = vmul.f32 %v2840_v57, %v6265_v33  ;;  %v2931_v48 = vsub.f32 1.0, %v2930_v23 }
 0x727   :  { %v6366_v35 = vadd.f32 %v2945_v5, %v2944_v45  ;;  %v2932_v15 = vmul.f32 %v5129_v47, %v2931_v48 }
 0x729   :  { %5132 = vtanh.f32 %v6366_v35  ;;  %v2933_v58 = vadd.f32 %v5129_v47, %v2932_v15  ;;  %4873 = vmatmul.msk.f32.vlgmr.msra.gmra.mxu3 %vm146_vm0, %v6366_v35 }
 0x72a   :  { %3245 = vmatpush.msra.mxu3 %v6371_v28 }
 0x72b   :  { %v2937_v33 = vsel %vm2936_vm14, %v5129_v47, %v2933_v58 }
 0x72c   :  { %3246 = vmatpush.msra.mxu3 %v6374_v11  ;;  %v2942_v39 = vsel %vm2939_vm15, %v2941_v2, %v2937_v33 }
 0x72f   :  { %v5133_v53 = vpop.eup %5132 }
 0x730   :  { %v2948_v52 = vmul.f32 %v5133_v53, %v2942_v39 }
 0x731   :  { %4878 = vmatmul.msk.f32.vlgmr.msrb.gmra.mxu3 %vm146_vm0, %v6351_v41 }
 0x732   :  { %4872 = vmatmul.msk.f32.vlgmr.msra.gmra.mxu2 %vm146_vm0, %v2948_v52  ;;  %4885 = vmatmul.msk.f32.vlgmr.msrb.gmra.mxu0 %vm146_vm0, %v2948_v52 }
 0x733   :  { %3225 = vmatpush.msra.mxu2 %v6381_v26  ;;  %3373 = vmatpush.msrb.mxu3 %v6127_v12  ;;  %v6398_v12 = vld [vmem:[#allocation9 + $0x8] sm:$0xff] }
 0x734   :  { %3520 = vmatpush.msrb.mxu0 %v6130_v14  ;;  %v6403_v14 = vld [vmem:[#allocation9] sm:$0xff] }
 0x735   :  { %3226 = vmatpush.msra.mxu2 %v6386_v16  ;;  %3374 = vmatpush.msrb.mxu3 %v6134_v63  ;;  %v6414_v63 = vld [vmem:[#allocation9 + $0x18] sm:$0xff] }
 0x736   :  { %3521 = vmatpush.msrb.mxu0 %v6137_v32  ;;  %v6417_v32 = vld [vmem:[#allocation9 + $0x10] sm:$0xff] }
 0x739   :  { %4883 = vmatmul.msk.f32.vlgmr.msra.gmra.mxu3 %vm146_vm0, %v6351_v41 }
 0x73a   :  { %4877 = vmatmul.msk.f32.vlgmr.msrb.gmra.mxu2 %vm146_vm0, %v6317_v31  ;;  %4891 = vmatmul.msk.f32.vlgmr.msra.gmra.mxu0 %vm146_vm0, %v2948_v52 }
 0x73b   :  { %3353 = vmatpush.msrb.mxu2 %v6145_v21  ;;  %3475 = vmatpush.msra.mxu3 %v6148_v50  ;;  %v2990_v21 = vpop.f32.mrf.mxu1  ;;  %v2966_v50 = vpop.f32.mrf.mxu0 }
 0x73c   :  { %3617 = vmatpush.msra.mxu0 %v6398_v12  ;;  %v2969_v41 = vadd.f32 %v6307_v42, %v2966_v50 }
 0x73d   :  { %3354 = vmatpush.msrb.mxu2 %v6152_v54  ;;  %3476 = vmatpush.msra.mxu3 %v6155_v19 }
 0x73e   :  { %3618 = vmatpush.msra.mxu0 %v6403_v14  ;;  %v2993_v30 = vadd.f32 %v2990_v21, %v2969_v41 }
 0x742   :  { %4882 = vmatmul.msk.f32.vlgmr.msra.gmra.mxu2 %vm146_vm0, %v6317_v31 }
 0x743   :  { %3455 = vmatpush.msra.mxu2 %v6161_v59  ;;  %v3086_v54 = vpop.f32.mrf.mxu1  ;;  %v3063_v19 = vpop.f32.mrf.mxu0 }
 0x744   :  { %v3087_v59 = vadd.f32 %v3086_v54, %v3063_v19 }
 0x745   :  { %3456 = vmatpush.msra.mxu2 %v6164_v60  ;;  %v6420_v60 = vld [vmem:[#allocation10] ss:$0 sm:$0xff] }
 0x74a   :  { %4888 = vmatmul.msk.f32.vlgmr.msrb.gmra.mxu2 %vm146_vm0, %v2948_v52 }
 0x74b   :  { %3568 = vmatpush.msrb.mxu2 %v6168_v0  ;;  %v3089_v0 = vadd.f32 %v6420_v60, %v3087_v59  ;;  %v3206_v5 = vpop.f32.mrf.mxu1  ;;  %v3186_v48 = vpop.f32.mrf.mxu0 }
 0x74c   :  { %v3207_v15 = vadd.f32 %v3206_v5, %v3186_v48  ;;  %v6481_v5 = vld [vmem:[#allocation7 + $0x28] sm:$0xff] }
 0x74d   :  { %3569 = vmatpush.msrb.mxu2 %v6171_v43  ;;  %v4876_v43 = vmul.f32 -1.442695, %v3089_v0  ;;  %v6484_v48 = vld [vmem:[#allocation13 + $0x28] sm:$0xff] }
 0x74e   :  { %v3209_v33 = vadd.f32 %v6815_v10, %v3207_v15  ;;  %v6487_v15 = vld [vmem:[#allocation7 + $0x20] sm:$0xff] }
 0x74f   :  { %5134 = vpow2.f32 %v4876_v43 }
 0x752   :  { %4893 = vmatmul.msk.f32.vlgmr.msra.gmra.mxu2 %vm146_vm0, %v2948_v52 }
 0x753   :  { %3680 = vmatpush.msra.mxu2 %v6414_v63 }
 0x755   :  { %3681 = vmatpush.msra.mxu2 %v6417_v32  ;;  %v5135_v7 = vpop.eup %5134 }
 0x756   :  { %v3093_v29 = vadd.f32 1.0, %v5135_v7 }
 0x758   :  { %5136 = vrcp.f32 %v3093_v29  ;;  %v3105_v52 = vand.u32 2147483648, %v3093_v29  ;;  %vm3099_vm2 = vweird.f32 %v3093_v29  ;;  %v3103_v21 = vand.u32 2147483647, %v3093_v29 }
 0x75a   :  { %v3106_v43 = vor.u32 1.1754944e-38, %v3105_v52  ;;  %vm3104_vm5 = vcmp.eq.f32.partialorder %v3103_v21, 8.507059e+37 }
 0x75e   :  { %v5137_v25 = vpop.eup %5136 }
 0x75f   :  { %v3095_v61 = vmul.f32 %v5137_v25, %v3093_v29  ;;  %vm3100_vm1 = vweird.f32 %v5137_v25 }
 0x760   :  { %vm3101_vm3 = vmor %vm3099_vm2, %vm3100_vm1 }
 0x761   :  { %v3096_v45 = vsub.f32 1.0, %v3095_v61 }
 0x763   :  { %v3097_v58 = vmul.f32 %v5137_v25, %v3096_v45  ;;  %v6474_v45 = vld [vmem:[#allocation7 + $0x10] sm:$0xff] }
 0x765   :  { %v3098_v53 = vadd.f32 %v5137_v25, %v3097_v58  ;;  %v6490_v58 = vld [vmem:[#allocation13 + $0x20] sm:$0xff] }
 0x767   :  { %v3102_v19 = vsel %vm3101_vm3, %v5137_v25, %v3098_v53  ;;  %v6508_v53 = vld [vmem:[#allocation12 + $0x20] sm:$0xff] }
 0x768   :  { %v3107_v41 = vsel %vm3104_vm5, %v3106_v43, %v3102_v19 }
 0x7ac   :  { %v3038_v31 = vpop.f32.mrf.mxu3 }
 0x7b4   :  { %v3146_v27 = vpop.f32.mrf.mxu3 }
 0x7b5   :  { %v3014_v18 = vpop.f32.mrf.mxu2 }
 0x7b6   :  { %v3017_v34 = vadd.f32 %v3014_v18, %v2993_v30 }
 0x7b8   :  { %v3041_v62 = vadd.f32 %v3038_v31, %v3017_v34 }
 0x7ba   :  { %3043 = vst [vmem:[#allocation16 + $0x20] sm:$0xff] %v3041_v62 }
 0x7bc   :  { %v3248_v51 = vpop.f32.mrf.mxu3 }
 0x7bd   :  { %v3126_v40 = vpop.f32.mrf.mxu2 }
 0x7be   :  { %v3147_v20 = vadd.f32 %v3146_v27, %v3126_v40 }
 0x7c0   :  { %v3149_v36 = vadd.f32 %v6424_v22, %v3147_v20 }
 0x7c2   :  { %v4879_v3 = vmul.f32 -1.442695, %v3149_v36 }
 0x7c4   :  { %5138 = vpow2.f32 %v4879_v3 }
 0x7c5   :  { %v3228_v8 = vpop.f32.mrf.mxu2 }
 0x7c6   :  { %v3249_v47 = vadd.f32 %v3248_v51, %v3228_v8 }
 0x7c8   :  { %v3251_v49 = vadd.f32 %v6427_v46, %v3249_v47 }
 0x7ca   :  { %v5139_v23 = vpop.eup %5138  ;;  %v4884_v1 = vmul.f32 -1.442695, %v3251_v49 }
 0x7cb   :  { %v3153_v57 = vadd.f32 1.0, %v5139_v23 }
 0x7cc   :  { %5140 = vpow2.f32 %v4884_v1  ;;  %v6449_v1 = vld [vmem:[#allocation9 + $0x20] sm:$0xff] }
 0x7cd   :  { %5142 = vrcp.f32 %v3153_v57  ;;  %v3165_v54 = vand.u32 2147483648, %v3153_v57  ;;  %v3163_v0 = vand.u32 2147483647, %v3153_v57  ;;  %vm3159_vm6 = vweird.f32 %v3153_v57 }
 0x7cf   :  { %v3166_v30 = vor.u32 1.1754944e-38, %v3165_v54  ;;  %vm3164_vm8 = vcmp.eq.f32.partialorder %v3163_v0, 8.507059e+37  ;;  %v3356_v54 = vpop.f32.mrf.mxu2 }
 0x7d2   :  { %v5141_v9 = vpop.eup %5140 }
 0x7d3   :  { %v5143_v4 = vpop.eup %5142  ;;  %v3255_v2 = vadd.f32 1.0, %v5141_v9  ;;  %v6493_v9 = vld [vmem:[#allocation4 + $0x30] sm:$0xff] }
 0x7d4   :  { %v3155_v39 = vmul.f32 %v5143_v4, %v3153_v57  ;;  %vm3160_vm4 = vweird.f32 %v5143_v4  ;;  %v6471_v57 = vld [vmem:[#allocation13] sm:$0xff] }
 0x7d5   :  { %5144 = vrcp.f32 %v3255_v2  ;;  %vm3161_vm7 = vmor %vm3159_vm6, %vm3160_vm4  ;;  %v3267_v51 = vand.u32 2147483648, %v3255_v2  ;;  %vm3261_vm10 = vweird.f32 %v3255_v2  ;;  %v3265_v25 = vand.u32 2147483647, %v3255_v2 }
 0x7d6   :  { %v3156_v50 = vsub.f32 1.0, %v3155_v39  ;;  %5146 = vtanh.f32 %v3209_v33  ;;  %v6500_v33 = vld [vmem:[#allocation12] sm:$0xff]  ;;  %v3293_v39 = vpop.f32.mrf.mxu0 }
 0x7d7   :  { %v3268_v47 = vor.u32 1.1754944e-38, %v3267_v51  ;;  %vm3266_vm12 = vcmp.eq.f32.partialorder %v3265_v25, 8.507059e+37 }
 0x7d8   :  { %v3157_v59 = vmul.f32 %v5143_v4, %v3156_v50 }
 0x7da   :  { %v3158_v31 = vadd.f32 %v5143_v4, %v3157_v59 }
 0x7db   :  { %v5145_v10 = vpop.eup %5144 }
 0x7dc   :  { %v3162_v18 = vsel %vm3161_vm7, %v5143_v4, %v3158_v31  ;;  %v3257_v34 = vmul.f32 %v5145_v10, %v3255_v2  ;;  %v5147_v7 = vpop.eup %5146  ;;  %vm3262_vm9 = vweird.f32 %v5145_v10  ;;  %v6497_v4 = vld [vmem:[#allocation12 + $0x8] sm:$0xff] }
 0x7dd   :  { %v3167_v62 = vsel %vm3164_vm8, %v3166_v30, %v3162_v18  ;;  %v3272_v27 = vmul.f32 %v5147_v7, %v3107_v41  ;;  %vm3263_vm11 = vmor %vm3261_vm10, %vm3262_vm9  ;;  %v6505_v2 = vld [vmem:[#allocation12 + $0x28] sm:$0xff]  ;;  %v3458_v41 = vpop.f32.mrf.mxu2 }
 0x7de   :  { %v3271_v29 = vmul.f32 %v3167_v62, %v6314_v44  ;;  %v3258_v40 = vsub.f32 1.0, %v3257_v34  ;;  %v6444_v44 = vld [vmem:[#allocation9 + $0x28] sm:$0xff] }
 0x7e0   :  { %v6432_v20 = vadd.f32 %v3272_v27, %v3271_v29  ;;  %v3259_v36 = vmul.f32 %v5145_v10, %v3258_v40 }
 0x7e2   :  { %5148 = vtanh.f32 %v6432_v20  ;;  %v3260_v3 = vadd.f32 %v5145_v10, %v3259_v36  ;;  %v3416_v36 = vpop.f32.mrf.mxu0 }
 0x7e4   :  { %v3264_v8 = vsel %vm3263_vm11, %v5145_v10, %v3260_v3 }
 0x7e5   :  { %v3269_v49 = vsel %vm3266_vm12, %v3268_v47, %v3264_v8 }
 0x7e8   :  { %v5149_v61 = vpop.eup %5148 }
 0x7e9   :  { %v6435_v23 = vmul.f32 %v5149_v61, %v3269_v49 }
 0x7eb   :  { %4886 = vmatmul.msk.f32.vlgmr.msrb.gmra.mxu1 %vm146_vm0, %v6435_v23  ;;  %4889 = vmatmul.msk.f32.vlgmr.msrb.gmra.mxu3 %vm146_vm0, %v6435_v23 }
 0x7ec   :  { %4896 = vmatmul.msk.f32.vlgmr.msrb.gmra.mxu0 %vm146_vm0, %v6435_v23  ;;  %3544 = vmatpush.msrb.mxu1 %v6196_v6  ;;  %v6459_v6 = vld [vmem:[#allocation7 + $0x8] sm:$0xff] }
 0x7ed   :  { %3740 = vmatpush.msrb.mxu0 %v6444_v44  ;;  %3592 = vmatpush.msrb.mxu3 %v6200_v17  ;;  %v6462_v17 = vld [vmem:[#allocation13 + $0x8] sm:$0xff] }
 0x7ee   :  { %3545 = vmatpush.msrb.mxu1 %v6203_v38  ;;  %v6465_v38 = vld [vmem:[#allocation7 + $0x18] sm:$0xff] }
 0x7ef   :  { %3741 = vmatpush.msrb.mxu0 %v6449_v1  ;;  %3593 = vmatpush.msrb.mxu3 %v6207_v56  ;;  %v6468_v56 = vld [vmem:[#allocation7] sm:$0xff] }
 0x7f3   :  { %4892 = vmatmul.msk.f32.vlgmr.msra.gmra.mxu1 %vm146_vm0, %v6435_v23  ;;  %4894 = vmatmul.msk.f32.vlgmr.msra.gmra.mxu3 %vm146_vm0, %v6435_v23 }
 0x7f4   :  { %4900 = vmatmul.msk.f32.vlgmr.msra.gmra.mxu0 %vm146_vm0, %v6435_v23  ;;  %3640 = vmatpush.msra.mxu1 %v6459_v6 }
 0x7f5   :  { %3847 = vmatpush.msra.mxu0 %v6462_v17  ;;  %3700 = vmatpush.msra.mxu3 %v6465_v38 }
 0x7f6   :  { %3641 = vmatpush.msra.mxu1 %v6468_v56 }
 0x7f7   :  { %3848 = vmatpush.msra.mxu0 %v6471_v57  ;;  %3701 = vmatpush.msra.mxu3 %v6474_v45 }
 0x7fb   :  { %4897 = vmatmul.msk.f32.vlgmr.msrb.gmra.mxu1 %vm146_vm0, %v6432_v20 }
 0x7fc   :  { %4906 = vmatmul.msk.f32.vlgmr.msrb.gmra.mxu0 %vm146_vm0, %v6435_v23  ;;  %3760 = vmatpush.msrb.mxu1 %v6481_v5 }
 0x7fd   :  { %3970 = vmatpush.msrb.mxu0 %v6484_v48 }
 0x7fe   :  { %3761 = vmatpush.msrb.mxu1 %v6487_v15 }
 0x7ff   :  { %3971 = vmatpush.msrb.mxu0 %v6490_v58 }
 0x803   :  { %4901 = vmatmul.msk.f32.vlgmr.msra.gmra.mxu1 %vm146_vm0, %v6493_v9 }
 0x804   :  { %3870 = vmatpush.msra.mxu1 %v6497_v4 }
 0x806   :  { %3871 = vmatpush.msra.mxu1 %v6500_v33 }
 0x80b   :  { %4907 = vmatmul.msk.f32.vlgmr.msrb.gmra.mxu1 %vm146_vm0, %v6493_v9 }
 0x80c   :  { %3990 = vmatpush.msrb.mxu1 %v6505_v2 }
 0x80e   :  { %3991 = vmatpush.msrb.mxu1 %v6508_v53 }
 0x868   :  { %v3316_v52 = vpop.f32.mrf.mxu1 }
 0x869   :  { %v3317_v21 = vadd.f32 %v3316_v52, %v3293_v39 }
 0x86b   :  { %v3319_v50 = vadd.f32 %v6823_v24, %v3317_v21 }
 0x86d   :  { %v4887_v19 = vmul.f32 -1.442695, %v3319_v50 }
 0x86e   :  { %v3376_v59 = vpop.f32.mrf.mxu3 }
 0x86f   :  { %5150 = vpow2.f32 %v4887_v19  ;;  %v3377_v0 = vadd.f32 %v3376_v59, %v3356_v54 }
 0x870   :  { %v3436_v29 = vpop.f32.mrf.mxu1 }
 0x871   :  { %v3379_v43 = vadd.f32 %v6824_v13, %v3377_v0  ;;  %v3437_v13 = vadd.f32 %v3436_v29, %v3416_v36 }
 0x873   :  { %v4890_v31 = vmul.f32 -1.442695, %v3379_v43  ;;  %v3439_v61 = vadd.f32 %v6826_v55, %v3437_v13 }
 0x875   :  { %v5151_v10 = vpop.eup %5150  ;;  %5152 = vpow2.f32 %v4890_v31 }
 0x876   :  { %v3323_v30 = vadd.f32 1.0, %v5151_v10  ;;  %v3478_v18 = vpop.f32.mrf.mxu3 }
 0x877   :  { %v3479_v34 = vadd.f32 %v3478_v18, %v3458_v41 }
 0x878   :  { %5154 = vrcp.f32 %v3323_v30  ;;  %vm3329_vm14 = vweird.f32 %v3323_v30  ;;  %v3333_v50 = vand.u32 2147483647, %v3323_v30 }
 0x879   :  { %v3481_v7 = vadd.f32 %v6825_v37, %v3479_v34  ;;  %v3335_v37 = vand.u32 2147483648, %v3323_v30 }
 0x87a   :  { %vm3334_vm3 = vcmp.eq.f32.partialorder %v3333_v50, 8.507059e+37  ;;  %v6553_v50 = vld [vmem:[#allocation13 + $0x10] sm:$0xff] }
 0x87b   :  { %v5153_v62 = vpop.eup %5152  ;;  %v4895_v27 = vmul.f32 -1.442695, %v3481_v7  ;;  %v3336_v43 = vor.u32 1.1754944e-38, %v3335_v37  ;;  %v6546_v37 = vld [vmem:[#allocation13 + $0x18] sm:$0xff] }
 0x87c   :  { %v3383_v24 = vadd.f32 1.0, %v5153_v62 }
 0x87d   :  { %5156 = vpow2.f32 %v4895_v27 }
 0x87e   :  { %v5155_v40 = vpop.eup %5154  ;;  %5158 = vrcp.f32 %v3383_v24  ;;  %v3395_v54 = vand.u32 2147483648, %v3383_v24  ;;  %v3393_v0 = vand.u32 2147483647, %v3383_v24  ;;  %vm3389_vm2 = vweird.f32 %v3383_v24 }
 0x87f   :  { %v3325_v3 = vmul.f32 %v5155_v40, %v3323_v30  ;;  %vm3330_vm13 = vweird.f32 %v5155_v40 }
 0x880   :  { %vm3331_vm15 = vmor %vm3329_vm14, %vm3330_vm13  ;;  %v3396_v10 = vor.u32 1.1754944e-38, %v3395_v54  ;;  %vm3394_vm5 = vcmp.eq.f32.partialorder %v3393_v0, 8.507059e+37  ;;  %v6562_v54 = vld [vmem:[#allocation13 + $0x38] sm:$0xff] }
 0x881   :  { %v3326_v51 = vsub.f32 1.0, %v3325_v3 }
 0x883   :  { %v5157_v25 = vpop.eup %5156  ;;  %v3327_v8 = vmul.f32 %v5155_v40, %v3326_v51 }
 0x884   :  { %v5159_v47 = vpop.eup %5158  ;;  %v3485_v49 = vadd.f32 1.0, %v5157_v25 }
 0x885   :  { %v3385_v39 = vmul.f32 %v5159_v47, %v3383_v24  ;;  %v3328_v52 = vadd.f32 %v5155_v40, %v3327_v8  ;;  %vm3390_vm1 = vweird.f32 %v5159_v47 }
 0x886   :  { %5160 = vrcp.f32 %v3485_v49  ;;  %vm3391_vm4 = vmor %vm3389_vm2, %vm3390_vm1  ;;  %v3497_v3 = vand.u32 2147483648, %v3485_v49  ;;  %vm3491_vm7 = vweird.f32 %v3485_v49  ;;  %v3495_v13 = vand.u32 2147483647, %v3485_v49 }
 0x887   :  { %v3386_v21 = vsub.f32 1.0, %v3385_v39  ;;  %5162 = vtanh.f32 %v3439_v61  ;;  %v3332_v59 = vsel %vm3331_vm15, %v5155_v40, %v3328_v52  ;;  %v6528_v61 = vld [vmem:[#allocation12 + $0x18] sm:$0xff]  ;;  %v6535_v39 = vld [vmem:[#allocation12 + $0x10] sm:$0xff]  ;;  %v6538_v52 = vld [vmem:[#allocation15] sm:$0xff] }
 0x888   :  { %v3337_v41 = vsel %vm3334_vm3, %v3336_v43, %v3332_v59  ;;  %vm3496_vm9 = vcmp.eq.f32.partialorder %v3495_v13, 8.507059e+37  ;;  %v6572_v59 = vld [vmem:[#allocation15 + $0x20] sm:$0xff] }
 0x889   :  { %v3387_v19 = vmul.f32 %v5159_v47, %v3386_v21  ;;  %v6549_v21 = vld [vmem:[#allocation12 + $0x38] sm:$0xff] }
 0x88b   :  { %v3388_v55 = vadd.f32 %v5159_v47, %v3387_v19  ;;  %v6565_v19 = vld [vmem:[#allocation13 + $0x30] sm:$0xff] }
 0x88c   :  { %v5161_v31 = vpop.eup %5160 }
 0x88d   :  { %v3392_v18 = vsel %vm3391_vm4, %v5159_v47, %v3388_v55  ;;  %v3487_v34 = vmul.f32 %v5161_v31, %v3485_v49  ;;  %v5163_v7 = vpop.eup %5162  ;;  %vm3492_vm6 = vweird.f32 %v5161_v31  ;;  %v6531_v49 = vld [vmem:[#allocation15 + $0x8] sm:$0xff] }
 0x88e   :  { %v3397_v30 = vsel %vm3394_vm5, %v3396_v10, %v3392_v18  ;;  %v3502_v27 = vmul.f32 %v5163_v7, %v3337_v41  ;;  %vm3493_vm8 = vmor %vm3491_vm7, %vm3492_vm6 }
 0x88f   :  { %v3501_v62 = vmul.f32 %v3397_v30, %v6366_v35  ;;  %v3488_v29 = vsub.f32 1.0, %v3487_v34  ;;  %v3498_v35 = vor.u32 1.1754944e-38, %v3497_v3 }
 0x891   :  { %v6516_v36 = vadd.f32 %v3502_v27, %v3501_v62  ;;  %v3489_v40 = vmul.f32 %v5161_v31, %v3488_v29 }
 0x893   :  { %5164 = vtanh.f32 %v6516_v36  ;;  %v3490_v24 = vadd.f32 %v5161_v31, %v3489_v40  ;;  %4899 = vmatmul.msk.f32.vlgmr.msrb.gmra.mxu3 %vm146_vm0, %v6516_v36 }
 0x894   :  { %3802 = vmatpush.msrb.mxu3 %v6371_v28 }
 0x895   :  { %v3494_v51 = vsel %vm3493_vm8, %v5161_v31, %v3490_v24 }
 0x896   :  { %3803 = vmatpush.msrb.mxu3 %v6374_v11  ;;  %v3499_v8 = vsel %vm3496_vm9, %v3498_v35, %v3494_v51 }
 0x899   :  { %v5165_v25 = vpop.eup %5164 }
 0x89a   :  { %v3505_v47 = vmul.f32 %v5165_v25, %v3499_v8 }
 0x89b   :  { %4904 = vmatmul.msk.f32.vlgmr.msra.gmra.mxu3 %vm146_vm0, %v6493_v9 }
 0x89c   :  { %4898 = vmatmul.msk.f32.vlgmr.msrb.gmra.mxu2 %vm146_vm0, %v3505_v47  ;;  %4911 = vmatmul.msk.f32.vlgmr.msra.gmra.mxu0 %vm146_vm0, %v3505_v47 }
 0x89d   :  { %3782 = vmatpush.msrb.mxu2 %v6381_v26  ;;  %3930 = vmatpush.msra.mxu3 %v6528_v61 }
 0x89e   :  { %4077 = vmatpush.msra.mxu0 %v6531_v49 }
 0x89f   :  { %3783 = vmatpush.msrb.mxu2 %v6386_v16  ;;  %3931 = vmatpush.msra.mxu3 %v6535_v39 }
 0x8a0   :  { %4078 = vmatpush.msra.mxu0 %v6538_v52 }
 0x8a3   :  { %4909 = vmatmul.msk.f32.vlgmr.msrb.gmra.mxu3 %vm146_vm0, %v6493_v9  ;;  %v6556_v9 = vld [vmem:[#allocation12 + $0x30] sm:$0xff] }
 0x8a4   :  { %4903 = vmatmul.msk.f32.vlgmr.msra.gmra.mxu2 %vm146_vm0, %v6435_v23  ;;  %4917 = vmatmul.msk.f32.vlgmr.msrb.gmra.mxu0 %vm146_vm0, %v3505_v47 }
 0x8a5   :  { %3910 = vmatpush.msra.mxu2 %v6546_v37  ;;  %4032 = vmatpush.msrb.mxu3 %v6549_v21 }
 0x8a6   :  { %4174 = vmatpush.msrb.mxu0 %v6398_v12  ;;  %v6569_v12 = vld [vmem:[#allocation15 + $0x28] sm:$0xff] }
 0x8a7   :  { %3911 = vmatpush.msra.mxu2 %v6553_v50  ;;  %4033 = vmatpush.msrb.mxu3 %v6556_v9 }
 0x8a8   :  { %4175 = vmatpush.msrb.mxu0 %v6403_v14  ;;  %v3547_v14 = vpop.f32.mrf.mxu1 }
 0x8ac   :  { %4908 = vmatmul.msk.f32.vlgmr.msrb.gmra.mxu2 %vm146_vm0, %v6435_v23  ;;  %v3523_v23 = vpop.f32.mrf.mxu0 }
 0x8ad   :  { %4012 = vmatpush.msrb.mxu2 %v6562_v54  ;;  %v3526_v18 = vadd.f32 %v6307_v42, %v3523_v23 }
 0x8af   :  { %4013 = vmatpush.msrb.mxu2 %v6565_v19  ;;  %v3550_v34 = vadd.f32 %v3547_v14, %v3526_v18 }
 0x8b0   :  { %v3643_v0 = vpop.f32.mrf.mxu1 }
 0x8b4   :  { %4914 = vmatmul.msk.f32.vlgmr.msra.gmra.mxu2 %vm146_vm0, %v3505_v47  ;;  %v3620_v43 = vpop.f32.mrf.mxu0 }
 0x8b5   :  { %4125 = vmatpush.msra.mxu2 %v6569_v12  ;;  %v3644_v55 = vadd.f32 %v3643_v0, %v3620_v43 }
 0x8b7   :  { %4126 = vmatpush.msra.mxu2 %v6572_v59  ;;  %v3646_v31 = vadd.f32 %v6420_v60, %v3644_v55 }
 0x8b8   :  { %v3763_v43 = vpop.f32.mrf.mxu1 }
 0x8b9   :  { %v4902_v10 = vmul.f32 -1.442695, %v3646_v31 }
 0x8bb   :  { %5166 = vpow2.f32 %v4902_v10 }
 0x8bc   :  { %4919 = vmatmul.msk.f32.vlgmr.msrb.gmra.mxu2 %vm146_vm0, %v3505_v47  ;;  %v3743_v55 = vpop.f32.mrf.mxu0 }
 0x8bd   :  { %4237 = vmatpush.msrb.mxu2 %v6414_v63  ;;  %v3764_v31 = vadd.f32 %v3763_v43, %v3743_v55 }
 0x8bf   :  { %4238 = vmatpush.msrb.mxu2 %v6417_v32 }
 0x8c1   :  { %v5167_v62 = vpop.eup %5166 }
 0x8c2   :  { %v3650_v32 = vadd.f32 1.0, %v5167_v62 }
 0x8c4   :  { %5168 = vrcp.f32 %v3650_v32  ;;  %vm3656_vm11 = vweird.f32 %v3650_v32 }
 0x8ca   :  { %v5169_v51 = vpop.eup %5168 }
 0x8cb   :  { %v3652_v25 = vmul.f32 %v5169_v51, %v3650_v32  ;;  %vm3657_vm10 = vweird.f32 %v5169_v51 }
 0x8cc   :  { %vm3658_vm12 = vmor %vm3656_vm11, %vm3657_vm10 }
 0x8cd   :  { %v3653_v0 = vsub.f32 1.0, %v3652_v25 }
 0x8cf   :  { %v3654_v10 = vmul.f32 %v5169_v51, %v3653_v0 }
 0x8d1   :  { %v3655_v62 = vadd.f32 %v5169_v51, %v3654_v10 }
 0x916   :  { %v3595_v41 = vpop.f32.mrf.mxu3 }
 0x91e   :  { %v3703_v63 = vpop.f32.mrf.mxu3 }
 0x91f   :  { %v3571_v7 = vpop.f32.mrf.mxu2 }
 0x920   :  { %v3574_v30 = vadd.f32 %v3571_v7, %v3550_v34  ;;  %v6582_v34 = vld [vmem:[#allocation10 + $0x2] ss:$0 sm:$0xff] }
 0x921   :  { %v3766_v7 = vadd.f32 %v6582_v34, %v3764_v31 }
 0x922   :  { %v3598_v27 = vadd.f32 %v3595_v41, %v3574_v30 }
 0x924   :  { %3600 = vst [vmem:[#allocation16 + $0x28] sm:$0xff] %v3598_v27 }
 0x926   :  { %v3805_v13 = vpop.f32.mrf.mxu3 }
 0x927   :  { %v3683_v29 = vpop.f32.mrf.mxu2 }
 0x928   :  { %v3704_v40 = vadd.f32 %v3703_v63, %v3683_v29  ;;  %v3662_v63 = vand.u32 2147483648, %v3650_v32  ;;  %v3660_v29 = vand.u32 2147483647, %v3650_v32 }
 0x92a   :  { %v3706_v24 = vadd.f32 %v6424_v22, %v3704_v40  ;;  %vm3661_vm14 = vcmp.eq.f32.partialorder %v3660_v29, 8.507059e+37 }
 0x92c   :  { %v4905_v3 = vmul.f32 -1.442695, %v3706_v24 }
 0x92e   :  { %5170 = vpow2.f32 %v4905_v3  ;;  %v3659_v3 = vsel %vm3658_vm12, %v5169_v51, %v3655_v62 }
 0x92f   :  { %v3785_v35 = vpop.f32.mrf.mxu2 }
 0x930   :  { %v3806_v42 = vadd.f32 %v3805_v13, %v3785_v35 }
 0x932   :  { %v3808_v8 = vadd.f32 %v6427_v46, %v3806_v42  ;;  %v3663_v42 = vor.u32 1.1754944e-38, %v3662_v63 }
 0x934   :  { %v5171_v47 = vpop.eup %5170  ;;  %v4910_v14 = vmul.f32 -1.442695, %v3808_v8 }
 0x935   :  { %v3710_v23 = vadd.f32 1.0, %v5171_v47  ;;  %v3664_v47 = vsel %vm3661_vm14, %v3663_v42, %v3659_v3  ;;  %v6604_v3 = vld [vmem:[#allocation15 + $0x10] sm:$0xff] }
 0x936   :  { %5172 = vpow2.f32 %v4910_v14 }
 0x937   :  { %5174 = vrcp.f32 %v3710_v23  ;;  %v3722_v24 = vand.u32 2147483648, %v3710_v23  ;;  %v3720_v35 = vand.u32 2147483647, %v3710_v23  ;;  %vm3716_vm15 = vweird.f32 %v3710_v23 }
 0x939   :  { %v3723_v14 = vor.u32 1.1754944e-38, %v3722_v24  ;;  %vm3721_vm2 = vcmp.eq.f32.partialorder %v3720_v35, 8.507059e+37 }
 0x93c   :  { %v5173_v41 = vpop.eup %5172 }
 0x93d   :  { %v5175_v18 = vpop.eup %5174  ;;  %v3812_v30 = vadd.f32 1.0, %v5173_v41 }
 0x93e   :  { %v3712_v27 = vmul.f32 %v5175_v18, %v3710_v23  ;;  %vm3717_vm13 = vweird.f32 %v5175_v18 }
 0x93f   :  { %5176 = vrcp.f32 %v3812_v30  ;;  %vm3718_vm1 = vmor %vm3716_vm15, %vm3717_vm13  ;;  %v3824_v62 = vand.u32 2147483648, %v3812_v30  ;;  %vm3818_vm4 = vweird.f32 %v3812_v30 }
 0x940   :  { %v3713_v40 = vsub.f32 1.0, %v3712_v27  ;;  %5178 = vtanh.f32 %v3766_v7  ;;  %v3822_v27 = vand.u32 2147483647, %v3812_v30 }
 0x941   :  { %v3825_v63 = vor.u32 1.1754944e-38, %v3824_v62 }
 0x942   :  { %v3714_v13 = vmul.f32 %v5175_v18, %v3713_v40  ;;  %vm3823_vm6 = vcmp.eq.f32.partialorder %v3822_v27, 8.507059e+37  ;;  %v6662_v27 = vld [vmem:[%s6745_s6 + $0x2] ss:$0 sm:$0xff] }
 0x944   :  { %v3715_v25 = vadd.f32 %v5175_v18, %v3714_v13  ;;  %v6608_v13 = vld [vmem:[#allocation15 + $0x30] sm:$0xff] }
 0x945   :  { %v5177_v8 = vpop.eup %5176 }
 0x946   :  { %v3719_v0 = vsel %vm3718_vm1, %v5175_v18, %v3715_v25  ;;  %v3814_v43 = vmul.f32 %v5177_v8, %v3812_v30  ;;  %v5179_v32 = vpop.eup %5178  ;;  %vm3819_vm3 = vweird.f32 %v5177_v8  ;;  %v6601_v30 = vld [vmem:[#allocation15 + $0x38] sm:$0xff] }
 0x947   :  { %v3724_v55 = vsel %vm3721_vm2, %v3723_v14, %v3719_v0  ;;  %v3829_v31 = vmul.f32 %v5179_v32, %v3664_v47  ;;  %vm3820_vm5 = vmor %vm3818_vm4, %vm3819_vm3  ;;  %v6656_v25 = vld [vmem:[%s6745_s6 + $0x3] ss:$0 sm:$0xff] }
 0x948   :  { %v3828_v10 = vmul.f32 %v3724_v55, %v6432_v20  ;;  %v3815_v51 = vsub.f32 1.0, %v3814_v43  ;;  %v6597_v20 = vld [vmem:[#allocation15 + $0x18] sm:$0xff] }
 0x94a   :  { %v6586_v41 = vadd.f32 %v3829_v31, %v3828_v10  ;;  %v3816_v7 = vmul.f32 %v5177_v8, %v3815_v51 }
 0x94c   :  { %5180 = vtanh.f32 %v6586_v41  ;;  %v3817_v23 = vadd.f32 %v5177_v8, %v3816_v7 }
 0x94e   :  { %v3821_v18 = vsel %vm3820_vm5, %v5177_v8, %v3817_v23 }
 0x94f   :  { %v3826_v40 = vsel %vm3823_vm6, %v3825_v63, %v3821_v18 }
 0x952   :  { %v5181_v29 = vpop.eup %5180 }
 0x953   :  { %v6589_v24 = vmul.f32 %v5181_v29, %v3826_v40 }
 0x955   :  { %4912 = vmatmul.msk.f32.vlgmr.msra.gmra.mxu1 %vm146_vm0, %v6589_v24  ;;  %4915 = vmatmul.msk.f32.vlgmr.msra.gmra.mxu3 %vm146_vm0, %v6589_v24 }
 0x956   :  { %4922 = vmatmul.msk.f32.vlgmr.msra.gmra.mxu0 %vm146_vm0, %v6589_v24  ;;  %4101 = vmatpush.msra.mxu1 %v6597_v20 }
 0x957   :  { %4297 = vmatpush.msra.mxu0 %v6444_v44  ;;  %4149 = vmatpush.msra.mxu3 %v6601_v30  ;;  %v6631_v44 = vld [vmem:[#allocation4 + $0x38] sm:$0xff] }
 0x958   :  { %4102 = vmatpush.msra.mxu1 %v6604_v3 }
 0x959   :  { %4298 = vmatpush.msra.mxu0 %v6449_v1  ;;  %4150 = vmatpush.msra.mxu3 %v6608_v13  ;;  %v3850_v1 = vpop.f32.mrf.mxu0 }
 0x95d   :  { %4918 = vmatmul.msk.f32.vlgmr.msrb.gmra.mxu1 %vm146_vm0, %v6589_v24  ;;  %4920 = vmatmul.msk.f32.vlgmr.msrb.gmra.mxu3 %vm146_vm0, %v6589_v24 }
 0x95e   :  { %4926 = vmatmul.msk.f32.vlgmr.msrb.gmra.mxu0 %vm146_vm0, %v6589_v24  ;;  %4197 = vmatpush.msrb.mxu1 %v6459_v6 }
 0x95f   :  { %4404 = vmatpush.msrb.mxu0 %v6462_v17  ;;  %4257 = vmatpush.msrb.mxu3 %v6465_v38  ;;  %v6644_v38 = vld [vmem:[%s6745_s6] ss:$0 sm:$0xff] }
 0x960   :  { %4198 = vmatpush.msrb.mxu1 %v6468_v56 }
 0x961   :  { %4405 = vmatpush.msrb.mxu0 %v6471_v57  ;;  %4258 = vmatpush.msrb.mxu3 %v6474_v45  ;;  %v3913_v57 = vpop.f32.mrf.mxu2  ;;  %v3973_v55 = vpop.f32.mrf.mxu0 }
 0x965   :  { %4923 = vmatmul.msk.f32.vlgmr.msra.gmra.mxu1 %vm146_vm0, %v6586_v41 }
 0x966   :  { %4932 = vmatmul.msk.f32.vlgmr.msra.gmra.mxu0 %vm146_vm0, %v6589_v24  ;;  %4317 = vmatpush.msra.mxu1 %v6481_v5 }
 0x967   :  { %4527 = vmatpush.msra.mxu0 %v6484_v48 }
 0x968   :  { %4318 = vmatpush.msra.mxu1 %v6487_v15  ;;  %v6650_v15 = vld [vmem:[%s6745_s6 + $0x1] ss:$0 sm:$0xff] }
 0x969   :  { %4528 = vmatpush.msra.mxu0 %v6490_v58 }
 0x96d   :  { %4927 = vmatmul.msk.f32.vlgmr.msrb.gmra.mxu1 %vm146_vm0, %v6631_v44 }
 0x96e   :  { %4427 = vmatpush.msrb.mxu1 %v6497_v4 }
 0x970   :  { %4428 = vmatpush.msrb.mxu1 %v6500_v33 }
 0x975   :  { %4933 = vmatmul.msk.f32.vlgmr.msra.gmra.mxu1 %vm146_vm0, %v6631_v44 }
 0x976   :  { %4547 = vmatpush.msra.mxu1 %v6505_v2  ;;  %v4015_v2 = vpop.f32.mrf.mxu2 }
 0x978   :  { %4548 = vmatpush.msra.mxu1 %v6508_v53 }
 0x9d2   :  { %v3873_v6 = vpop.f32.mrf.mxu1 }
 0x9d3   :  { %v3874_v17 = vadd.f32 %v3873_v6, %v3850_v1 }
 0x9d5   :  { %v3876_v56 = vadd.f32 %v6644_v38, %v3874_v17 }
 0x9d7   :  { %v4913_v45 = vmul.f32 -1.442695, %v3876_v56 }
 0x9d8   :  { %v3933_v5 = vpop.f32.mrf.mxu3 }
 0x9d9   :  { %5182 = vpow2.f32 %v4913_v45  ;;  %v3934_v48 = vadd.f32 %v3933_v5, %v3913_v57 }
 0x9da   :  { %v3993_v43 = vpop.f32.mrf.mxu1 }
 0x9db   :  { %v3936_v58 = vadd.f32 %v6650_v15, %v3934_v48  ;;  %v3994_v10 = vadd.f32 %v3993_v43, %v3973_v55 }
 0x9dd   :  { %v4916_v4 = vmul.f32 -1.442695, %v3936_v58  ;;  %v3996_v18 = vadd.f32 %v6662_v27, %v3994_v10 }
 0x9df   :  { %v5183_v33 = vpop.eup %5182  ;;  %5184 = vpow2.f32 %v4916_v4 }
 0x9e0   :  { %v3880_v53 = vadd.f32 1.0, %v5183_v33  ;;  %v4035_v35 = vpop.f32.mrf.mxu3 }
 0x9e1   :  { %v4036_v42 = vadd.f32 %v4035_v35, %v4015_v2 }
 0x9e2   :  { %5186 = vrcp.f32 %v3880_v53  ;;  %v3892_v1 = vand.u32 2147483648, %v3880_v53  ;;  %vm3886_vm8 = vweird.f32 %v3880_v53  ;;  %v3890_v17 = vand.u32 2147483647, %v3880_v53 }
 0x9e3   :  { %v4038_v8 = vadd.f32 %v6656_v25, %v4036_v42 }
 0x9e4   :  { %v3893_v48 = vor.u32 1.1754944e-38, %v3892_v1  ;;  %vm3891_vm12 = vcmp.eq.f32.partialorder %v3890_v17, 8.507059e+37 }
 0x9e5   :  { %v5185_v47 = vpop.eup %5184  ;;  %v4921_v14 = vmul.f32 -1.442695, %v4038_v8 }
 0x9e6   :  { %v3940_v0 = vadd.f32 1.0, %v5185_v47 }
 0x9e7   :  { %5188 = vpow2.f32 %v4921_v14 }
 0x9e8   :  { %v5187_v32 = vpop.eup %5186  ;;  %5190 = vrcp.f32 %v3940_v0  ;;  %v3952_v56 = vand.u32 2147483648, %v3940_v0  ;;  %v3950_v5 = vand.u32 2147483647, %v3940_v0  ;;  %vm3946_vm11 = vweird.f32 %v3940_v0 }
 0x9e9   :  { %v3882_v31 = vmul.f32 %v5187_v32, %v3880_v53  ;;  %vm3887_vm7 = vweird.f32 %v5187_v32 }
 0x9ea   :  { %vm3888_vm9 = vmor %vm3886_vm8, %vm3887_vm7  ;;  %v3953_v33 = vor.u32 1.1754944e-38, %v3952_v56  ;;  %vm3951_vm14 = vcmp.eq.f32.partialorder %v3950_v5, 8.507059e+37 }
 0x9eb   :  { %v3883_v51 = vsub.f32 1.0, %v3882_v31 }
 0x9ed   :  { %v5189_v7 = vpop.eup %5188  ;;  %v3884_v23 = vmul.f32 %v5187_v32, %v3883_v51 }
 0x9ee   :  { %v5191_v62 = vpop.eup %5190  ;;  %v4042_v63 = vadd.f32 1.0, %v5189_v7 }
 0x9ef   :  { %v3942_v29 = vmul.f32 %v5191_v62, %v3940_v0  ;;  %v3885_v40 = vadd.f32 %v5187_v32, %v3884_v23  ;;  %vm3947_vm10 = vweird.f32 %v5191_v62 }
 0x9f0   :  { %5192 = vrcp.f32 %v4042_v63  ;;  %vm3948_vm13 = vmor %vm3946_vm11, %vm3947_vm10  ;;  %v4054_v31 = vand.u32 2147483648, %v4042_v63  ;;  %vm4048_vm1 = vweird.f32 %v4042_v63  ;;  %v4052_v10 = vand.u32 2147483647, %v4042_v63 }
 0x9f1   :  { %v3943_v6 = vsub.f32 1.0, %v3942_v29  ;;  %5194 = vtanh.f32 %v3996_v18  ;;  %v3889_v45 = vsel %vm3888_vm9, %v5187_v32, %v3885_v40 }
 0x9f2   :  { %v3894_v2 = vsel %vm3891_vm12, %v3893_v48, %v3889_v45  ;;  %vm4053_vm3 = vcmp.eq.f32.partialorder %v4052_v10, 8.507059e+37 }
 0x9f3   :  { %v3944_v57 = vmul.f32 %v5191_v62, %v3943_v6 }
 0x9f5   :  { %v3945_v58 = vadd.f32 %v5191_v62, %v3944_v57 }
 0x9f6   :  { %v5193_v4 = vpop.eup %5192 }
 0x9f7   :  { %v3949_v35 = vsel %vm3948_vm13, %v5191_v62, %v3945_v58  ;;  %v4044_v42 = vmul.f32 %v5193_v4, %v4042_v63  ;;  %v5195_v8 = vpop.eup %5194  ;;  %vm4049_vm15 = vweird.f32 %v5193_v4 }
 0x9f8   :  { %v3954_v53 = vsel %vm3951_vm14, %v3953_v33, %v3949_v35  ;;  %v4059_v14 = vmul.f32 %v5195_v8, %v3894_v2  ;;  %vm4050_vm2 = vmor %vm4048_vm1, %vm4049_vm15 }
 0x9f9   :  { %v4058_v47 = vmul.f32 %v3954_v53, %v6516_v36  ;;  %v4045_v43 = vsub.f32 1.0, %v4044_v42  ;;  %v4055_v36 = vor.u32 1.1754944e-38, %v4054_v31 }
 0x9fb   :  { %v6666_v55 = vadd.f32 %v4059_v14, %v4058_v47  ;;  %v4046_v32 = vmul.f32 %v5193_v4, %v4045_v43 }
 0x9fd   :  { %5196 = vtanh.f32 %v6666_v55  ;;  %v4047_v0 = vadd.f32 %v5193_v4, %v4046_v32  ;;  %4925 = vmatmul.msk.f32.vlgmr.msra.gmra.mxu3 %vm146_vm0, %v6666_v55 }
 0x9fe   :  { %4359 = vmatpush.msra.mxu3 %v6371_v28  ;;  %v4104_v28 = vpop.f32.mrf.mxu1 }
 0x9ff   :  { %v4051_v51 = vsel %vm4050_vm2, %v5193_v4, %v4047_v0 }
 0xa00   :  { %4360 = vmatpush.msra.mxu3 %v6374_v11  ;;  %v4056_v23 = vsel %vm4053_vm3, %v4055_v36, %v4051_v51  ;;  %v4080_v11 = vpop.f32.mrf.mxu0 }
 0xa03   :  { %v5197_v7 = vpop.eup %5196 }
 0xa04   :  { %v4062_v62 = vmul.f32 %v5197_v7, %v4056_v23 }
 0xa05   :  { %4930 = vmatmul.msk.f32.vlgmr.msrb.gmra.mxu3 %vm146_vm0, %v6631_v44 }
 0xa06   :  { %4924 = vmatmul.msk.f32.vlgmr.msra.gmra.mxu2 %vm146_vm0, %v4062_v62  ;;  %4937 = vmatmul.msk.f32.vlgmr.msrb.gmra.mxu0 %vm146_vm0, %v4062_v62 }
 0xa07   :  { %4339 = vmatpush.msra.mxu2 %v6381_v26  ;;  %4487 = vmatpush.msrb.mxu3 %v6528_v61  ;;  %v4200_v26 = vpop.f32.mrf.mxu1 }
 0xa08   :  { %4634 = vmatpush.msrb.mxu0 %v6531_v49 }
 0xa09   :  { %4340 = vmatpush.msra.mxu2 %v6386_v16  ;;  %4488 = vmatpush.msrb.mxu3 %v6535_v39  ;;  %v4177_v16 = vpop.f32.mrf.mxu0 }
 0xa0a   :  { %4635 = vmatpush.msrb.mxu0 %v6538_v52  ;;  %v4201_v61 = vadd.f32 %v4200_v26, %v4177_v16 }
 0xa0c   :  { %v4203_v49 = vadd.f32 %v6420_v60, %v4201_v61 }
 0xa0d   :  { %4935 = vmatmul.msk.f32.vlgmr.msra.gmra.mxu3 %vm146_vm0, %v6631_v44 }
 0xa0e   :  { %4929 = vmatmul.msk.f32.vlgmr.msrb.gmra.mxu2 %vm146_vm0, %v6589_v24  ;;  %4943 = vmatmul.msk.f32.vlgmr.msra.gmra.mxu0 %vm146_vm0, %v4062_v62  ;;  %v4928_v39 = vmul.f32 -1.442695, %v4203_v49 }
 0xa0f   :  { %4467 = vmatpush.msrb.mxu2 %v6546_v37  ;;  %4589 = vmatpush.msra.mxu3 %v6549_v21  ;;  %v6704_v37 = vld [vmem:[%s6747_s8] ss:$0 sm:$0xff]  ;;  %v4320_v58 = vpop.f32.mrf.mxu1  ;;  %s5542_s8 = smov [#allocation16]  }
 0xa10   :  { %v4083_v21 = vadd.f32 %v6704_v37, %v4080_v11  ;;  %5198 = vpow2.f32 %v4928_v39  ;;  %s4723_s24 = sshll.u32 %s5542_s8, 4  ;;  %s4724_s24 = int_to_ptr.vmem [resolvable:$true] %s4723_s24 }
 0xa11   :  { %4468 = vmatpush.msrb.mxu2 %v6553_v50  ;;  %4590 = vmatpush.msra.mxu3 %v6556_v9  ;;  %v4300_v4 = vpop.f32.mrf.mxu0 }
 0xa12   :  { %v4107_v50 = vadd.f32 %v4104_v28, %v4083_v21  ;;  %v4321_v33 = vadd.f32 %v4320_v58, %v4300_v4 }
 0xa14   :  { %v4323_v42 = vadd.f32 %v6582_v34, %v4321_v33 }
 0xa16   :  { %4934 = vmatmul.msk.f32.vlgmr.msra.gmra.mxu2 %vm146_vm0, %v6589_v24 }
 0xa17   :  { %4569 = vmatpush.msra.mxu2 %v6562_v54 }
 0xa19   :  { %4570 = vmatpush.msra.mxu2 %v6565_v19  ;;  %v5199_v19 = vpop.eup %5198 }
 0xa1a   :  { %v4207_v24 = vadd.f32 1.0, %v5199_v19 }
 0xa1c   :  { %5200 = vrcp.f32 %v4207_v24  ;;  %v4219_v14 = vand.u32 2147483648, %v4207_v24  ;;  %vm4213_vm5 = vweird.f32 %v4207_v24 }
 0xa1e   :  { %4940 = vmatmul.msk.f32.vlgmr.msrb.gmra.mxu2 %vm146_vm0, %v4062_v62  ;;  %v4220_v51 = vor.u32 1.1754944e-38, %v4219_v14 }
 0xa1f   :  { %4682 = vmatpush.msrb.mxu2 %v6569_v12 }
 0xa21   :  { %4683 = vmatpush.msrb.mxu2 %v6572_v59 }
 0xa22   :  { %v5201_v40 = vpop.eup %5200 }
 0xa23   :  { %v4209_v17 = vmul.f32 %v5201_v40, %v4207_v24  ;;  %vm4214_vm4 = vweird.f32 %v5201_v40 }
 0xa24   :  { %vm4215_vm6 = vmor %vm4213_vm5, %vm4214_vm4 }
 0xa25   :  { %v4210_v48 = vsub.f32 1.0, %v4209_v17 }
 0xa26   :  { %4945 = vmatmul.msk.f32.vlgmr.msra.gmra.mxu2 %vm146_vm0, %v4062_v62 }
 0xa27   :  { %v4211_v2 = vmul.f32 %v5201_v40, %v4210_v48 }
 0xa29   :  { %v4212_v53 = vadd.f32 %v5201_v40, %v4211_v2 }
 0xa2b   :  { %v4216_v0 = vsel %vm4215_vm6, %v5201_v40, %v4212_v53 }
 0xa80   :  { %v4152_v52 = vpop.f32.mrf.mxu3 }
 0xa88   :  { %v4260_v59 = vpop.f32.mrf.mxu3 }
 0xa89   :  { %v4128_v9 = vpop.f32.mrf.mxu2 }
 0xa8a   :  { %v4131_v54 = vadd.f32 %v4128_v9, %v4107_v50 }
 0xa8c   :  { %v4155_v12 = vadd.f32 %v4152_v52, %v4131_v54 }
 0xa8e   :  { %4157 = vst [vmem:[#allocation16 + $0x30] sm:$0xff] %v4155_v12 }
 0xa90   :  { %v4362_v29 = vpop.f32.mrf.mxu3 }
 0xa91   :  { %v4240_v44 = vpop.f32.mrf.mxu2 }
 0xa92   :  { %v4261_v60 = vadd.f32 %v4260_v59, %v4240_v44 }
 0xa94   :  { %v4263_v18 = vadd.f32 %v6424_v22, %v4261_v60 }
 0xa96   :  { %v4931_v63 = vmul.f32 -1.442695, %v4263_v18 }
 0xa98   :  { %5202 = vpow2.f32 %v4931_v63 }
 0xa99   :  { %v4342_v1 = vpop.f32.mrf.mxu2 }
 0xa9a   :  { %v4363_v6 = vadd.f32 %v4362_v29, %v4342_v1 }
 0xa9c   :  { %v4365_v56 = vadd.f32 %v6427_v46, %v4363_v6  ;;  %v4217_v46 = vand.u32 2147483647, %v4207_v24 }
 0xa9e   :  { %v5203_v57 = vpop.eup %5202  ;;  %v4936_v45 = vmul.f32 -1.442695, %v4365_v56  ;;  %vm4218_vm8 = vcmp.eq.f32.partialorder %v4217_v46, 8.507059e+37 }
 0xa9f   :  { %v4267_v5 = vadd.f32 1.0, %v5203_v57  ;;  %v4221_v7 = vsel %vm4218_vm8, %v4220_v51, %v4216_v0 }
 0xaa0   :  { %5204 = vpow2.f32 %v4936_v45 }
 0xaa1   :  { %5206 = vrcp.f32 %v4267_v5  ;;  %v4279_v32 = vand.u32 2147483648, %v4267_v5  ;;  %v4277_v10 = vand.u32 2147483647, %v4267_v5  ;;  %vm4273_vm9 = vweird.f32 %v4267_v5  ;;  %v4470_v63 = vpop.f32.mrf.mxu2 }
 0xaa3   :  { %v4280_v23 = vor.u32 1.1754944e-38, %v4279_v32  ;;  %vm4278_vm11 = vcmp.eq.f32.partialorder %v4277_v10, 8.507059e+37 }
 0xaa6   :  { %v5205_v22 = vpop.eup %5204 }
 0xaa7   :  { %v5207_v35 = vpop.eup %5206  ;;  %v4369_v8 = vadd.f32 1.0, %v5205_v22 }
 0xaa8   :  { %v4269_v47 = vmul.f32 %v5207_v35, %v4267_v5  ;;  %vm4274_vm7 = vweird.f32 %v5207_v35 }
 0xaa9   :  { %5208 = vrcp.f32 %v4369_v8  ;;  %vm4275_vm10 = vmor %vm4273_vm9, %vm4274_vm7  ;;  %v4381_v50 = vand.u32 2147483648, %v4369_v8  ;;  %vm4375_vm13 = vweird.f32 %v4369_v8  ;;  %v4379_v9 = vand.u32 2147483647, %v4369_v8  ;;  %v4572_v1 = vpop.f32.mrf.mxu2 }
 0xaaa   :  { %v4270_v43 = vsub.f32 1.0, %v4269_v47  ;;  %5210 = vtanh.f32 %v4323_v42 }
 0xaab   :  { %v4382_v19 = vor.u32 1.1754944e-38, %v4381_v50  ;;  %vm4380_vm15 = vcmp.eq.f32.partialorder %v4379_v9, 8.507059e+37 }
 0xaac   :  { %v4271_v31 = vmul.f32 %v5207_v35, %v4270_v43 }
 0xaae   :  { %v4272_v36 = vadd.f32 %v5207_v35, %v4271_v31 }
 0xaaf   :  { %v5209_v34 = vpop.eup %5208 }
 0xab0   :  { %v4276_v62 = vsel %vm4275_vm10, %v5207_v35, %v4272_v36  ;;  %v4371_v28 = vmul.f32 %v5209_v34, %v4369_v8  ;;  %v5211_v11 = vpop.eup %5210  ;;  %vm4376_vm12 = vweird.f32 %v5209_v34 }
 0xab1   :  { %v4281_v26 = vsel %vm4278_vm11, %v4280_v23, %v4276_v62  ;;  %v4386_v16 = vmul.f32 %v5211_v11, %v4221_v7  ;;  %vm4377_vm14 = vmor %vm4375_vm13, %vm4376_vm12 }
 0xab2   :  { %v4385_v61 = vmul.f32 %v4281_v26, %v6586_v41  ;;  %v4372_v49 = vsub.f32 1.0, %v4371_v28  ;;  %v4407_v41 = vpop.f32.mrf.mxu0 }
 0xab4   :  { %v4387_v39 = vadd.f32 %v4386_v16, %v4385_v61  ;;  %v4373_v52 = vmul.f32 %v5209_v34, %v4372_v49 }
 0xab6   :  { %4716 = vst.msk [vmem:[#allocation3] sm:$0xff] %vm146_vm0, %v4387_v39  ;;  %v4374_v21 = vadd.f32 %v5209_v34, %v4373_v52  ;;  %5212 = vtanh.f32 %v4387_v39 }
 0xab8   :  { %v4378_v54 = vsel %vm4377_vm14, %v5209_v34, %v4374_v21 }
 0xab9   :  { %v4383_v59 = vsel %vm4380_vm15, %v4382_v19, %v4378_v54 }
 0xaba   :  { %v4530_v4 = vpop.f32.mrf.mxu0 }
 0xabc   :  { %v5213_v12 = vpop.eup %5212 }
 0xabd   :  { %v4389_v24 = vmul.f32 %v5213_v12, %v4383_v59 }
 0xabf   :  { %4938 = vmatmul.msk.f32.vlgmr.msrb.gmra.mxu1 %vm146_vm0, %v4389_v24  ;;  %4715 = vst.msk [vmem:[#allocation2] sm:$0xff] %vm146_vm0, %v4389_v24  ;;  %4941 = vmatmul.msk.f32.vlgmr.msrb.gmra.mxu3 %vm146_vm0, %v4389_v24 }
 0xac0   :  { %4948 = vmatmul.msk.f32.vlgmr.msrb.gmra.mxu0 %vm146_vm0, %v4389_v24  ;;  %4658 = vmatpush.msrb.mxu1 %v6597_v20 }
 0xac1   :  { %4706 = vmatpush.msrb.mxu3 %v6601_v30 }
 0xac2   :  { %4659 = vmatpush.msrb.mxu1 %v6604_v3 }
 0xac3   :  { %4707 = vmatpush.msrb.mxu3 %v6608_v13 }
 0xac7   :  { %4944 = vmatmul.msk.f32.vlgmr.msra.gmra.mxu1 %vm146_vm0, %v4389_v24  ;;  %4946 = vmatmul.msk.f32.vlgmr.msra.gmra.mxu3 %vm146_vm0, %v4389_v24 }
 0xacf   :  { %4949 = vmatmul.msk.f32.vlgmr.msrb.gmra.mxu1 %vm146_vm0, %v4387_v39 }
 0xb3c   :  { %v4430_v44 = vpop.f32.mrf.mxu1 }
 0xb3d   :  { %v4431_v60 = vadd.f32 %v4430_v44, %v4407_v41  ;;  %v4637_v59 = vpop.f32.mrf.mxu0 }
 0xb3e   :  { %v4640_v41 = vadd.f32 %v6704_v37, %v4637_v59 }
 0xb3f   :  { %v4433_v18 = vadd.f32 %v6644_v38, %v4431_v60 }
 0xb41   :  { %v4939_v29 = vmul.f32 -1.442695, %v4433_v18 }
 0xb42   :  { %v4490_v20 = vpop.f32.mrf.mxu3 }
 0xb43   :  { %5214 = vpow2.f32 %v4939_v29  ;;  %v4491_v30 = vadd.f32 %v4490_v20, %v4470_v63 }
 0xb44   :  { %v4550_v48 = vpop.f32.mrf.mxu1 }
 0xb45   :  { %v4493_v3 = vadd.f32 %v6650_v15, %v4491_v30  ;;  %v4551_v15 = vadd.f32 %v4550_v48, %v4530_v4 }
 0xb47   :  { %v4942_v40 = vmul.f32 -1.442695, %v4493_v3  ;;  %v4553_v8 = vadd.f32 %v6662_v27, %v4551_v15 }
 0xb49   :  { %v5215_v13 = vpop.eup %5214  ;;  %5216 = vpow2.f32 %v4942_v40 }
 0xb4a   :  { %v4437_v6 = vadd.f32 1.0, %v5215_v13  ;;  %v4592_v17 = vpop.f32.mrf.mxu3 }
 0xb4b   :  { %v4593_v56 = vadd.f32 %v4592_v17, %v4572_v1 }
 0xb4c   :  { %5218 = vrcp.f32 %v4437_v6  ;;  %vm4443_vm2 = vweird.f32 %v4437_v6  ;;  %v4447_v43 = vand.u32 2147483647, %v4437_v6  ;;  %v4661_v24 = vpop.f32.mrf.mxu1 }
 0xb4d   :  { %v4595_v57 = vadd.f32 %v6656_v25, %v4593_v56  ;;  %v4449_v25 = vand.u32 2147483648, %v4437_v6  ;;  %v4664_v44 = vadd.f32 %v4661_v24, %v4640_v41 }
 0xb4e   :  { %vm4448_vm6 = vcmp.eq.f32.partialorder %v4447_v43, 8.507059e+37 }
 0xb4f   :  { %v5217_v45 = vpop.eup %5216  ;;  %v4947_v5 = vmul.f32 -1.442695, %v4595_v57  ;;  %v4450_v51 = vor.u32 1.1754944e-38, %v4449_v25 }
 0xb50   :  { %v4497_v38 = vadd.f32 1.0, %v5217_v45 }
 0xb51   :  { %5220 = vpow2.f32 %v4947_v5 }
 0xb52   :  { %v5219_v58 = vpop.eup %5218  ;;  %5222 = vrcp.f32 %v4497_v38  ;;  %v4509_v32 = vand.u32 2147483648, %v4497_v38  ;;  %v4507_v10 = vand.u32 2147483647, %v4497_v38  ;;  %vm4503_vm5 = vweird.f32 %v4497_v38 }
 0xb53   :  { %v4439_v33 = vmul.f32 %v5219_v58, %v4437_v6  ;;  %vm4444_vm1 = vweird.f32 %v5219_v58 }
 0xb54   :  { %vm4445_vm3 = vmor %vm4443_vm2, %vm4444_vm1  ;;  %v4510_v34 = vor.u32 1.1754944e-38, %v4509_v32  ;;  %vm4508_vm8 = vcmp.eq.f32.partialorder %v4507_v10, 8.507059e+37 }
 0xb55   :  { %v4440_v2 = vsub.f32 1.0, %v4439_v33 }
 0xb57   :  { %v5221_v22 = vpop.eup %5220  ;;  %v4441_v35 = vmul.f32 %v5219_v58, %v4440_v2 }
 0xb58   :  { %v5223_v42 = vpop.eup %5222  ;;  %v4599_v53 = vadd.f32 1.0, %v5221_v22 }
 0xb59   :  { %v4499_v47 = vmul.f32 %v5223_v42, %v4497_v38  ;;  %v4442_v14 = vadd.f32 %v5219_v58, %v4441_v35  ;;  %vm4504_vm4 = vweird.f32 %v5223_v42 }
 0xb5a   :  { %5224 = vrcp.f32 %v4599_v53  ;;  %vm4505_vm7 = vmor %vm4503_vm5, %vm4504_vm4  ;;  %v4611_v21 = vand.u32 2147483648, %v4599_v53  ;;  %vm4605_vm10 = vweird.f32 %v4599_v53  ;;  %v4609_v50 = vand.u32 2147483647, %v4599_v53 }
 0xb5b   :  { %v4500_v46 = vsub.f32 1.0, %v4499_v47  ;;  %5226 = vtanh.f32 %v4553_v8  ;;  %v4446_v31 = vsel %vm4445_vm3, %v5219_v58, %v4442_v14 }
 0xb5c   :  { %v4451_v7 = vsel %vm4448_vm6, %v4450_v51, %v4446_v31  ;;  %v4612_v54 = vor.u32 1.1754944e-38, %v4611_v21  ;;  %vm4610_vm12 = vcmp.eq.f32.partialorder %v4609_v50, 8.507059e+37 }
 0xb5d   :  { %v4501_v0 = vmul.f32 %v5223_v42, %v4500_v46 }
 0xb5f   :  { %v4502_v27 = vadd.f32 %v5223_v42, %v4501_v0 }
 0xb60   :  { %v5225_v36 = vpop.eup %5224 }
 0xb61   :  { %v4506_v23 = vsel %vm4505_vm7, %v5223_v42, %v4502_v27  ;;  %v4601_v62 = vmul.f32 %v5225_v36, %v4599_v53  ;;  %v5227_v28 = vpop.eup %5226  ;;  %vm4606_vm9 = vweird.f32 %v5225_v36 }
 0xb62   :  { %v4511_v11 = vsel %vm4508_vm8, %v4510_v34, %v4506_v23  ;;  %v4616_v16 = vmul.f32 %v5227_v28, %v4451_v7  ;;  %vm4607_vm11 = vmor %vm4605_vm10, %vm4606_vm9 }
 0xb63   :  { %v4615_v26 = vmul.f32 %v4511_v11, %v6666_v55  ;;  %v4602_v61 = vsub.f32 1.0, %v4601_v62 }
 0xb65   :  { %v4617_v49 = vadd.f32 %v4616_v16, %v4615_v26  ;;  %v4603_v39 = vmul.f32 %v5225_v36, %v4602_v61 }
 0xb67   :  { %5228 = vtanh.f32 %v4617_v49  ;;  %4718 = vst.msk [vmem:[#allocation3 + $0x8] sm:$0xff] %vm146_vm0, %v4617_v49  ;;  %v4604_v52 = vadd.f32 %v5225_v36, %v4603_v39  ;;  %4951 = vmatmul.msk.f32.vlgmr.msrb.gmra.mxu3 %vm146_vm0, %v4617_v49 }
 0xb69   :  { %v4608_v9 = vsel %vm4607_vm11, %v5225_v36, %v4604_v52 }
 0xb6a   :  { %v4613_v55 = vsel %vm4610_vm12, %v4612_v54, %v4608_v9 }
 0xb6d   :  { %v5229_v19 = vpop.eup %5228 }
 0xb6e   :  { %v4619_v12 = vmul.f32 %v5229_v19, %v4613_v55 }
 0xb70   :  { %4950 = vmatmul.msk.f32.vlgmr.msrb.gmra.mxu2 %vm146_vm0, %v4619_v12  ;;  %4717 = vst.msk [vmem:[#allocation2 + $0x8] sm:$0xff] %vm146_vm0, %v4619_v12 }
 0xbea   :  { %v4709_v63 = vpop.f32.mrf.mxu3 }
 0xbf3   :  { %v4685_v60 = vpop.f32.mrf.mxu2 }
 0xbf4   :  { %v4688_v18 = vadd.f32 %v4685_v60, %v4664_v44 }
 0xbf6   :  { %v4712_v29 = vadd.f32 %v4709_v63, %v4688_v18 }
 0xbf8   :  { %4714 = vst [vmem:[#allocation16 + $0x38] sm:$0xff] %v4712_v29 }
 0xbf9   :  { %4731 = dma.vmem_to_hbm [thread:$0]  %s4724_s24, 1024, %s4726_s26, [#allocation6], %s5531_s17, %s5531_s17, %s5532_s18  }
 0xbfa   :  { %5528 = dma.done.wait [#allocation6], 1024  }
 0xbfb   :  { %5529 = vsyncadd [#allocation6], 4294966272 }
 0xbfc   :  { %4736 = vsyncpa [#allocation5], 1 }
 0xbfd   :  { %4737 = vsyncpa [#allocation8], 1 }
 0xbfe   :  { %4738 = vsyncpa [#allocation11], 1 }
 0xbff   :  { %4739 = vsyncpa [#allocation14], 1 }
 0xc00   :  { %4740 = vsyncpa [#allocation6], 1 }

</bundles_post_ra>
